<compile_context>
chip_gen: v7x
topology: tpu7x:2x2x1
jax: 0.10.0
libtpu: 0.0.40
codegen_flags: <defaults>
</compile_context>

<pallas_src>
import functools

import jax
import jax.numpy as jnp
from jax.experimental import pallas as pl
from jax.experimental.pallas import tpu as pltpu


def _round_up(x, m):
    return (x + m - 1) // m * m


def encoder_gru_kernel(num_layers, T, B, H, x_ref, *refs):
    """Fused multi-layer GRU forward (no grid, all operands VMEM resident).

    Inputs (after x_ref), 4 per layer:
      w_i    (in_pad, 3H) bf16  -- input weights, gate order r,z,n per 128-block
      w_h    (H, 3H)      bf16  -- hidden weights
      b_rzn  (1, 3H)      f32   -- b_ih (all gates) + b_hh folded in for r,z
      b_hn   (1, H)       f32   -- b_hh n-gate (must be scaled by r in-loop)
    Outputs:
      y_ref   (T, B, H) f32     -- top-layer output for every timestep
      hid_ref (L, B, H) f32     -- final hidden state of every layer
    Scratch:
      y_buf  (T, B, H)  f32     -- inter-layer activations
      gx_buf (T, B, 3H) f32     -- hoisted input-projection gate preacts
    """
    n_w = 4 * num_layers
    w_refs = refs[:n_w]
    y_ref, hid_ref = refs[n_w], refs[n_w + 1]
    y_buf, gx_buf = refs[n_w + 2], refs[n_w + 3]

    for l in range(num_layers):
        w_i_ref = w_refs[4 * l]
        w_h_ref = w_refs[4 * l + 1]
        b_rzn = w_refs[4 * l + 2][...]          # (1, 3H)
        b_hn = w_refs[4 * l + 3][...]           # (1, H)

        # ---- Hoisted input projection: one (T*B, in) x (in, 3H) GEMM. ----
        # w_i's value dies here; it is never live across the recurrence.
        xin_ref = x_ref if l == 0 else y_buf
        xin = xin_ref[...]                                   # (T, B, in)
        xin2d = xin.reshape(T * B, xin.shape[-1]).astype(jnp.bfloat16)
        gx = jnp.dot(xin2d, w_i_ref[...],
                     preferred_element_type=jnp.float32) + b_rzn
        gx_buf[...] = gx.reshape(T, B, 3 * H)

        out_ref = y_ref if l == num_layers - 1 else y_buf

        # Hoist the (1,H)->(B,H) n-gate hidden-bias broadcast once per layer
        # (JAX does not CSE broadcast_in_dim).
        b_hn_b = jnp.broadcast_to(b_hn, (B, H))

        # ---- t = 0 peeled: h0 == 0 (PyTorch default), hidden matmul skipped.
        gx0 = gx_buf[0]
        r0 = jax.nn.sigmoid(gx0[:, 0 * H:1 * H])
        z0 = jax.nn.sigmoid(gx0[:, 1 * H:2 * H])
        n0 = jnp.tanh(gx0[:, 2 * H:3 * H] + r0 * b_hn_b)
        h1 = (1.0 - z0) * n0
        out_ref[0] = h1

        # ---- Steps 1..T-1: h carried as a value (vreg resident), fully
        # unrolled; w_h re-read from VMEM inside each step so its live range
        # stays within the step body.
        def step(t, h):
            gx_t = gx_buf[t]                                 # (B, 3H) f32
            gh = jnp.dot(h.astype(jnp.bfloat16), w_h_ref[...],
                         preferred_element_type=jnp.float32)
            r = jax.nn.sigmoid(gx_t[:, 0 * H:1 * H] + gh[:, 0 * H:1 * H])
            z = jax.nn.sigmoid(gx_t[:, 1 * H:2 * H] + gh[:, 1 * H:2 * H])
            n = jnp.tanh(gx_t[:, 2 * H:3 * H] + r * (gh[:, 2 * H:3 * H] + b_hn_b))
            h_new = (1.0 - z) * n + z * h
            out_ref[t] = h_new
            return h_new

        h_last = h1
        if T > 1:
            h_last = jax.lax.fori_loop(1, T, step, h1, unroll=True)

        hid_ref[l] = h_last


def _pack_w(w, in_size, in_pad, H, H_pad):
    """PyTorch (3H, in) gate-stacked weight -> padded (in_pad, 3*H_pad), transposed."""
    out = jnp.zeros((in_pad, 3 * H_pad), jnp.float32)
    for g in range(3):  # gate order r, z, n
        blk = w[g * H:(g + 1) * H, :].T                      # (in_size, H)
        out = out.at[:in_size, g * H_pad:g * H_pad + H].set(blk)
    return out


def _pack_b_rzn(b_ih, b_hh, H, H_pad):
    """b_ih for all gates, with b_hh folded in for the r and z gates only."""
    out = jnp.zeros((1, 3 * H_pad), jnp.float32)
    for g in range(3):
        b = b_ih[g * H:(g + 1) * H]
        if g < 2:
            b = b + b_hh[g * H:(g + 1) * H]
        out = out.at[0, g * H_pad:g * H_pad + H].set(b)
    return out


def _pack_b_hn(b_hh, H, H_pad):
    out = jnp.zeros((1, H_pad), jnp.float32)
    return out.at[0, :H].set(b_hh[2 * H:3 * H])


def encoder_rnn_forward(x_bti, params):
    """EncoderRNN.forward: x (B, T, input_size) ->
       output (B, T, H), hidden (num_layers, B, H) with H = hidden_size*30."""
    B, T, I = x_bti.shape
    num_layers = len(params)
    H = params[0]["w_hh"].shape[1]
    H_pad = _round_up(H, 128)
    B_pad = _round_up(B, 8)
    I_pad = _round_up(I, 128)

    # time-major + zero padding (padded lanes/rows provably stay inert)
    x = jnp.transpose(x_bti, (1, 0, 2)).astype(jnp.float32)
    x = jnp.pad(x, ((0, 0), (0, B_pad - B), (0, I_pad - I)))

    flat = []
    for l, p in enumerate(params):
        in_size = I if l == 0 else H
        in_pad = I_pad if l == 0 else H_pad
        flat.append(_pack_w(p["w_ih"], in_size, in_pad, H, H_pad).astype(jnp.bfloat16))
        flat.append(_pack_w(p["w_hh"], H, H_pad, H, H_pad).astype(jnp.bfloat16))
        flat.append(_pack_b_rzn(p["b_ih"], p["b_hh"], H, H_pad))
        flat.append(_pack_b_hn(p["b_hh"], H, H_pad))

    kernel = functools.partial(encoder_gru_kernel, num_layers, T, B_pad, H_pad)
    n_in = 1 + 4 * num_layers
    vmem_spec = lambda: pl.BlockSpec(memory_space=pltpu.MemorySpace.VMEM)

    # Resident VMEM footprint (no grid => no double buffering); used to size
    # the scoped-VMEM limit so production shapes don't hit the 16/32 MiB default.
    f32, bf16 = 4, 2
    footprint = T * B_pad * I_pad * f32                              # x
    for l in range(num_layers):
        in_pad = I_pad if l == 0 else H_pad
        footprint += in_pad * 3 * H_pad * bf16                       # w_i
        footprint += H_pad * 3 * H_pad * bf16                        # w_h
        footprint += 8 * 3 * H_pad * f32 + 8 * H_pad * f32           # biases (sublane-padded)
    footprint += T * B_pad * H_pad * f32                             # y
    footprint += num_layers * B_pad * H_pad * f32                    # hidden
    footprint += T * B_pad * H_pad * f32                             # y_buf scratch
    footprint += T * B_pad * 3 * H_pad * f32                         # gx_buf scratch
    vmem_limit = int(min(100 * 1024 * 1024, max(2 * footprint, 16 * 1024 * 1024)))

    y_pad, hid_pad = pl.pallas_call(
        kernel,
        out_shape=[
            jax.ShapeDtypeStruct((T, B_pad, H_pad), jnp.float32),
            jax.ShapeDtypeStruct((num_layers, B_pad, H_pad), jnp.float32),
        ],
        in_specs=[vmem_spec() for _ in range(n_in)],
        out_specs=[vmem_spec(), vmem_spec()],
        scratch_shapes=[
            pltpu.VMEM((T, B_pad, H_pad), jnp.float32),      # inter-layer output buffer
            pltpu.VMEM((T, B_pad, 3 * H_pad), jnp.float32),  # precomputed x-gates
        ],
        compiler_params=pltpu.CompilerParams(vmem_limit_bytes=vmem_limit),
    )(x, *flat)

    output = jnp.transpose(y_pad[:, :B, :H], (1, 0, 2))      # (B, T, H)
    hidden = hid_pad[:, :B, :H]                              # (L, B, H)
    return output, hidden


def init_encoder_rnn_params(key, input_size, hidden_size, num_layers):
    """nn.GRU-shaped params per layer: weight_ih (3H,in), weight_hh (3H,H),
    bias_ih (3H,), bias_hh (3H,). Gate order r, z, n."""
    H = hidden_size * 30
    bound = 1.0 / (H ** 0.5)
    params = []
    for layer in range(num_layers):
        in_size = input_size if layer == 0 else H
        key, k1, k2, k3, k4 = jax.random.split(key, 5)
        params.append({
            "w_ih": jax.random.uniform(k1, (3 * H, in_size), jnp.float32, -bound, bound),
            "w_hh": jax.random.uniform(k2, (3 * H, H), jnp.float32, -bound, bound),
            "b_ih": jax.random.uniform(k3, (3 * H,), jnp.float32, -bound, bound),
            "b_hh": jax.random.uniform(k4, (3 * H,), jnp.float32, -bound, bound),
        })
    return params


def gru_reference(x_bti, params):
    """Pure-JAX lax.scan reference (same bf16-matmul / f32-accum convention).
    Note: weights are cast to bf16 in both paths, so results diverge from a
    true f32 PyTorch GRU at the ~1e-3 level."""
    x = jnp.transpose(x_bti, (1, 0, 2)).astype(jnp.float32)
    h_finals = []
    for p in params:
        H = p["w_hh"].shape[1]
        w_i = p["w_ih"].T.astype(jnp.bfloat16)
        w_h = p["w_hh"].T.astype(jnp.bfloat16)
        b_i, b_h = p["b_ih"], p["b_hh"]
        B = x.shape[1]

        def step(h, x_t, w_i=w_i, w_h=w_h, b_i=b_i, b_h=b_h, H=H):
            gx = jnp.dot(x_t.astype(jnp.bfloat16), w_i,
                         preferred_element_type=jnp.float32) + b_i
            gh = jnp.dot(h.astype(jnp.bfloat16), w_h,
                         preferred_element_type=jnp.float32) + b_h
            r = jax.nn.sigmoid(gx[:, :H] + gh[:, :H])
            z = jax.nn.sigmoid(gx[:, H:2 * H] + gh[:, H:2 * H])
            n = jnp.tanh(gx[:, 2 * H:] + r * gh[:, 2 * H:])
            h_new = (1.0 - z) * n + z * h
            return h_new, h_new

        h0 = jnp.zeros((B, H), jnp.float32)
        h_last, ys = jax.lax.scan(step, h0, x)
        x = ys
        h_finals.append(h_last)
    return jnp.transpose(x, (1, 0, 2)), jnp.stack(h_finals, axis=0)


if __name__ == "__main__":
    input_size = 16
    hidden_size = 4          # GRU hidden width = hidden_size * 30 = 120
    num_layers = 2
    B, T = 2, 8

    key = jax.random.PRNGKey(0)
    key, kx, kp = jax.random.split(key, 3)
    x = jax.random.normal(kx, (B, T, input_size), jnp.float32)
    params = init_encoder_rnn_params(kp, input_size, hidden_size, num_layers)

    output, hidden = encoder_rnn_forward(x, params)
    output = jax.block_until_ready(output)
    hidden = jax.block_until_ready(hidden)

    ref_out, ref_hidden = gru_reference(x, params)
    assert output.shape == (B, T, hidden_size * 30)
    assert hidden.shape == (num_layers, B, hidden_size * 30)
    # bf16 matmuls in both paths; only accumulation-order differences remain.
    assert jnp.allclose(output, ref_out, atol=3e-3, rtol=3e-3)
    assert jnp.allclose(hidden, ref_hidden, atol=3e-3, rtol=3e-3)

    print("KERNEL_OK")
</pallas_src>

<mosaic_0001>
module attributes {stable_mosaic.version = 11 : i64} {
  func.func @encoder_gru_kernel(%arg0: memref<8x8x128xf32, #tpu.memory_space<vmem>>, %arg1: memref<128x384xbf16, #tpu.memory_space<vmem>>, %arg2: memref<128x384xbf16, #tpu.memory_space<vmem>>, %arg3: memref<1x384xf32, #tpu.memory_space<vmem>>, %arg4: memref<1x128xf32, #tpu.memory_space<vmem>>, %arg5: memref<128x384xbf16, #tpu.memory_space<vmem>>, %arg6: memref<128x384xbf16, #tpu.memory_space<vmem>>, %arg7: memref<1x384xf32, #tpu.memory_space<vmem>>, %arg8: memref<1x128xf32, #tpu.memory_space<vmem>>, %arg9: memref<8x8x128xf32, #tpu.memory_space<vmem>>, %arg10: memref<2x8x128xf32, #tpu.memory_space<vmem>>, %arg11: memref<8x8x128xf32, #tpu.memory_space<vmem>>, %arg12: memref<8x8x384xf32, #tpu.memory_space<vmem>>) attributes {dimension_semantics = [], scalar_prefetch = 0 : i64, scratch_operands = 2 : i64, tpu.core_type = #tpu.core_type<tc>} {
    %c0 = arith.constant 0 : index
    %c0_0 = arith.constant 0 : index
    %0 = vector.load %arg3[%c0, %c0_0] : memref<1x384xf32, #tpu.memory_space<vmem>>, vector<1x384xf32>
    %c0_1 = arith.constant 0 : index
    %c0_2 = arith.constant 0 : index
    %1 = vector.load %arg4[%c0_1, %c0_2] : memref<1x128xf32, #tpu.memory_space<vmem>>, vector<1x128xf32>
    %c0_3 = arith.constant 0 : index
    %c0_4 = arith.constant 0 : index
    %c0_5 = arith.constant 0 : index
    %2 = vector.load %arg0[%c0_3, %c0_4, %c0_5] : memref<8x8x128xf32, #tpu.memory_space<vmem>>, vector<8x8x128xf32>
    %3 = vector.shape_cast %2 : vector<8x8x128xf32> to vector<64x128xf32>
    %4 = arith.truncf %3 : vector<64x128xf32> to vector<64x128xbf16>
    %c0_6 = arith.constant 0 : index
    %c0_7 = arith.constant 0 : index
    %5 = vector.load %arg1[%c0_6, %c0_7] : memref<128x384xbf16, #tpu.memory_space<vmem>>, vector<128x384xbf16>
    %cst = arith.constant dense<0.000000e+00> : vector<64x384xf32>
    %6 = tpu.matmul %4, %5, %cst {dimension_numbers = #tpu.dot_dimension_numbers<[1], [0], [0], [1], [0, 0, 1, 1], [], []>} : vector<64x128xbf16>, vector<128x384xbf16>, vector<64x384xf32> -> vector<64x384xf32>
    %7 = vector.broadcast %0 : vector<1x384xf32> to vector<64x384xf32>
    %8 = arith.addf %6, %7 : vector<64x384xf32>
    %9 = vector.shape_cast %8 : vector<64x384xf32> to vector<8x8x384xf32>
    %c0_8 = arith.constant 0 : index
    %c0_9 = arith.constant 0 : index
    %c0_10 = arith.constant 0 : index
    %10 = vector.load %arg12[%c0_8, %c0_9, %c0_10] : memref<8x8x384xf32, #tpu.memory_space<vmem>>, vector<8x8x384xf32>
    tpu.vector_store %arg12[%c0_8, %c0_9, %c0_10], %9 {strides = array<i32>} : memref<8x8x384xf32, #tpu.memory_space<vmem>>, vector<8x8x384xf32>,
    %11 = vector.shape_cast %1 : vector<1x128xf32> to vector<1x128xf32>
    %12 = vector.broadcast %11 : vector<1x128xf32> to vector<8x128xf32>
    %c0_11 = arith.constant 0 : index
    %c0_12 = arith.constant 0 : index
    %c0_13 = arith.constant 0 : index
    %13 = vector.load %arg12[%c0_11, %c0_12, %c0_13] : memref<8x8x384xf32, #tpu.memory_space<vmem>>, vector<1x8x384xf32>
    %14 = vector.shape_cast %13 : vector<1x8x384xf32> to vector<8x384xf32>
    %15 = vector.extract_strided_slice %14 {offsets = [0, 0], sizes = [8, 128], strides = [1, 1]} : vector<8x384xf32> to vector<8x128xf32>
    %16 = arith.negf %15 : vector<8x128xf32>
    %17 = math.exp %16 : vector<8x128xf32>
    %cst_14 = arith.constant 1.000000e+00 : f32
    %18 = vector.broadcast %cst_14 : f32 to vector<8x128xf32>
    %19 = arith.addf %18, %17 : vector<8x128xf32>
    %20 = arith.divf %18, %19 : vector<8x128xf32>
    %21 = vector.extract_strided_slice %14 {offsets = [0, 128], sizes = [8, 128], strides = [1, 1]} : vector<8x384xf32> to vector<8x128xf32>
    %22 = arith.negf %21 : vector<8x128xf32>
    %23 = math.exp %22 : vector<8x128xf32>
    %cst_15 = arith.constant 1.000000e+00 : f32
    %24 = vector.broadcast %cst_15 : f32 to vector<8x128xf32>
    %25 = arith.addf %24, %23 : vector<8x128xf32>
    %26 = arith.divf %24, %25 : vector<8x128xf32>
    %27 = vector.extract_strided_slice %14 {offsets = [0, 256], sizes = [8, 128], strides = [1, 1]} : vector<8x384xf32> to vector<8x128xf32>
    %28 = arith.mulf %20, %12 : vector<8x128xf32>
    %29 = arith.addf %27, %28 : vector<8x128xf32>
    %30 = math.tanh %29 : vector<8x128xf32>
    %cst_16 = arith.constant 1.000000e+00 : f32
    %31 = vector.broadcast %cst_16 : f32 to vector<8x128xf32>
    %32 = arith.subf %31, %26 : vector<8x128xf32>
    %33 = arith.mulf %32, %30 : vector<8x128xf32>
    %c0_17 = arith.constant 0 : index
    %c0_18 = arith.constant 0 : index
    %c0_19 = arith.constant 0 : index
    %34 = vector.load %arg11[%c0_17, %c0_18, %c0_19] : memref<8x8x128xf32, #tpu.memory_space<vmem>>, vector<1x8x128xf32>
    %35 = vector.shape_cast %34 : vector<1x8x128xf32> to vector<8x128xf32>
    %36 = vector.shape_cast %33 : vector<8x128xf32> to vector<1x8x128xf32>
    tpu.vector_store %arg11[%c0_17, %c0_18, %c0_19], %36 {strides = array<i32>} : memref<8x8x128xf32, #tpu.memory_space<vmem>>, vector<1x8x128xf32>,
    %c1_i32 = arith.constant 1 : i32
    %37 = arith.index_cast %c1_i32 : i32 to index
    %c0_20 = arith.constant 0 : index
    %c0_21 = arith.constant 0 : index
    %38 = vector.load %arg12[%37, %c0_20, %c0_21] : memref<8x8x384xf32, #tpu.memory_space<vmem>>, vector<1x8x384xf32>
    %39 = vector.shape_cast %38 : vector<1x8x384xf32> to vector<8x384xf32>
    %40 = arith.truncf %33 : vector<8x128xf32> to vector<8x128xbf16>
    %c0_22 = arith.constant 0 : index
    %c0_23 = arith.constant 0 : index
    %41 = vector.load %arg2[%c0_22, %c0_23] : memref<128x384xbf16, #tpu.memory_space<vmem>>, vector<128x384xbf16>
    %cst_24 = arith.constant dense<0.000000e+00> : vector<8x384xf32>
    %42 = tpu.matmul %40, %41, %cst_24 {dimension_numbers = #tpu.dot_dimension_numbers<[1], [0], [0], [1], [0, 0, 1, 1], [], []>} : vector<8x128xbf16>, vector<128x384xbf16>, vector<8x384xf32> -> vector<8x384xf32>
    %43 = vector.extract_strided_slice %39 {offsets = [0, 0], sizes = [8, 128], strides = [1, 1]} : vector<8x384xf32> to vector<8x128xf32>
    %44 = vector.extract_strided_slice %42 {offsets = [0, 0], sizes = [8, 128], strides = [1, 1]} : vector<8x384xf32> to vector<8x128xf32>
    %45 = arith.addf %43, %44 : vector<8x128xf32>
    %46 = arith.negf %45 : vector<8x128xf32>
    %47 = math.exp %46 : vector<8x128xf32>
    %cst_25 = arith.constant 1.000000e+00 : f32
    %48 = vector.broadcast %cst_25 : f32 to vector<8x128xf32>
    %49 = arith.addf %48, %47 : vector<8x128xf32>
    %50 = arith.divf %48, %49 : vector<8x128xf32>
    %51 = vector.extract_strided_slice %39 {offsets = [0, 128], sizes = [8, 128], strides = [1, 1]} : vector<8x384xf32> to vector<8x128xf32>
    %52 = vector.extract_strided_slice %42 {offsets = [0, 128], sizes = [8, 128], strides = [1, 1]} : vector<8x384xf32> to vector<8x128xf32>
    %53 = arith.addf %51, %52 : vector<8x128xf32>
    %54 = arith.negf %53 : vector<8x128xf32>
    %55 = math.exp %54 : vector<8x128xf32>
    %cst_26 = arith.constant 1.000000e+00 : f32
    %56 = vector.broadcast %cst_26 : f32 to vector<8x128xf32>
    %57 = arith.addf %56, %55 : vector<8x128xf32>
    %58 = arith.divf %56, %57 : vector<8x128xf32>
    %59 = vector.extract_strided_slice %39 {offsets = [0, 256], sizes = [8, 128], strides = [1, 1]} : vector<8x384xf32> to vector<8x128xf32>
    %60 = vector.extract_strided_slice %42 {offsets = [0, 256], sizes = [8, 128], strides = [1, 1]} : vector<8x384xf32> to vector<8x128xf32>
    %61 = arith.addf %60, %12 : vector<8x128xf32>
    %62 = arith.mulf %50, %61 : vector<8x128xf32>
    %63 = arith.addf %59, %62 : vector<8x128xf32>
    %64 = math.tanh %63 : vector<8x128xf32>
    %cst_27 = arith.constant 1.000000e+00 : f32
    %65 = vector.broadcast %cst_27 : f32 to vector<8x128xf32>
    %66 = arith.subf %65, %58 : vector<8x128xf32>
    %67 = arith.mulf %66, %64 : vector<8x128xf32>
    %68 = arith.mulf %58, %33 : vector<8x128xf32>
    %69 = arith.addf %67, %68 : vector<8x128xf32>
    %70 = arith.index_cast %c1_i32 : i32 to index
    %c0_28 = arith.constant 0 : index
    %c0_29 = arith.constant 0 : index
    %71 = vector.load %arg11[%70, %c0_28, %c0_29] : memref<8x8x128xf32, #tpu.memory_space<vmem>>, vector<1x8x128xf32>
    %72 = vector.shape_cast %71 : vector<1x8x128xf32> to vector<8x128xf32>
    %73 = vector.shape_cast %69 : vector<8x128xf32> to vector<1x8x128xf32>
    tpu.vector_store %arg11[%70, %c0_28, %c0_29], %73 {strides = array<i32>} : memref<8x8x128xf32, #tpu.memory_space<vmem>>, vector<1x8x128xf32>,
    %c2_i32 = arith.constant 2 : i32
    %74 = arith.index_cast %c2_i32 : i32 to index
    %c0_30 = arith.constant 0 : index
    %c0_31 = arith.constant 0 : index
    %75 = vector.load %arg12[%74, %c0_30, %c0_31] : memref<8x8x384xf32, #tpu.memory_space<vmem>>, vector<1x8x384xf32>
    %76 = vector.shape_cast %75 : vector<1x8x384xf32> to vector<8x384xf32>
    %77 = arith.truncf %69 : vector<8x128xf32> to vector<8x128xbf16>
    %c0_32 = arith.constant 0 : index
    %c0_33 = arith.constant 0 : index
    %78 = vector.load %arg2[%c0_32, %c0_33] : memref<128x384xbf16, #tpu.memory_space<vmem>>, vector<128x384xbf16>
    %cst_34 = arith.constant dense<0.000000e+00> : vector<8x384xf32>
    %79 = tpu.matmul %77, %78, %cst_34 {dimension_numbers = #tpu.dot_dimension_numbers<[1], [0], [0], [1], [0, 0, 1, 1], [], []>} : vector<8x128xbf16>, vector<128x384xbf16>, vector<8x384xf32> -> vector<8x384xf32>
    %80 = vector.extract_strided_slice %76 {offsets = [0, 0], sizes = [8, 128], strides = [1, 1]} : vector<8x384xf32> to vector<8x128xf32>
    %81 = vector.extract_strided_slice %79 {offsets = [0, 0], sizes = [8, 128], strides = [1, 1]} : vector<8x384xf32> to vector<8x128xf32>
    %82 = arith.addf %80, %81 : vector<8x128xf32>
    %83 = arith.negf %82 : vector<8x128xf32>
    %84 = math.exp %83 : vector<8x128xf32>
    %cst_35 = arith.constant 1.000000e+00 : f32
    %85 = vector.broadcast %cst_35 : f32 to vector<8x128xf32>
    %86 = arith.addf %85, %84 : vector<8x128xf32>
    %87 = arith.divf %85, %86 : vector<8x128xf32>
    %88 = vector.extract_strided_slice %76 {offsets = [0, 128], sizes = [8, 128], strides = [1, 1]} : vector<8x384xf32> to vector<8x128xf32>
    %89 = vector.extract_strided_slice %79 {offsets = [0, 128], sizes = [8, 128], strides = [1, 1]} : vector<8x384xf32> to vector<8x128xf32>
    %90 = arith.addf %88, %89 : vector<8x128xf32>
    %91 = arith.negf %90 : vector<8x128xf32>
    %92 = math.exp %91 : vector<8x128xf32>
    %cst_36 = arith.constant 1.000000e+00 : f32
    %93 = vector.broadcast %cst_36 : f32 to vector<8x128xf32>
    %94 = arith.addf %93, %92 : vector<8x128xf32>
    %95 = arith.divf %93, %94 : vector<8x128xf32>
    %96 = vector.extract_strided_slice %76 {offsets = [0, 256], sizes = [8, 128], strides = [1, 1]} : vector<8x384xf32> to vector<8x128xf32>
    %97 = vector.extract_strided_slice %79 {offsets = [0, 256], sizes = [8, 128], strides = [1, 1]} : vector<8x384xf32> to vector<8x128xf32>
    %98 = arith.addf %97, %12 : vector<8x128xf32>
    %99 = arith.mulf %87, %98 : vector<8x128xf32>
    %100 = arith.addf %96, %99 : vector<8x128xf32>
    %101 = math.tanh %100 : vector<8x128xf32>
    %cst_37 = arith.constant 1.000000e+00 : f32
    %102 = vector.broadcast %cst_37 : f32 to vector<8x128xf32>
    %103 = arith.subf %102, %95 : vector<8x128xf32>
    %104 = arith.mulf %103, %101 : vector<8x128xf32>
    %105 = arith.mulf %95, %69 : vector<8x128xf32>
    %106 = arith.addf %104, %105 : vector<8x128xf32>
    %107 = arith.index_cast %c2_i32 : i32 to index
    %c0_38 = arith.constant 0 : index
    %c0_39 = arith.constant 0 : index
    %108 = vector.load %arg11[%107, %c0_38, %c0_39] : memref<8x8x128xf32, #tpu.memory_space<vmem>>, vector<1x8x128xf32>
    %109 = vector.shape_cast %108 : vector<1x8x128xf32> to vector<8x128xf32>
    %110 = vector.shape_cast %106 : vector<8x128xf32> to vector<1x8x128xf32>
    tpu.vector_store %arg11[%107, %c0_38, %c0_39], %110 {strides = array<i32>} : memref<8x8x128xf32, #tpu.memory_space<vmem>>, vector<1x8x128xf32>,
    %c3_i32 = arith.constant 3 : i32
    %111 = arith.index_cast %c3_i32 : i32 to index
    %c0_40 = arith.constant 0 : index
    %c0_41 = arith.constant 0 : index
    %112 = vector.load %arg12[%111, %c0_40, %c0_41] : memref<8x8x384xf32, #tpu.memory_space<vmem>>, vector<1x8x384xf32>
    %113 = vector.shape_cast %112 : vector<1x8x384xf32> to vector<8x384xf32>
    %114 = arith.truncf %106 : vector<8x128xf32> to vector<8x128xbf16>
    %c0_42 = arith.constant 0 : index
    %c0_43 = arith.constant 0 : index
    %115 = vector.load %arg2[%c0_42, %c0_43] : memref<128x384xbf16, #tpu.memory_space<vmem>>, vector<128x384xbf16>
    %cst_44 = arith.constant dense<0.000000e+00> : vector<8x384xf32>
    %116 = tpu.matmul %114, %115, %cst_44 {dimension_numbers = #tpu.dot_dimension_numbers<[1], [0], [0], [1], [0, 0, 1, 1], [], []>} : vector<8x128xbf16>, vector<128x384xbf16>, vector<8x384xf32> -> vector<8x384xf32>
    %117 = vector.extract_strided_slice %113 {offsets = [0, 0], sizes = [8, 128], strides = [1, 1]} : vector<8x384xf32> to vector<8x128xf32>
    %118 = vector.extract_strided_slice %116 {offsets = [0, 0], sizes = [8, 128], strides = [1, 1]} : vector<8x384xf32> to vector<8x128xf32>
    %119 = arith.addf %117, %118 : vector<8x128xf32>
    %120 = arith.negf %119 : vector<8x128xf32>
    %121 = math.exp %120 : vector<8x128xf32>
    %cst_45 = arith.constant 1.000000e+00 : f32
    %122 = vector.broadcast %cst_45 : f32 to vector<8x128xf32>
    %123 = arith.addf %122, %121 : vector<8x128xf32>
    %124 = arith.divf %122, %123 : vector<8x128xf32>
    %125 = vector.extract_strided_slice %113 {offsets = [0, 128], sizes = [8, 128], strides = [1, 1]} : vector<8x384xf32> to vector<8x128xf32>
    %126 = vector.extract_strided_slice %116 {offsets = [0, 128], sizes = [8, 128], strides = [1, 1]} : vector<8x384xf32> to vector<8x128xf32>
    %127 = arith.addf %125, %126 : vector<8x128xf32>
    %128 = arith.negf %127 : vector<8x128xf32>
    %129 = math.exp %128 : vector<8x128xf32>
    %cst_46 = arith.constant 1.000000e+00 : f32
    %130 = vector.broadcast %cst_46 : f32 to vector<8x128xf32>
    %131 = arith.addf %130, %129 : vector<8x128xf32>
    %132 = arith.divf %130, %131 : vector<8x128xf32>
    %133 = vector.extract_strided_slice %113 {offsets = [0, 256], sizes = [8, 128], strides = [1, 1]} : vector<8x384xf32> to vector<8x128xf32>
    %134 = vector.extract_strided_slice %116 {offsets = [0, 256], sizes = [8, 128], strides = [1, 1]} : vector<8x384xf32> to vector<8x128xf32>
    %135 = arith.addf %134, %12 : vector<8x128xf32>
    %136 = arith.mulf %124, %135 : vector<8x128xf32>
    %137 = arith.addf %133, %136 : vector<8x128xf32>
    %138 = math.tanh %137 : vector<8x128xf32>
    %cst_47 = arith.constant 1.000000e+00 : f32
    %139 = vector.broadcast %cst_47 : f32 to vector<8x128xf32>
    %140 = arith.subf %139, %132 : vector<8x128xf32>
    %141 = arith.mulf %140, %138 : vector<8x128xf32>
    %142 = arith.mulf %132, %106 : vector<8x128xf32>
    %143 = arith.addf %141, %142 : vector<8x128xf32>
    %144 = arith.index_cast %c3_i32 : i32 to index
    %c0_48 = arith.constant 0 : index
    %c0_49 = arith.constant 0 : index
    %145 = vector.load %arg11[%144, %c0_48, %c0_49] : memref<8x8x128xf32, #tpu.memory_space<vmem>>, vector<1x8x128xf32>
    %146 = vector.shape_cast %145 : vector<1x8x128xf32> to vector<8x128xf32>
    %147 = vector.shape_cast %143 : vector<8x128xf32> to vector<1x8x128xf32>
    tpu.vector_store %arg11[%144, %c0_48, %c0_49], %147 {strides = array<i32>} : memref<8x8x128xf32, #tpu.memory_space<vmem>>, vector<1x8x128xf32>,
    %c4_i32 = arith.constant 4 : i32
    %148 = arith.index_cast %c4_i32 : i32 to index
    %c0_50 = arith.constant 0 : index
    %c0_51 = arith.constant 0 : index
    %149 = vector.load %arg12[%148, %c0_50, %c0_51] : memref<8x8x384xf32, #tpu.memory_space<vmem>>, vector<1x8x384xf32>
    %150 = vector.shape_cast %149 : vector<1x8x384xf32> to vector<8x384xf32>
    %151 = arith.truncf %143 : vector<8x128xf32> to vector<8x128xbf16>
    %c0_52 = arith.constant 0 : index
    %c0_53 = arith.constant 0 : index
    %152 = vector.load %arg2[%c0_52, %c0_53] : memref<128x384xbf16, #tpu.memory_space<vmem>>, vector<128x384xbf16>
    %cst_54 = arith.constant dense<0.000000e+00> : vector<8x384xf32>
    %153 = tpu.matmul %151, %152, %cst_54 {dimension_numbers = #tpu.dot_dimension_numbers<[1], [0], [0], [1], [0, 0, 1, 1], [], []>} : vector<8x128xbf16>, vector<128x384xbf16>, vector<8x384xf32> -> vector<8x384xf32>
    %154 = vector.extract_strided_slice %150 {offsets = [0, 0], sizes = [8, 128], strides = [1, 1]} : vector<8x384xf32> to vector<8x128xf32>
    %155 = vector.extract_strided_slice %153 {offsets = [0, 0], sizes = [8, 128], strides = [1, 1]} : vector<8x384xf32> to vector<8x128xf32>
    %156 = arith.addf %154, %155 : vector<8x128xf32>
    %157 = arith.negf %156 : vector<8x128xf32>
    %158 = math.exp %157 : vector<8x128xf32>
    %cst_55 = arith.constant 1.000000e+00 : f32
    %159 = vector.broadcast %cst_55 : f32 to vector<8x128xf32>
    %160 = arith.addf %159, %158 : vector<8x128xf32>
    %161 = arith.divf %159, %160 : vector<8x128xf32>
    %162 = vector.extract_strided_slice %150 {offsets = [0, 128], sizes = [8, 128], strides = [1, 1]} : vector<8x384xf32> to vector<8x128xf32>
    %163 = vector.extract_strided_slice %153 {offsets = [0, 128], sizes = [8, 128], strides = [1, 1]} : vector<8x384xf32> to vector<8x128xf32>
    %164 = arith.addf %162, %163 : vector<8x128xf32>
    %165 = arith.negf %164 : vector<8x128xf32>
    %166 = math.exp %165 : vector<8x128xf32>
    %cst_56 = arith.constant 1.000000e+00 : f32
    %167 = vector.broadcast %cst_56 : f32 to vector<8x128xf32>
    %168 = arith.addf %167, %166 : vector<8x128xf32>
    %169 = arith.divf %167, %168 : vector<8x128xf32>
    %170 = vector.extract_strided_slice %150 {offsets = [0, 256], sizes = [8, 128], strides = [1, 1]} : vector<8x384xf32> to vector<8x128xf32>
    %171 = vector.extract_strided_slice %153 {offsets = [0, 256], sizes = [8, 128], strides = [1, 1]} : vector<8x384xf32> to vector<8x128xf32>
    %172 = arith.addf %171, %12 : vector<8x128xf32>
    %173 = arith.mulf %161, %172 : vector<8x128xf32>
    %174 = arith.addf %170, %173 : vector<8x128xf32>
    %175 = math.tanh %174 : vector<8x128xf32>
    %cst_57 = arith.constant 1.000000e+00 : f32
    %176 = vector.broadcast %cst_57 : f32 to vector<8x128xf32>
    %177 = arith.subf %176, %169 : vector<8x128xf32>
    %178 = arith.mulf %177, %175 : vector<8x128xf32>
    %179 = arith.mulf %169, %143 : vector<8x128xf32>
    %180 = arith.addf %178, %179 : vector<8x128xf32>
    %181 = arith.index_cast %c4_i32 : i32 to index
    %c0_58 = arith.constant 0 : index
    %c0_59 = arith.constant 0 : index
    %182 = vector.load %arg11[%181, %c0_58, %c0_59] : memref<8x8x128xf32, #tpu.memory_space<vmem>>, vector<1x8x128xf32>
    %183 = vector.shape_cast %182 : vector<1x8x128xf32> to vector<8x128xf32>
    %184 = vector.shape_cast %180 : vector<8x128xf32> to vector<1x8x128xf32>
    tpu.vector_store %arg11[%181, %c0_58, %c0_59], %184 {strides = array<i32>} : memref<8x8x128xf32, #tpu.memory_space<vmem>>, vector<1x8x128xf32>,
    %c5_i32 = arith.constant 5 : i32
    %185 = arith.index_cast %c5_i32 : i32 to index
    %c0_60 = arith.constant 0 : index
    %c0_61 = arith.constant 0 : index
    %186 = vector.load %arg12[%185, %c0_60, %c0_61] : memref<8x8x384xf32, #tpu.memory_space<vmem>>, vector<1x8x384xf32>
    %187 = vector.shape_cast %186 : vector<1x8x384xf32> to vector<8x384xf32>
    %188 = arith.truncf %180 : vector<8x128xf32> to vector<8x128xbf16>
    %c0_62 = arith.constant 0 : index
    %c0_63 = arith.constant 0 : index
    %189 = vector.load %arg2[%c0_62, %c0_63] : memref<128x384xbf16, #tpu.memory_space<vmem>>, vector<128x384xbf16>
    %cst_64 = arith.constant dense<0.000000e+00> : vector<8x384xf32>
    %190 = tpu.matmul %188, %189, %cst_64 {dimension_numbers = #tpu.dot_dimension_numbers<[1], [0], [0], [1], [0, 0, 1, 1], [], []>} : vector<8x128xbf16>, vector<128x384xbf16>, vector<8x384xf32> -> vector<8x384xf32>
    %191 = vector.extract_strided_slice %187 {offsets = [0, 0], sizes = [8, 128], strides = [1, 1]} : vector<8x384xf32> to vector<8x128xf32>
    %192 = vector.extract_strided_slice %190 {offsets = [0, 0], sizes = [8, 128], strides = [1, 1]} : vector<8x384xf32> to vector<8x128xf32>
    %193 = arith.addf %191, %192 : vector<8x128xf32>
    %194 = arith.negf %193 : vector<8x128xf32>
    %195 = math.exp %194 : vector<8x128xf32>
    %cst_65 = arith.constant 1.000000e+00 : f32
    %196 = vector.broadcast %cst_65 : f32 to vector<8x128xf32>
    %197 = arith.addf %196, %195 : vector<8x128xf32>
    %198 = arith.divf %196, %197 : vector<8x128xf32>
    %199 = vector.extract_strided_slice %187 {offsets = [0, 128], sizes = [8, 128], strides = [1, 1]} : vector<8x384xf32> to vector<8x128xf32>
    %200 = vector.extract_strided_slice %190 {offsets = [0, 128], sizes = [8, 128], strides = [1, 1]} : vector<8x384xf32> to vector<8x128xf32>
    %201 = arith.addf %199, %200 : vector<8x128xf32>
    %202 = arith.negf %201 : vector<8x128xf32>
    %203 = math.exp %202 : vector<8x128xf32>
    %cst_66 = arith.constant 1.000000e+00 : f32
    %204 = vector.broadcast %cst_66 : f32 to vector<8x128xf32>
    %205 = arith.addf %204, %203 : vector<8x128xf32>
    %206 = arith.divf %204, %205 : vector<8x128xf32>
    %207 = vector.extract_strided_slice %187 {offsets = [0, 256], sizes = [8, 128], strides = [1, 1]} : vector<8x384xf32> to vector<8x128xf32>
    %208 = vector.extract_strided_slice %190 {offsets = [0, 256], sizes = [8, 128], strides = [1, 1]} : vector<8x384xf32> to vector<8x128xf32>
    %209 = arith.addf %208, %12 : vector<8x128xf32>
    %210 = arith.mulf %198, %209 : vector<8x128xf32>
    %211 = arith.addf %207, %210 : vector<8x128xf32>
    %212 = math.tanh %211 : vector<8x128xf32>
    %cst_67 = arith.constant 1.000000e+00 : f32
    %213 = vector.broadcast %cst_67 : f32 to vector<8x128xf32>
    %214 = arith.subf %213, %206 : vector<8x128xf32>
    %215 = arith.mulf %214, %212 : vector<8x128xf32>
    %216 = arith.mulf %206, %180 : vector<8x128xf32>
    %217 = arith.addf %215, %216 : vector<8x128xf32>
    %218 = arith.index_cast %c5_i32 : i32 to index
    %c0_68 = arith.constant 0 : index
    %c0_69 = arith.constant 0 : index
    %219 = vector.load %arg11[%218, %c0_68, %c0_69] : memref<8x8x128xf32, #tpu.memory_space<vmem>>, vector<1x8x128xf32>
    %220 = vector.shape_cast %219 : vector<1x8x128xf32> to vector<8x128xf32>
    %221 = vector.shape_cast %217 : vector<8x128xf32> to vector<1x8x128xf32>
    tpu.vector_store %arg11[%218, %c0_68, %c0_69], %221 {strides = array<i32>} : memref<8x8x128xf32, #tpu.memory_space<vmem>>, vector<1x8x128xf32>,
    %c6_i32 = arith.constant 6 : i32
    %222 = arith.index_cast %c6_i32 : i32 to index
    %c0_70 = arith.constant 0 : index
    %c0_71 = arith.constant 0 : index
    %223 = vector.load %arg12[%222, %c0_70, %c0_71] : memref<8x8x384xf32, #tpu.memory_space<vmem>>, vector<1x8x384xf32>
    %224 = vector.shape_cast %223 : vector<1x8x384xf32> to vector<8x384xf32>
    %225 = arith.truncf %217 : vector<8x128xf32> to vector<8x128xbf16>
    %c0_72 = arith.constant 0 : index
    %c0_73 = arith.constant 0 : index
    %226 = vector.load %arg2[%c0_72, %c0_73] : memref<128x384xbf16, #tpu.memory_space<vmem>>, vector<128x384xbf16>
    %cst_74 = arith.constant dense<0.000000e+00> : vector<8x384xf32>
    %227 = tpu.matmul %225, %226, %cst_74 {dimension_numbers = #tpu.dot_dimension_numbers<[1], [0], [0], [1], [0, 0, 1, 1], [], []>} : vector<8x128xbf16>, vector<128x384xbf16>, vector<8x384xf32> -> vector<8x384xf32>
    %228 = vector.extract_strided_slice %224 {offsets = [0, 0], sizes = [8, 128], strides = [1, 1]} : vector<8x384xf32> to vector<8x128xf32>
    %229 = vector.extract_strided_slice %227 {offsets = [0, 0], sizes = [8, 128], strides = [1, 1]} : vector<8x384xf32> to vector<8x128xf32>
    %230 = arith.addf %228, %229 : vector<8x128xf32>
    %231 = arith.negf %230 : vector<8x128xf32>
    %232 = math.exp %231 : vector<8x128xf32>
    %cst_75 = arith.constant 1.000000e+00 : f32
    %233 = vector.broadcast %cst_75 : f32 to vector<8x128xf32>
    %234 = arith.addf %233, %232 : vector<8x128xf32>
    %235 = arith.divf %233, %234 : vector<8x128xf32>
    %236 = vector.extract_strided_slice %224 {offsets = [0, 128], sizes = [8, 128], strides = [1, 1]} : vector<8x384xf32> to vector<8x128xf32>
    %237 = vector.extract_strided_slice %227 {offsets = [0, 128], sizes = [8, 128], strides = [1, 1]} : vector<8x384xf32> to vector<8x128xf32>
    %238 = arith.addf %236, %237 : vector<8x128xf32>
    %239 = arith.negf %238 : vector<8x128xf32>
    %240 = math.exp %239 : vector<8x128xf32>
    %cst_76 = arith.constant 1.000000e+00 : f32
    %241 = vector.broadcast %cst_76 : f32 to vector<8x128xf32>
    %242 = arith.addf %241, %240 : vector<8x128xf32>
    %243 = arith.divf %241, %242 : vector<8x128xf32>
    %244 = vector.extract_strided_slice %224 {offsets = [0, 256], sizes = [8, 128], strides = [1, 1]} : vector<8x384xf32> to vector<8x128xf32>
    %245 = vector.extract_strided_slice %227 {offsets = [0, 256], sizes = [8, 128], strides = [1, 1]} : vector<8x384xf32> to vector<8x128xf32>
    %246 = arith.addf %245, %12 : vector<8x128xf32>
    %247 = arith.mulf %235, %246 : vector<8x128xf32>
    %248 = arith.addf %244, %247 : vector<8x128xf32>
    %249 = math.tanh %248 : vector<8x128xf32>
    %cst_77 = arith.constant 1.000000e+00 : f32
    %250 = vector.broadcast %cst_77 : f32 to vector<8x128xf32>
    %251 = arith.subf %250, %243 : vector<8x128xf32>
    %252 = arith.mulf %251, %249 : vector<8x128xf32>
    %253 = arith.mulf %243, %217 : vector<8x128xf32>
    %254 = arith.addf %252, %253 : vector<8x128xf32>
    %255 = arith.index_cast %c6_i32 : i32 to index
    %c0_78 = arith.constant 0 : index
    %c0_79 = arith.constant 0 : index
    %256 = vector.load %arg11[%255, %c0_78, %c0_79] : memref<8x8x128xf32, #tpu.memory_space<vmem>>, vector<1x8x128xf32>
    %257 = vector.shape_cast %256 : vector<1x8x128xf32> to vector<8x128xf32>
    %258 = vector.shape_cast %254 : vector<8x128xf32> to vector<1x8x128xf32>
    tpu.vector_store %arg11[%255, %c0_78, %c0_79], %258 {strides = array<i32>} : memref<8x8x128xf32, #tpu.memory_space<vmem>>, vector<1x8x128xf32>,
    %c7_i32 = arith.constant 7 : i32
    %259 = arith.index_cast %c7_i32 : i32 to index
    %c0_80 = arith.constant 0 : index
    %c0_81 = arith.constant 0 : index
    %260 = vector.load %arg12[%259, %c0_80, %c0_81] : memref<8x8x384xf32, #tpu.memory_space<vmem>>, vector<1x8x384xf32>
    %261 = vector.shape_cast %260 : vector<1x8x384xf32> to vector<8x384xf32>
    %262 = arith.truncf %254 : vector<8x128xf32> to vector<8x128xbf16>
    %c0_82 = arith.constant 0 : index
    %c0_83 = arith.constant 0 : index
    %263 = vector.load %arg2[%c0_82, %c0_83] : memref<128x384xbf16, #tpu.memory_space<vmem>>, vector<128x384xbf16>
    %cst_84 = arith.constant dense<0.000000e+00> : vector<8x384xf32>
    %264 = tpu.matmul %262, %263, %cst_84 {dimension_numbers = #tpu.dot_dimension_numbers<[1], [0], [0], [1], [0, 0, 1, 1], [], []>} : vector<8x128xbf16>, vector<128x384xbf16>, vector<8x384xf32> -> vector<8x384xf32>
    %265 = vector.extract_strided_slice %261 {offsets = [0, 0], sizes = [8, 128], strides = [1, 1]} : vector<8x384xf32> to vector<8x128xf32>
    %266 = vector.extract_strided_slice %264 {offsets = [0, 0], sizes = [8, 128], strides = [1, 1]} : vector<8x384xf32> to vector<8x128xf32>
    %267 = arith.addf %265, %266 : vector<8x128xf32>
    %268 = arith.negf %267 : vector<8x128xf32>
    %269 = math.exp %268 : vector<8x128xf32>
    %cst_85 = arith.constant 1.000000e+00 : f32
    %270 = vector.broadcast %cst_85 : f32 to vector<8x128xf32>
    %271 = arith.addf %270, %269 : vector<8x128xf32>
    %272 = arith.divf %270, %271 : vector<8x128xf32>
    %273 = vector.extract_strided_slice %261 {offsets = [0, 128], sizes = [8, 128], strides = [1, 1]} : vector<8x384xf32> to vector<8x128xf32>
    %274 = vector.extract_strided_slice %264 {offsets = [0, 128], sizes = [8, 128], strides = [1, 1]} : vector<8x384xf32> to vector<8x128xf32>
    %275 = arith.addf %273, %274 : vector<8x128xf32>
    %276 = arith.negf %275 : vector<8x128xf32>
    %277 = math.exp %276 : vector<8x128xf32>
    %cst_86 = arith.constant 1.000000e+00 : f32
    %278 = vector.broadcast %cst_86 : f32 to vector<8x128xf32>
    %279 = arith.addf %278, %277 : vector<8x128xf32>
    %280 = arith.divf %278, %279 : vector<8x128xf32>
    %281 = vector.extract_strided_slice %261 {offsets = [0, 256], sizes = [8, 128], strides = [1, 1]} : vector<8x384xf32> to vector<8x128xf32>
    %282 = vector.extract_strided_slice %264 {offsets = [0, 256], sizes = [8, 128], strides = [1, 1]} : vector<8x384xf32> to vector<8x128xf32>
    %283 = arith.addf %282, %12 : vector<8x128xf32>
    %284 = arith.mulf %272, %283 : vector<8x128xf32>
    %285 = arith.addf %281, %284 : vector<8x128xf32>
    %286 = math.tanh %285 : vector<8x128xf32>
    %cst_87 = arith.constant 1.000000e+00 : f32
    %287 = vector.broadcast %cst_87 : f32 to vector<8x128xf32>
    %288 = arith.subf %287, %280 : vector<8x128xf32>
    %289 = arith.mulf %288, %286 : vector<8x128xf32>
    %290 = arith.mulf %280, %254 : vector<8x128xf32>
    %291 = arith.addf %289, %290 : vector<8x128xf32>
    %292 = arith.index_cast %c7_i32 : i32 to index
    %c0_88 = arith.constant 0 : index
    %c0_89 = arith.constant 0 : index
    %293 = vector.load %arg11[%292, %c0_88, %c0_89] : memref<8x8x128xf32, #tpu.memory_space<vmem>>, vector<1x8x128xf32>
    %294 = vector.shape_cast %293 : vector<1x8x128xf32> to vector<8x128xf32>
    %295 = vector.shape_cast %291 : vector<8x128xf32> to vector<1x8x128xf32>
    tpu.vector_store %arg11[%292, %c0_88, %c0_89], %295 {strides = array<i32>} : memref<8x8x128xf32, #tpu.memory_space<vmem>>, vector<1x8x128xf32>,
    %c7_i32_90 = arith.constant 7 : i32
    %c0_91 = arith.constant 0 : index
    %c0_92 = arith.constant 0 : index
    %c0_93 = arith.constant 0 : index
    %296 = vector.load %arg10[%c0_91, %c0_92, %c0_93] : memref<2x8x128xf32, #tpu.memory_space<vmem>>, vector<1x8x128xf32>
    %297 = vector.shape_cast %296 : vector<1x8x128xf32> to vector<8x128xf32>
    %298 = vector.shape_cast %291 : vector<8x128xf32> to vector<1x8x128xf32>
    tpu.vector_store %arg10[%c0_91, %c0_92, %c0_93], %298 {strides = array<i32>} : memref<2x8x128xf32, #tpu.memory_space<vmem>>, vector<1x8x128xf32>,
    %c0_94 = arith.constant 0 : index
    %c0_95 = arith.constant 0 : index
    %299 = vector.load %arg7[%c0_94, %c0_95] : memref<1x384xf32, #tpu.memory_space<vmem>>, vector<1x384xf32>
    %c0_96 = arith.constant 0 : index
    %c0_97 = arith.constant 0 : index
    %300 = vector.load %arg8[%c0_96, %c0_97] : memref<1x128xf32, #tpu.memory_space<vmem>>, vector<1x128xf32>
    %c0_98 = arith.constant 0 : index
    %c0_99 = arith.constant 0 : index
    %c0_100 = arith.constant 0 : index
    %301 = vector.load %arg11[%c0_98, %c0_99, %c0_100] : memref<8x8x128xf32, #tpu.memory_space<vmem>>, vector<8x8x128xf32>
    %302 = vector.shape_cast %301 : vector<8x8x128xf32> to vector<64x128xf32>
    %303 = arith.truncf %302 : vector<64x128xf32> to vector<64x128xbf16>
    %c0_101 = arith.constant 0 : index
    %c0_102 = arith.constant 0 : index
    %304 = vector.load %arg5[%c0_101, %c0_102] : memref<128x384xbf16, #tpu.memory_space<vmem>>, vector<128x384xbf16>
    %cst_103 = arith.constant dense<0.000000e+00> : vector<64x384xf32>
    %305 = tpu.matmul %303, %304, %cst_103 {dimension_numbers = #tpu.dot_dimension_numbers<[1], [0], [0], [1], [0, 0, 1, 1], [], []>} : vector<64x128xbf16>, vector<128x384xbf16>, vector<64x384xf32> -> vector<64x384xf32>
    %306 = vector.broadcast %299 : vector<1x384xf32> to vector<64x384xf32>
    %307 = arith.addf %305, %306 : vector<64x384xf32>
    %308 = vector.shape_cast %307 : vector<64x384xf32> to vector<8x8x384xf32>
    %c0_104 = arith.constant 0 : index
    %c0_105 = arith.constant 0 : index
    %c0_106 = arith.constant 0 : index
    %309 = vector.load %arg12[%c0_104, %c0_105, %c0_106] : memref<8x8x384xf32, #tpu.memory_space<vmem>>, vector<8x8x384xf32>
    tpu.vector_store %arg12[%c0_104, %c0_105, %c0_106], %308 {strides = array<i32>} : memref<8x8x384xf32, #tpu.memory_space<vmem>>, vector<8x8x384xf32>,
    %310 = vector.shape_cast %300 : vector<1x128xf32> to vector<1x128xf32>
    %311 = vector.broadcast %310 : vector<1x128xf32> to vector<8x128xf32>
    %c0_107 = arith.constant 0 : index
    %c0_108 = arith.constant 0 : index
    %c0_109 = arith.constant 0 : index
    %312 = vector.load %arg12[%c0_107, %c0_108, %c0_109] : memref<8x8x384xf32, #tpu.memory_space<vmem>>, vector<1x8x384xf32>
    %313 = vector.shape_cast %312 : vector<1x8x384xf32> to vector<8x384xf32>
    %314 = vector.extract_strided_slice %313 {offsets = [0, 0], sizes = [8, 128], strides = [1, 1]} : vector<8x384xf32> to vector<8x128xf32>
    %315 = arith.negf %314 : vector<8x128xf32>
    %316 = math.exp %315 : vector<8x128xf32>
    %cst_110 = arith.constant 1.000000e+00 : f32
    %317 = vector.broadcast %cst_110 : f32 to vector<8x128xf32>
    %318 = arith.addf %317, %316 : vector<8x128xf32>
    %319 = arith.divf %317, %318 : vector<8x128xf32>
    %320 = vector.extract_strided_slice %313 {offsets = [0, 128], sizes = [8, 128], strides = [1, 1]} : vector<8x384xf32> to vector<8x128xf32>
    %321 = arith.negf %320 : vector<8x128xf32>
    %322 = math.exp %321 : vector<8x128xf32>
    %cst_111 = arith.constant 1.000000e+00 : f32
    %323 = vector.broadcast %cst_111 : f32 to vector<8x128xf32>
    %324 = arith.addf %323, %322 : vector<8x128xf32>
    %325 = arith.divf %323, %324 : vector<8x128xf32>
    %326 = vector.extract_strided_slice %313 {offsets = [0, 256], sizes = [8, 128], strides = [1, 1]} : vector<8x384xf32> to vector<8x128xf32>
    %327 = arith.mulf %319, %311 : vector<8x128xf32>
    %328 = arith.addf %326, %327 : vector<8x128xf32>
    %329 = math.tanh %328 : vector<8x128xf32>
    %cst_112 = arith.constant 1.000000e+00 : f32
    %330 = vector.broadcast %cst_112 : f32 to vector<8x128xf32>
    %331 = arith.subf %330, %325 : vector<8x128xf32>
    %332 = arith.mulf %331, %329 : vector<8x128xf32>
    %c0_113 = arith.constant 0 : index
    %c0_114 = arith.constant 0 : index
    %c0_115 = arith.constant 0 : index
    %333 = vector.load %arg9[%c0_113, %c0_114, %c0_115] : memref<8x8x128xf32, #tpu.memory_space<vmem>>, vector<1x8x128xf32>
    %334 = vector.shape_cast %333 : vector<1x8x128xf32> to vector<8x128xf32>
    %335 = vector.shape_cast %332 : vector<8x128xf32> to vector<1x8x128xf32>
    tpu.vector_store %arg9[%c0_113, %c0_114, %c0_115], %335 {strides = array<i32>} : memref<8x8x128xf32, #tpu.memory_space<vmem>>, vector<1x8x128xf32>,
    %c1_i32_116 = arith.constant 1 : i32
    %336 = arith.index_cast %c1_i32_116 : i32 to index
    %c0_117 = arith.constant 0 : index
    %c0_118 = arith.constant 0 : index
    %337 = vector.load %arg12[%336, %c0_117, %c0_118] : memref<8x8x384xf32, #tpu.memory_space<vmem>>, vector<1x8x384xf32>
    %338 = vector.shape_cast %337 : vector<1x8x384xf32> to vector<8x384xf32>
    %339 = arith.truncf %332 : vector<8x128xf32> to vector<8x128xbf16>
    %c0_119 = arith.constant 0 : index
    %c0_120 = arith.constant 0 : index
    %340 = vector.load %arg6[%c0_119, %c0_120] : memref<128x384xbf16, #tpu.memory_space<vmem>>, vector<128x384xbf16>
    %cst_121 = arith.constant dense<0.000000e+00> : vector<8x384xf32>
    %341 = tpu.matmul %339, %340, %cst_121 {dimension_numbers = #tpu.dot_dimension_numbers<[1], [0], [0], [1], [0, 0, 1, 1], [], []>} : vector<8x128xbf16>, vector<128x384xbf16>, vector<8x384xf32> -> vector<8x384xf32>
    %342 = vector.extract_strided_slice %338 {offsets = [0, 0], sizes = [8, 128], strides = [1, 1]} : vector<8x384xf32> to vector<8x128xf32>
    %343 = vector.extract_strided_slice %341 {offsets = [0, 0], sizes = [8, 128], strides = [1, 1]} : vector<8x384xf32> to vector<8x128xf32>
    %344 = arith.addf %342, %343 : vector<8x128xf32>
    %345 = arith.negf %344 : vector<8x128xf32>
    %346 = math.exp %345 : vector<8x128xf32>
    %cst_122 = arith.constant 1.000000e+00 : f32
    %347 = vector.broadcast %cst_122 : f32 to vector<8x128xf32>
    %348 = arith.addf %347, %346 : vector<8x128xf32>
    %349 = arith.divf %347, %348 : vector<8x128xf32>
    %350 = vector.extract_strided_slice %338 {offsets = [0, 128], sizes = [8, 128], strides = [1, 1]} : vector<8x384xf32> to vector<8x128xf32>
    %351 = vector.extract_strided_slice %341 {offsets = [0, 128], sizes = [8, 128], strides = [1, 1]} : vector<8x384xf32> to vector<8x128xf32>
    %352 = arith.addf %350, %351 : vector<8x128xf32>
    %353 = arith.negf %352 : vector<8x128xf32>
    %354 = math.exp %353 : vector<8x128xf32>
    %cst_123 = arith.constant 1.000000e+00 : f32
    %355 = vector.broadcast %cst_123 : f32 to vector<8x128xf32>
    %356 = arith.addf %355, %354 : vector<8x128xf32>
    %357 = arith.divf %355, %356 : vector<8x128xf32>
    %358 = vector.extract_strided_slice %338 {offsets = [0, 256], sizes = [8, 128], strides = [1, 1]} : vector<8x384xf32> to vector<8x128xf32>
    %359 = vector.extract_strided_slice %341 {offsets = [0, 256], sizes = [8, 128], strides = [1, 1]} : vector<8x384xf32> to vector<8x128xf32>
    %360 = arith.addf %359, %311 : vector<8x128xf32>
    %361 = arith.mulf %349, %360 : vector<8x128xf32>
    %362 = arith.addf %358, %361 : vector<8x128xf32>
    %363 = math.tanh %362 : vector<8x128xf32>
    %cst_124 = arith.constant 1.000000e+00 : f32
    %364 = vector.broadcast %cst_124 : f32 to vector<8x128xf32>
    %365 = arith.subf %364, %357 : vector<8x128xf32>
    %366 = arith.mulf %365, %363 : vector<8x128xf32>
    %367 = arith.mulf %357, %332 : vector<8x128xf32>
    %368 = arith.addf %366, %367 : vector<8x128xf32>
    %369 = arith.index_cast %c1_i32_116 : i32 to index
    %c0_125 = arith.constant 0 : index
    %c0_126 = arith.constant 0 : index
    %370 = vector.load %arg9[%369, %c0_125, %c0_126] : memref<8x8x128xf32, #tpu.memory_space<vmem>>, vector<1x8x128xf32>
    %371 = vector.shape_cast %370 : vector<1x8x128xf32> to vector<8x128xf32>
    %372 = vector.shape_cast %368 : vector<8x128xf32> to vector<1x8x128xf32>
    tpu.vector_store %arg9[%369, %c0_125, %c0_126], %372 {strides = array<i32>} : memref<8x8x128xf32, #tpu.memory_space<vmem>>, vector<1x8x128xf32>,
    %c2_i32_127 = arith.constant 2 : i32
    %373 = arith.index_cast %c2_i32_127 : i32 to index
    %c0_128 = arith.constant 0 : index
    %c0_129 = arith.constant 0 : index
    %374 = vector.load %arg12[%373, %c0_128, %c0_129] : memref<8x8x384xf32, #tpu.memory_space<vmem>>, vector<1x8x384xf32>
    %375 = vector.shape_cast %374 : vector<1x8x384xf32> to vector<8x384xf32>
    %376 = arith.truncf %368 : vector<8x128xf32> to vector<8x128xbf16>
    %c0_130 = arith.constant 0 : index
    %c0_131 = arith.constant 0 : index
    %377 = vector.load %arg6[%c0_130, %c0_131] : memref<128x384xbf16, #tpu.memory_space<vmem>>, vector<128x384xbf16>
    %cst_132 = arith.constant dense<0.000000e+00> : vector<8x384xf32>
    %378 = tpu.matmul %376, %377, %cst_132 {dimension_numbers = #tpu.dot_dimension_numbers<[1], [0], [0], [1], [0, 0, 1, 1], [], []>} : vector<8x128xbf16>, vector<128x384xbf16>, vector<8x384xf32> -> vector<8x384xf32>
    %379 = vector.extract_strided_slice %375 {offsets = [0, 0], sizes = [8, 128], strides = [1, 1]} : vector<8x384xf32> to vector<8x128xf32>
    %380 = vector.extract_strided_slice %378 {offsets = [0, 0], sizes = [8, 128], strides = [1, 1]} : vector<8x384xf32> to vector<8x128xf32>
    %381 = arith.addf %379, %380 : vector<8x128xf32>
    %382 = arith.negf %381 : vector<8x128xf32>
    %383 = math.exp %382 : vector<8x128xf32>
    %cst_133 = arith.constant 1.000000e+00 : f32
    %384 = vector.broadcast %cst_133 : f32 to vector<8x128xf32>
    %385 = arith.addf %384, %383 : vector<8x128xf32>
    %386 = arith.divf %384, %385 : vector<8x128xf32>
    %387 = vector.extract_strided_slice %375 {offsets = [0, 128], sizes = [8, 128], strides = [1, 1]} : vector<8x384xf32> to vector<8x128xf32>
    %388 = vector.extract_strided_slice %378 {offsets = [0, 128], sizes = [8, 128], strides = [1, 1]} : vector<8x384xf32> to vector<8x128xf32>
    %389 = arith.addf %387, %388 : vector<8x128xf32>
    %390 = arith.negf %389 : vector<8x128xf32>
    %391 = math.exp %390 : vector<8x128xf32>
    %cst_134 = arith.constant 1.000000e+00 : f32
    %392 = vector.broadcast %cst_134 : f32 to vector<8x128xf32>
    %393 = arith.addf %392, %391 : vector<8x128xf32>
    %394 = arith.divf %392, %393 : vector<8x128xf32>
    %395 = vector.extract_strided_slice %375 {offsets = [0, 256], sizes = [8, 128], strides = [1, 1]} : vector<8x384xf32> to vector<8x128xf32>
    %396 = vector.extract_strided_slice %378 {offsets = [0, 256], sizes = [8, 128], strides = [1, 1]} : vector<8x384xf32> to vector<8x128xf32>
    %397 = arith.addf %396, %311 : vector<8x128xf32>
    %398 = arith.mulf %386, %397 : vector<8x128xf32>
    %399 = arith.addf %395, %398 : vector<8x128xf32>
    %400 = math.tanh %399 : vector<8x128xf32>
    %cst_135 = arith.constant 1.000000e+00 : f32
    %401 = vector.broadcast %cst_135 : f32 to vector<8x128xf32>
    %402 = arith.subf %401, %394 : vector<8x128xf32>
    %403 = arith.mulf %402, %400 : vector<8x128xf32>
    %404 = arith.mulf %394, %368 : vector<8x128xf32>
    %405 = arith.addf %403, %404 : vector<8x128xf32>
    %406 = arith.index_cast %c2_i32_127 : i32 to index
    %c0_136 = arith.constant 0 : index
    %c0_137 = arith.constant 0 : index
    %407 = vector.load %arg9[%406, %c0_136, %c0_137] : memref<8x8x128xf32, #tpu.memory_space<vmem>>, vector<1x8x128xf32>
    %408 = vector.shape_cast %407 : vector<1x8x128xf32> to vector<8x128xf32>
    %409 = vector.shape_cast %405 : vector<8x128xf32> to vector<1x8x128xf32>
    tpu.vector_store %arg9[%406, %c0_136, %c0_137], %409 {strides = array<i32>} : memref<8x8x128xf32, #tpu.memory_space<vmem>>, vector<1x8x128xf32>,
    %c3_i32_138 = arith.constant 3 : i32
    %410 = arith.index_cast %c3_i32_138 : i32 to index
    %c0_139 = arith.constant 0 : index
    %c0_140 = arith.constant 0 : index
    %411 = vector.load %arg12[%410, %c0_139, %c0_140] : memref<8x8x384xf32, #tpu.memory_space<vmem>>, vector<1x8x384xf32>
    %412 = vector.shape_cast %411 : vector<1x8x384xf32> to vector<8x384xf32>
    %413 = arith.truncf %405 : vector<8x128xf32> to vector<8x128xbf16>
    %c0_141 = arith.constant 0 : index
    %c0_142 = arith.constant 0 : index
    %414 = vector.load %arg6[%c0_141, %c0_142] : memref<128x384xbf16, #tpu.memory_space<vmem>>, vector<128x384xbf16>
    %cst_143 = arith.constant dense<0.000000e+00> : vector<8x384xf32>
    %415 = tpu.matmul %413, %414, %cst_143 {dimension_numbers = #tpu.dot_dimension_numbers<[1], [0], [0], [1], [0, 0, 1, 1], [], []>} : vector<8x128xbf16>, vector<128x384xbf16>, vector<8x384xf32> -> vector<8x384xf32>
    %416 = vector.extract_strided_slice %412 {offsets = [0, 0], sizes = [8, 128], strides = [1, 1]} : vector<8x384xf32> to vector<8x128xf32>
    %417 = vector.extract_strided_slice %415 {offsets = [0, 0], sizes = [8, 128], strides = [1, 1]} : vector<8x384xf32> to vector<8x128xf32>
    %418 = arith.addf %416, %417 : vector<8x128xf32>
    %419 = arith.negf %418 : vector<8x128xf32>
    %420 = math.exp %419 : vector<8x128xf32>
    %cst_144 = arith.constant 1.000000e+00 : f32
    %421 = vector.broadcast %cst_144 : f32 to vector<8x128xf32>
    %422 = arith.addf %421, %420 : vector<8x128xf32>
    %423 = arith.divf %421, %422 : vector<8x128xf32>
    %424 = vector.extract_strided_slice %412 {offsets = [0, 128], sizes = [8, 128], strides = [1, 1]} : vector<8x384xf32> to vector<8x128xf32>
    %425 = vector.extract_strided_slice %415 {offsets = [0, 128], sizes = [8, 128], strides = [1, 1]} : vector<8x384xf32> to vector<8x128xf32>
    %426 = arith.addf %424, %425 : vector<8x128xf32>
    %427 = arith.negf %426 : vector<8x128xf32>
    %428 = math.exp %427 : vector<8x128xf32>
    %cst_145 = arith.constant 1.000000e+00 : f32
    %429 = vector.broadcast %cst_145 : f32 to vector<8x128xf32>
    %430 = arith.addf %429, %428 : vector<8x128xf32>
    %431 = arith.divf %429, %430 : vector<8x128xf32>
    %432 = vector.extract_strided_slice %412 {offsets = [0, 256], sizes = [8, 128], strides = [1, 1]} : vector<8x384xf32> to vector<8x128xf32>
    %433 = vector.extract_strided_slice %415 {offsets = [0, 256], sizes = [8, 128], strides = [1, 1]} : vector<8x384xf32> to vector<8x128xf32>
    %434 = arith.addf %433, %311 : vector<8x128xf32>
    %435 = arith.mulf %423, %434 : vector<8x128xf32>
    %436 = arith.addf %432, %435 : vector<8x128xf32>
    %437 = math.tanh %436 : vector<8x128xf32>
    %cst_146 = arith.constant 1.000000e+00 : f32
    %438 = vector.broadcast %cst_146 : f32 to vector<8x128xf32>
    %439 = arith.subf %438, %431 : vector<8x128xf32>
    %440 = arith.mulf %439, %437 : vector<8x128xf32>
    %441 = arith.mulf %431, %405 : vector<8x128xf32>
    %442 = arith.addf %440, %441 : vector<8x128xf32>
    %443 = arith.index_cast %c3_i32_138 : i32 to index
    %c0_147 = arith.constant 0 : index
    %c0_148 = arith.constant 0 : index
    %444 = vector.load %arg9[%443, %c0_147, %c0_148] : memref<8x8x128xf32, #tpu.memory_space<vmem>>, vector<1x8x128xf32>
    %445 = vector.shape_cast %444 : vector<1x8x128xf32> to vector<8x128xf32>
    %446 = vector.shape_cast %442 : vector<8x128xf32> to vector<1x8x128xf32>
    tpu.vector_store %arg9[%443, %c0_147, %c0_148], %446 {strides = array<i32>} : memref<8x8x128xf32, #tpu.memory_space<vmem>>, vector<1x8x128xf32>,
    %c4_i32_149 = arith.constant 4 : i32
    %447 = arith.index_cast %c4_i32_149 : i32 to index
    %c0_150 = arith.constant 0 : index
    %c0_151 = arith.constant 0 : index
    %448 = vector.load %arg12[%447, %c0_150, %c0_151] : memref<8x8x384xf32, #tpu.memory_space<vmem>>, vector<1x8x384xf32>
    %449 = vector.shape_cast %448 : vector<1x8x384xf32> to vector<8x384xf32>
    %450 = arith.truncf %442 : vector<8x128xf32> to vector<8x128xbf16>
    %c0_152 = arith.constant 0 : index
    %c0_153 = arith.constant 0 : index
    %451 = vector.load %arg6[%c0_152, %c0_153] : memref<128x384xbf16, #tpu.memory_space<vmem>>, vector<128x384xbf16>
    %cst_154 = arith.constant dense<0.000000e+00> : vector<8x384xf32>
    %452 = tpu.matmul %450, %451, %cst_154 {dimension_numbers = #tpu.dot_dimension_numbers<[1], [0], [0], [1], [0, 0, 1, 1], [], []>} : vector<8x128xbf16>, vector<128x384xbf16>, vector<8x384xf32> -> vector<8x384xf32>
    %453 = vector.extract_strided_slice %449 {offsets = [0, 0], sizes = [8, 128], strides = [1, 1]} : vector<8x384xf32> to vector<8x128xf32>
    %454 = vector.extract_strided_slice %452 {offsets = [0, 0], sizes = [8, 128], strides = [1, 1]} : vector<8x384xf32> to vector<8x128xf32>
    %455 = arith.addf %453, %454 : vector<8x128xf32>
    %456 = arith.negf %455 : vector<8x128xf32>
    %457 = math.exp %456 : vector<8x128xf32>
    %cst_155 = arith.constant 1.000000e+00 : f32
    %458 = vector.broadcast %cst_155 : f32 to vector<8x128xf32>
    %459 = arith.addf %458, %457 : vector<8x128xf32>
    %460 = arith.divf %458, %459 : vector<8x128xf32>
    %461 = vector.extract_strided_slice %449 {offsets = [0, 128], sizes = [8, 128], strides = [1, 1]} : vector<8x384xf32> to vector<8x128xf32>
    %462 = vector.extract_strided_slice %452 {offsets = [0, 128], sizes = [8, 128], strides = [1, 1]} : vector<8x384xf32> to vector<8x128xf32>
    %463 = arith.addf %461, %462 : vector<8x128xf32>
    %464 = arith.negf %463 : vector<8x128xf32>
    %465 = math.exp %464 : vector<8x128xf32>
    %cst_156 = arith.constant 1.000000e+00 : f32
    %466 = vector.broadcast %cst_156 : f32 to vector<8x128xf32>
    %467 = arith.addf %466, %465 : vector<8x128xf32>
    %468 = arith.divf %466, %467 : vector<8x128xf32>
    %469 = vector.extract_strided_slice %449 {offsets = [0, 256], sizes = [8, 128], strides = [1, 1]} : vector<8x384xf32> to vector<8x128xf32>
    %470 = vector.extract_strided_slice %452 {offsets = [0, 256], sizes = [8, 128], strides = [1, 1]} : vector<8x384xf32> to vector<8x128xf32>
    %471 = arith.addf %470, %311 : vector<8x128xf32>
    %472 = arith.mulf %460, %471 : vector<8x128xf32>
    %473 = arith.addf %469, %472 : vector<8x128xf32>
    %474 = math.tanh %473 : vector<8x128xf32>
    %cst_157 = arith.constant 1.000000e+00 : f32
    %475 = vector.broadcast %cst_157 : f32 to vector<8x128xf32>
    %476 = arith.subf %475, %468 : vector<8x128xf32>
    %477 = arith.mulf %476, %474 : vector<8x128xf32>
    %478 = arith.mulf %468, %442 : vector<8x128xf32>
    %479 = arith.addf %477, %478 : vector<8x128xf32>
    %480 = arith.index_cast %c4_i32_149 : i32 to index
    %c0_158 = arith.constant 0 : index
    %c0_159 = arith.constant 0 : index
    %481 = vector.load %arg9[%480, %c0_158, %c0_159] : memref<8x8x128xf32, #tpu.memory_space<vmem>>, vector<1x8x128xf32>
    %482 = vector.shape_cast %481 : vector<1x8x128xf32> to vector<8x128xf32>
    %483 = vector.shape_cast %479 : vector<8x128xf32> to vector<1x8x128xf32>
    tpu.vector_store %arg9[%480, %c0_158, %c0_159], %483 {strides = array<i32>} : memref<8x8x128xf32, #tpu.memory_space<vmem>>, vector<1x8x128xf32>,
    %c5_i32_160 = arith.constant 5 : i32
    %484 = arith.index_cast %c5_i32_160 : i32 to index
    %c0_161 = arith.constant 0 : index
    %c0_162 = arith.constant 0 : index
    %485 = vector.load %arg12[%484, %c0_161, %c0_162] : memref<8x8x384xf32, #tpu.memory_space<vmem>>, vector<1x8x384xf32>
    %486 = vector.shape_cast %485 : vector<1x8x384xf32> to vector<8x384xf32>
    %487 = arith.truncf %479 : vector<8x128xf32> to vector<8x128xbf16>
    %c0_163 = arith.constant 0 : index
    %c0_164 = arith.constant 0 : index
    %488 = vector.load %arg6[%c0_163, %c0_164] : memref<128x384xbf16, #tpu.memory_space<vmem>>, vector<128x384xbf16>
    %cst_165 = arith.constant dense<0.000000e+00> : vector<8x384xf32>
    %489 = tpu.matmul %487, %488, %cst_165 {dimension_numbers = #tpu.dot_dimension_numbers<[1], [0], [0], [1], [0, 0, 1, 1], [], []>} : vector<8x128xbf16>, vector<128x384xbf16>, vector<8x384xf32> -> vector<8x384xf32>
    %490 = vector.extract_strided_slice %486 {offsets = [0, 0], sizes = [8, 128], strides = [1, 1]} : vector<8x384xf32> to vector<8x128xf32>
    %491 = vector.extract_strided_slice %489 {offsets = [0, 0], sizes = [8, 128], strides = [1, 1]} : vector<8x384xf32> to vector<8x128xf32>
    %492 = arith.addf %490, %491 : vector<8x128xf32>
    %493 = arith.negf %492 : vector<8x128xf32>
    %494 = math.exp %493 : vector<8x128xf32>
    %cst_166 = arith.constant 1.000000e+00 : f32
    %495 = vector.broadcast %cst_166 : f32 to vector<8x128xf32>
    %496 = arith.addf %495, %494 : vector<8x128xf32>
    %497 = arith.divf %495, %496 : vector<8x128xf32>
    %498 = vector.extract_strided_slice %486 {offsets = [0, 128], sizes = [8, 128], strides = [1, 1]} : vector<8x384xf32> to vector<8x128xf32>
    %499 = vector.extract_strided_slice %489 {offsets = [0, 128], sizes = [8, 128], strides = [1, 1]} : vector<8x384xf32> to vector<8x128xf32>
    %500 = arith.addf %498, %499 : vector<8x128xf32>
    %501 = arith.negf %500 : vector<8x128xf32>
    %502 = math.exp %501 : vector<8x128xf32>
    %cst_167 = arith.constant 1.000000e+00 : f32
    %503 = vector.broadcast %cst_167 : f32 to vector<8x128xf32>
    %504 = arith.addf %503, %502 : vector<8x128xf32>
    %505 = arith.divf %503, %504 : vector<8x128xf32>
    %506 = vector.extract_strided_slice %486 {offsets = [0, 256], sizes = [8, 128], strides = [1, 1]} : vector<8x384xf32> to vector<8x128xf32>
    %507 = vector.extract_strided_slice %489 {offsets = [0, 256], sizes = [8, 128], strides = [1, 1]} : vector<8x384xf32> to vector<8x128xf32>
    %508 = arith.addf %507, %311 : vector<8x128xf32>
    %509 = arith.mulf %497, %508 : vector<8x128xf32>
    %510 = arith.addf %506, %509 : vector<8x128xf32>
    %511 = math.tanh %510 : vector<8x128xf32>
    %cst_168 = arith.constant 1.000000e+00 : f32
    %512 = vector.broadcast %cst_168 : f32 to vector<8x128xf32>
    %513 = arith.subf %512, %505 : vector<8x128xf32>
    %514 = arith.mulf %513, %511 : vector<8x128xf32>
    %515 = arith.mulf %505, %479 : vector<8x128xf32>
    %516 = arith.addf %514, %515 : vector<8x128xf32>
    %517 = arith.index_cast %c5_i32_160 : i32 to index
    %c0_169 = arith.constant 0 : index
    %c0_170 = arith.constant 0 : index
    %518 = vector.load %arg9[%517, %c0_169, %c0_170] : memref<8x8x128xf32, #tpu.memory_space<vmem>>, vector<1x8x128xf32>
    %519 = vector.shape_cast %518 : vector<1x8x128xf32> to vector<8x128xf32>
    %520 = vector.shape_cast %516 : vector<8x128xf32> to vector<1x8x128xf32>
    tpu.vector_store %arg9[%517, %c0_169, %c0_170], %520 {strides = array<i32>} : memref<8x8x128xf32, #tpu.memory_space<vmem>>, vector<1x8x128xf32>,
    %c6_i32_171 = arith.constant 6 : i32
    %521 = arith.index_cast %c6_i32_171 : i32 to index
    %c0_172 = arith.constant 0 : index
    %c0_173 = arith.constant 0 : index
    %522 = vector.load %arg12[%521, %c0_172, %c0_173] : memref<8x8x384xf32, #tpu.memory_space<vmem>>, vector<1x8x384xf32>
    %523 = vector.shape_cast %522 : vector<1x8x384xf32> to vector<8x384xf32>
    %524 = arith.truncf %516 : vector<8x128xf32> to vector<8x128xbf16>
    %c0_174 = arith.constant 0 : index
    %c0_175 = arith.constant 0 : index
    %525 = vector.load %arg6[%c0_174, %c0_175] : memref<128x384xbf16, #tpu.memory_space<vmem>>, vector<128x384xbf16>
    %cst_176 = arith.constant dense<0.000000e+00> : vector<8x384xf32>
    %526 = tpu.matmul %524, %525, %cst_176 {dimension_numbers = #tpu.dot_dimension_numbers<[1], [0], [0], [1], [0, 0, 1, 1], [], []>} : vector<8x128xbf16>, vector<128x384xbf16>, vector<8x384xf32> -> vector<8x384xf32>
    %527 = vector.extract_strided_slice %523 {offsets = [0, 0], sizes = [8, 128], strides = [1, 1]} : vector<8x384xf32> to vector<8x128xf32>
    %528 = vector.extract_strided_slice %526 {offsets = [0, 0], sizes = [8, 128], strides = [1, 1]} : vector<8x384xf32> to vector<8x128xf32>
    %529 = arith.addf %527, %528 : vector<8x128xf32>
    %530 = arith.negf %529 : vector<8x128xf32>
    %531 = math.exp %530 : vector<8x128xf32>
    %cst_177 = arith.constant 1.000000e+00 : f32
    %532 = vector.broadcast %cst_177 : f32 to vector<8x128xf32>
    %533 = arith.addf %532, %531 : vector<8x128xf32>
    %534 = arith.divf %532, %533 : vector<8x128xf32>
    %535 = vector.extract_strided_slice %523 {offsets = [0, 128], sizes = [8, 128], strides = [1, 1]} : vector<8x384xf32> to vector<8x128xf32>
    %536 = vector.extract_strided_slice %526 {offsets = [0, 128], sizes = [8, 128], strides = [1, 1]} : vector<8x384xf32> to vector<8x128xf32>
    %537 = arith.addf %535, %536 : vector<8x128xf32>
    %538 = arith.negf %537 : vector<8x128xf32>
    %539 = math.exp %538 : vector<8x128xf32>
    %cst_178 = arith.constant 1.000000e+00 : f32
    %540 = vector.broadcast %cst_178 : f32 to vector<8x128xf32>
    %541 = arith.addf %540, %539 : vector<8x128xf32>
    %542 = arith.divf %540, %541 : vector<8x128xf32>
    %543 = vector.extract_strided_slice %523 {offsets = [0, 256], sizes = [8, 128], strides = [1, 1]} : vector<8x384xf32> to vector<8x128xf32>
    %544 = vector.extract_strided_slice %526 {offsets = [0, 256], sizes = [8, 128], strides = [1, 1]} : vector<8x384xf32> to vector<8x128xf32>
    %545 = arith.addf %544, %311 : vector<8x128xf32>
    %546 = arith.mulf %534, %545 : vector<8x128xf32>
    %547 = arith.addf %543, %546 : vector<8x128xf32>
    %548 = math.tanh %547 : vector<8x128xf32>
    %cst_179 = arith.constant 1.000000e+00 : f32
    %549 = vector.broadcast %cst_179 : f32 to vector<8x128xf32>
    %550 = arith.subf %549, %542 : vector<8x128xf32>
    %551 = arith.mulf %550, %548 : vector<8x128xf32>
    %552 = arith.mulf %542, %516 : vector<8x128xf32>
    %553 = arith.addf %551, %552 : vector<8x128xf32>
    %554 = arith.index_cast %c6_i32_171 : i32 to index
    %c0_180 = arith.constant 0 : index
    %c0_181 = arith.constant 0 : index
    %555 = vector.load %arg9[%554, %c0_180, %c0_181] : memref<8x8x128xf32, #tpu.memory_space<vmem>>, vector<1x8x128xf32>
    %556 = vector.shape_cast %555 : vector<1x8x128xf32> to vector<8x128xf32>
    %557 = vector.shape_cast %553 : vector<8x128xf32> to vector<1x8x128xf32>
    tpu.vector_store %arg9[%554, %c0_180, %c0_181], %557 {strides = array<i32>} : memref<8x8x128xf32, #tpu.memory_space<vmem>>, vector<1x8x128xf32>,
    %c7_i32_182 = arith.constant 7 : i32
    %558 = arith.index_cast %c7_i32_182 : i32 to index
    %c0_183 = arith.constant 0 : index
    %c0_184 = arith.constant 0 : index
    %559 = vector.load %arg12[%558, %c0_183, %c0_184] : memref<8x8x384xf32, #tpu.memory_space<vmem>>, vector<1x8x384xf32>
    %560 = vector.shape_cast %559 : vector<1x8x384xf32> to vector<8x384xf32>
    %561 = arith.truncf %553 : vector<8x128xf32> to vector<8x128xbf16>
    %c0_185 = arith.constant 0 : index
    %c0_186 = arith.constant 0 : index
    %562 = vector.load %arg6[%c0_185, %c0_186] : memref<128x384xbf16, #tpu.memory_space<vmem>>, vector<128x384xbf16>
    %cst_187 = arith.constant dense<0.000000e+00> : vector<8x384xf32>
    %563 = tpu.matmul %561, %562, %cst_187 {dimension_numbers = #tpu.dot_dimension_numbers<[1], [0], [0], [1], [0, 0, 1, 1], [], []>} : vector<8x128xbf16>, vector<128x384xbf16>, vector<8x384xf32> -> vector<8x384xf32>
    %564 = vector.extract_strided_slice %560 {offsets = [0, 0], sizes = [8, 128], strides = [1, 1]} : vector<8x384xf32> to vector<8x128xf32>
    %565 = vector.extract_strided_slice %563 {offsets = [0, 0], sizes = [8, 128], strides = [1, 1]} : vector<8x384xf32> to vector<8x128xf32>
    %566 = arith.addf %564, %565 : vector<8x128xf32>
    %567 = arith.negf %566 : vector<8x128xf32>
    %568 = math.exp %567 : vector<8x128xf32>
    %cst_188 = arith.constant 1.000000e+00 : f32
    %569 = vector.broadcast %cst_188 : f32 to vector<8x128xf32>
    %570 = arith.addf %569, %568 : vector<8x128xf32>
    %571 = arith.divf %569, %570 : vector<8x128xf32>
    %572 = vector.extract_strided_slice %560 {offsets = [0, 128], sizes = [8, 128], strides = [1, 1]} : vector<8x384xf32> to vector<8x128xf32>
    %573 = vector.extract_strided_slice %563 {offsets = [0, 128], sizes = [8, 128], strides = [1, 1]} : vector<8x384xf32> to vector<8x128xf32>
    %574 = arith.addf %572, %573 : vector<8x128xf32>
    %575 = arith.negf %574 : vector<8x128xf32>
    %576 = math.exp %575 : vector<8x128xf32>
    %cst_189 = arith.constant 1.000000e+00 : f32
    %577 = vector.broadcast %cst_189 : f32 to vector<8x128xf32>
    %578 = arith.addf %577, %576 : vector<8x128xf32>
    %579 = arith.divf %577, %578 : vector<8x128xf32>
    %580 = vector.extract_strided_slice %560 {offsets = [0, 256], sizes = [8, 128], strides = [1, 1]} : vector<8x384xf32> to vector<8x128xf32>
    %581 = vector.extract_strided_slice %563 {offsets = [0, 256], sizes = [8, 128], strides = [1, 1]} : vector<8x384xf32> to vector<8x128xf32>
    %582 = arith.addf %581, %311 : vector<8x128xf32>
    %583 = arith.mulf %571, %582 : vector<8x128xf32>
    %584 = arith.addf %580, %583 : vector<8x128xf32>
    %585 = math.tanh %584 : vector<8x128xf32>
    %cst_190 = arith.constant 1.000000e+00 : f32
    %586 = vector.broadcast %cst_190 : f32 to vector<8x128xf32>
    %587 = arith.subf %586, %579 : vector<8x128xf32>
    %588 = arith.mulf %587, %585 : vector<8x128xf32>
    %589 = arith.mulf %579, %553 : vector<8x128xf32>
    %590 = arith.addf %588, %589 : vector<8x128xf32>
    %591 = arith.index_cast %c7_i32_182 : i32 to index
    %c0_191 = arith.constant 0 : index
    %c0_192 = arith.constant 0 : index
    %592 = vector.load %arg9[%591, %c0_191, %c0_192] : memref<8x8x128xf32, #tpu.memory_space<vmem>>, vector<1x8x128xf32>
    %593 = vector.shape_cast %592 : vector<1x8x128xf32> to vector<8x128xf32>
    %594 = vector.shape_cast %590 : vector<8x128xf32> to vector<1x8x128xf32>
    tpu.vector_store %arg9[%591, %c0_191, %c0_192], %594 {strides = array<i32>} : memref<8x8x128xf32, #tpu.memory_space<vmem>>, vector<1x8x128xf32>,
    %c7_i32_193 = arith.constant 7 : i32
    %c1 = arith.constant 1 : index
    %c0_194 = arith.constant 0 : index
    %c0_195 = arith.constant 0 : index
    %595 = vector.load %arg10[%c1, %c0_194, %c0_195] : memref<2x8x128xf32, #tpu.memory_space<vmem>>, vector<1x8x128xf32>
    %596 = vector.shape_cast %595 : vector<1x8x128xf32> to vector<8x128xf32>
    %597 = vector.shape_cast %590 : vector<8x128xf32> to vector<1x8x128xf32>
    tpu.vector_store %arg10[%c1, %c0_194, %c0_195], %597 {strides = array<i32>} : memref<2x8x128xf32, #tpu.memory_space<vmem>>, vector<1x8x128xf32>,
    return
  }
}

</mosaic_0001>

<bundles_post_ra>
// kernel: tpu_custom_call.1
= control target key start
LH: loop header
LB: loop body
LE: loop exit
PB: predicated region body
PF: predicated region fallthrough
CT: control target
= control target key end

     0   :  { %16 = vsyncpa [#allocation5], 0  ;;  %s7186_s0 = inlined_call_operand.hbm [shape: f32[8,8,128], index: 0, kind: input, shape index: {}]   ;;  %s7187_s1 = inlined_call_operand.hbm [shape: bf16[128,384], index: 1, kind: input, shape index: {}]   ;;  %s7188_s2 = inlined_call_operand.hbm [shape: bf16[128,384], index: 2, kind: input, shape index: {}]   ;;  %s7189_s3 = inlined_call_operand.vmem [shape: f32[1,384], index: 3, kind: input, shape index: {}]   ;;  %s7190_s4 = inlined_call_operand.vmem [shape: f32[1,128], index: 4, kind: input, shape index: {}]   ;;  %s7191_s5 = inlined_call_operand.hbm [shape: bf16[128,384], index: 5, kind: input, shape index: {}]   ;;  %s7192_s6 = inlined_call_operand.hbm [shape: bf16[128,384], index: 6, kind: input, shape index: {}]   ;;  %s7193_s7 = inlined_call_operand.vmem [shape: f32[1,384], index: 7, kind: input, shape index: {}]   ;;  %s7194_s8 = inlined_call_operand.vmem [shape: f32[1,128], index: 8, kind: input, shape index: {}]   ;;  %s7195_s9 = inlined_call_operand.hbm [shape: f32[8,8,128], index: 9, kind: output, shape index: {0}]   ;;  %s7196_s10 = inlined_call_operand.hbm [shape: f32[2,8,128], index: 10, kind: output, shape index: {1}]  }
   0x1   :  { %17 = vsyncpa [#allocation8], 0 }
   0x2   :  { %18 = vsyncpa [#allocation11], 0 }
   0x3   :  { %19 = vsyncpa [#allocation6], 0 }
   0x4   :  { %20 = vsyncpa [#allocation15], 0  ;;  %s6182_s13 = smov [#allocation7]   ;;  %s6018_s17 = scalar_lea.hbm %s7187_s1, 3072 }
   0x5   :  { %s38_s14 = sshll.u32 %s6182_s13, 4  ;;  %p6019_p0 = scmp.ne.s32.totalorder %s7187_s1, %s6018_s17  ;;  %s39_s14 = int_to_ptr.vmem [resolvable:$true] %s38_s14 }
   0x6   :  { %p6022_p1 = scmp.lt.u32.totalorder %s6018_s17, %s7187_s1 }
   0x8   :  { %p6024_p2 = pnand %p6022_p1, %p6019_p0 }
   0xa   :  { %6027 = shalt.err (!%p6024_p2)
}
   0xb   :  { %s6028_s22 = scalar_lea.vmem %s39_s14, 3072  ;;  %p6033_p4 = scmp.lt.s32.totalorder %s39_s14, %s39_s14 }
   0xc   :  { %p6029_p3 = scmp.ne.s32.totalorder %s39_s14, %s6028_s22  ;;  %p6034_p5 = scmp.lt.s32.totalorder %s6028_s22, %s6028_s22 }
   0xe   :  { %p6035_p6 = por %p6034_p5, %p6033_p4 }
  0x10   :  { %p6036_p7 = pnand %p6035_p6, %p6029_p3 }
  0x12   :  { %6039 = shalt.err (!%p6036_p7)
}
  0x13   :  { %s6183_s23 = smov 192   ;;  %s6184_s24 = smov 12  }
  0x14   :  { %44 = dma.hbm_to_vmem [thread:$0]  %s7187_s1, 3072, %s39_s14, [#allocation8], %s6183_s23, %s6183_s23, %s6184_s24  }
  0x15   :  { %s6185_s27 = smov [#allocation10]   ;;  %s6186_s29 = smov [#allocation4]  }
  0x16   :  { %s66_s28 = sshll.u32 %s6185_s27, 4  ;;  %s26_s30 = sshll.u32 %s6186_s29, 4  ;;  %s67_s28 = int_to_ptr.vmem [resolvable:$true] %s66_s28  ;;  %s27_s30 = int_to_ptr.vmem [resolvable:$true] %s26_s30 }
  0x17   :  { %s6040_s13 = scalar_lea.hbm %s7191_s5, 3072 }
  0x18   :  { %p6041_p8 = scmp.ne.s32.totalorder %s7191_s5, %s6040_s13  ;;  %p6044_p9 = scmp.lt.u32.totalorder %s6040_s13, %s7191_s5 }
  0x1a   :  { %p6046_p10 = pnand %p6044_p9, %p6041_p8 }
  0x1c   :  { %6049 = shalt.err (!%p6046_p10)
}
  0x1d   :  { %s6050_s1 = scalar_lea.vmem %s67_s28, 3072  ;;  %p6055_p12 = scmp.lt.s32.totalorder %s67_s28, %s67_s28 }
  0x1e   :  { %p6051_p11 = scmp.ne.s32.totalorder %s67_s28, %s6050_s1  ;;  %p6056_p13 = scmp.lt.s32.totalorder %s6050_s1, %s6050_s1 }
  0x20   :  { %p6057_p0 = por %p6056_p13, %p6055_p12 }
  0x22   :  { %p6058_p1 = pnand %p6057_p0, %p6051_p11 }
  0x24   :  { %6061 = shalt.err (!%p6058_p1)
}
  0x25   :  { %72 = dma.hbm_to_vmem [thread:$0]  %s7191_s5, 3072, %s67_s28, [#allocation11], %s6183_s23, %s6183_s23, %s6184_s24  }
  0x26   :  { %s6062_s22 = scalar_lea.hbm %s7186_s0, 1024 }
  0x27   :  { %p6063_p2 = scmp.ne.s32.totalorder %s7186_s0, %s6062_s22  ;;  %p6066_p3 = scmp.lt.u32.totalorder %s6062_s22, %s7186_s0 }
  0x29   :  { %p6068_p4 = pnand %p6066_p3, %p6063_p2 }
  0x2b   :  { %6071 = shalt.err (!%p6068_p4)
}
  0x2c   :  { %s6072_s11 = scalar_lea.vmem %s27_s30, 1024  ;;  %p6077_p6 = scmp.lt.s32.totalorder %s27_s30, %s27_s30 }
  0x2d   :  { %p6073_p5 = scmp.ne.s32.totalorder %s27_s30, %s6072_s11  ;;  %p6078_p7 = scmp.lt.s32.totalorder %s6072_s11, %s6072_s11 }
  0x2f   :  { %p6079_p8 = por %p6078_p7, %p6077_p6 }
  0x31   :  { %p6080_p9 = pnand %p6079_p8, %p6073_p5 }
  0x33   :  { %6083 = shalt.err (!%p6080_p9)
}
  0x34   :  { %s6187_s5 = smov 128   ;;  %s6188_s28 = smov 8  }
  0x35   :  { %32 = dma.hbm_to_vmem [thread:$0]  %s7186_s0, 1024, %s27_s30, [#allocation5], %s6187_s5, %s6187_s5, %s6188_s28  }
  0x36   :  { %s6189_s15 = smov [#allocation9]   ;;  %s6190_s17 = smov [#allocation12]  }
  0x37   :  { %s50_s16 = sshll.u32 %s6189_s15, 4  ;;  %s78_s18 = sshll.u32 %s6190_s17, 4  ;;  %s51_s16 = int_to_ptr.vmem [resolvable:$true] %s50_s16  ;;  %s79_s18 = int_to_ptr.vmem [resolvable:$true] %s78_s18 }
  0x38   :  { %s6084_s19 = scalar_lea.hbm %s7188_s2, 3072 }
  0x39   :  { %p6085_p10 = scmp.ne.s32.totalorder %s7188_s2, %s6084_s19  ;;  %p6088_p11 = scmp.lt.u32.totalorder %s6084_s19, %s7188_s2 }
  0x3b   :  { %p6090_p12 = pnand %p6088_p11, %p6085_p10 }
  0x3d   :  { %6093 = shalt.err (!%p6090_p12)
}
  0x3e   :  { %s6094_s0 = scalar_lea.vmem %s51_s16, 3072  ;;  %p6099_p0 = scmp.lt.s32.totalorder %s51_s16, %s51_s16 }
  0x3f   :  { %p6095_p13 = scmp.ne.s32.totalorder %s51_s16, %s6094_s0  ;;  %p6100_p1 = scmp.lt.s32.totalorder %s6094_s0, %s6094_s0 }
  0x41   :  { %p6101_p2 = por %p6100_p1, %p6099_p0 }
  0x43   :  { %p6102_p3 = pnand %p6101_p2, %p6095_p13 }
  0x45   :  { %6105 = shalt.err (!%p6102_p3)
}
  0x46   :  { %56 = dma.hbm_to_vmem [thread:$0]  %s7188_s2, 3072, %s51_s16, [#allocation8], %s6183_s23, %s6183_s23, %s6184_s24  }
  0x47   :  { %s6106_s11 = scalar_lea.hbm %s7192_s6, 3072 }
  0x48   :  { %p6107_p4 = scmp.ne.s32.totalorder %s7192_s6, %s6106_s11  ;;  %p6110_p5 = scmp.lt.u32.totalorder %s6106_s11, %s7192_s6 }
  0x4a   :  { %p6112_p6 = pnand %p6110_p5, %p6107_p4 }
  0x4c   :  { %6115 = shalt.err (!%p6112_p6)
}
  0x4d   :  { %s6116_s1 = scalar_lea.vmem %s79_s18, 3072  ;;  %p6121_p8 = scmp.lt.s32.totalorder %s79_s18, %s79_s18 }
  0x4e   :  { %p6117_p7 = scmp.ne.s32.totalorder %s79_s18, %s6116_s1  ;;  %p6122_p9 = scmp.lt.s32.totalorder %s6116_s1, %s6116_s1 }
  0x50   :  { %p6123_p10 = por %p6122_p9, %p6121_p8 }
  0x52   :  { %p6124_p11 = pnand %p6123_p10, %p6117_p7 }
  0x54   :  { %6127 = shalt.err (!%p6124_p11)
}
  0x55   :  { %84 = dma.hbm_to_vmem [thread:$0]  %s7192_s6, 3072, %s79_s18, [#allocation11], %s6183_s23, %s6183_s23, %s6184_s24  }
  0x56   :  { %6172 = dma.done.wait [#allocation5], 1024  }
  0x57   :  { %6173 = vsyncadd [#allocation5], 4294966272 }
  0x58   :  { %6174 = dma.done.wait [#allocation8], 6144  }
  0x59   :  { %6175 = vsyncadd [#allocation8], 4294961152 }
  0x5a   :  { %6176 = dma.done.wait [#allocation11], 6144  }
  0x5b   :  { %6177 = vsyncadd [#allocation11], 4294961152  ;;  %v6191_v0 = vmov 0   ;;  %v5584_v1 = vld [vmem:[#allocation7 + $0x4] ss:$12 sps:$4 sm:$0xff]   ;;  %v108_v13 = vld [vmem:[#allocation4 + $0x8] sm:$0xff]  ;;  %v152_v62 = vlaneseq }
  0x5c   :  { %327 = vmatprep.mubr.bf16.mxu0 %v6191_v0  ;;  %v5586_v2 = vld [vmem:[#allocation7] ss:$12 sps:$4 sm:$0xff]   ;;  %295 = vmatprep.subr.bf16.mxu0 %v5584_v1  ;;  %v5587_v3 = vld [vmem:[#allocation7 + $0x1c] ss:$12 sps:$4 sm:$0xff]   ;;  %v5589_v4 = vld [vmem:[#allocation7 + $0x18] ss:$12 sps:$4 sm:$0xff]  }
  0x5d   :  { %296 = vmatpush1.bf16.msra.mxu0 %v5586_v2  ;;  %v5590_v5 = vld [vmem:[#allocation7 + $0x34] ss:$12 sps:$4 sm:$0xff]   ;;  %v5592_v6 = vld [vmem:[#allocation7 + $0x30] ss:$12 sps:$4 sm:$0xff]   ;;  %v5593_v7 = vld [vmem:[#allocation7 + $0x4c] ss:$12 sps:$4 sm:$0xff]  }
  0x5e   :  { %297 = vmatprep.subr.bf16.mxu0 %v5587_v3  ;;  %v5604_v8 = vld [vmem:[#allocation7 + $0x8] ss:$12 sps:$4 sm:$0xff]   ;;  %v5596_v10 = vld [vmem:[#allocation7 + $0x64] ss:$12 sps:$4 sm:$0xff]   ;;  %v5608_v11 = vld [vmem:[#allocation7 + $0x20] ss:$12 sps:$4 sm:$0xff]  }
  0x5f   :  { %v5595_v9 = vld [vmem:[#allocation7 + $0x48] ss:$12 sps:$4 sm:$0xff]   ;;  %5242 = vmatprep.subr.bf16.mxu1 %v5604_v8  ;;  %v107_v12 = vld [vmem:[#allocation4] sm:$0xff]  ;;  %v5611_v18 = vld [vmem:[#allocation7 + $0x50] ss:$12 sps:$4 sm:$0xff]   ;;  %v6192_v34 = vmov 0.0  }
  0x60   :  { %5243 = vmatpush3.bf16.msra.mxu1 %v5604_v8  ;;  %v5610_v14 = vld [vmem:[#allocation7 + $0x38] ss:$12 sps:$4 sm:$0xff]   ;;  %v5598_v15 = vld [vmem:[#allocation7 + $0x60] ss:$12 sps:$4 sm:$0xff]   ;;  %v115_v16 = vpack.c.bf16 %v108_v13, %v107_v12  ;;  %v5599_v17 = vld [vmem:[#allocation7 + $0x7c] ss:$12 sps:$4 sm:$0xff]  }
  0x61   :  { %298 = vmatpush1.bf16.msra.mxu0 %v5589_v4  ;;  %5244 = vmatprep.subr.bf16.mxu1 %v5608_v11  ;;  %v5601_v19 = vld [vmem:[#allocation7 + $0x78] ss:$12 sps:$4 sm:$0xff]   ;;  %v5602_v20 = vld [vmem:[#allocation7 + $0x94] ss:$12 sps:$4 sm:$0xff]   ;;  %v5605_v22 = vld [vmem:[#allocation7 + $0x90] ss:$12 sps:$4 sm:$0xff]  }
  0x62   :  { %299 = vmatprep.subr.bf16.mxu0 %v5590_v5  ;;  %5258 = vmatprep.mubr.bf16.mxu1 %v115_v16  ;;  %v5612_v21 = vld [vmem:[#allocation7 + $0x68] ss:$12 sps:$4 sm:$0xff]   ;;  %v5606_v23 = vld [vmem:[#allocation7 + $0xac] ss:$12 sps:$4 sm:$0xff]   ;;  %v5615_v27 = vld [vmem:[#allocation7 + $0xb0] ss:$12 sps:$4 sm:$0xff]  }
  0x63   :  { %v5613_v24 = vld [vmem:[#allocation7 + $0x80] ss:$12 sps:$4 sm:$0xff]   ;;  %v5609_v25 = vld [vmem:[#allocation7 + $0xa8] ss:$12 sps:$4 sm:$0xff]   ;;  %v5614_v26 = vld [vmem:[#allocation7 + $0x98] ss:$12 sps:$4 sm:$0xff]  }
  0x64   :  { %5245 = vmatpush3.bf16.msra.mxu1 %v5608_v11  ;;  %v109_v28 = vld [vmem:[#allocation4 + $0x10] sm:$0xff]  ;;  %v110_v29 = vld [vmem:[#allocation4 + $0x18] sm:$0xff]  ;;  %v6331_v32 = vld [vmem:[#allocation9] ss:$12 sps:$4 sm:$0xff]   ;;  %vm6193_vm0 = vmmov 0   ;;  %v6391_v63 = vshrl.u32 %v152_v62, 7 }
  0x65   :  { %300 = vmatpush1.bf16.msra.mxu0 %v5592_v6  ;;  %5246 = vmatprep.subr.bf16.mxu1 %v5610_v14  ;;  %v116_v30 = vpack.c.bf16 %v110_v29, %v109_v28  ;;  %v6329_v31 = vld [vmem:[#allocation9 + $0x4] ss:$12 sps:$4 sm:$0xff]   ;;  %v5619_v33 = vld [vmem:[#allocation9 + $0x8] ss:$12 sps:$4 sm:$0xff]   ;;  %v5623_v37 = vld [vmem:[#allocation9 + $0x20] ss:$12 sps:$4 sm:$0xff]  }
  0x66   :  { %301 = vmatprep.subr.bf16.mxu0 %v5593_v7  ;;  %v6336_v35 = vld [vmem:[#allocation9 + $0x1c] ss:$12 sps:$4 sm:$0xff]   ;;  %v6339_v36 = vld [vmem:[#allocation9 + $0x18] ss:$12 sps:$4 sm:$0xff]   ;;  %v6343_v38 = vld [vmem:[#allocation9 + $0x34] ss:$12 sps:$4 sm:$0xff]  }
  0x67   :  { %v6346_v39 = vld [vmem:[#allocation9 + $0x30] ss:$12 sps:$4 sm:$0xff]   ;;  %v5627_v40 = vld [vmem:[#allocation9 + $0x38] ss:$12 sps:$4 sm:$0xff]   ;;  %v112_v43 = vld [vmem:[#allocation4 + $0x28] sm:$0xff]  ;;  %v154_v1 = vsub.s32 0, %v6391_v63 }
  0x68   :  { %5247 = vmatpush3.bf16.msra.mxu1 %v5610_v14  ;;  %v6350_v41 = vld [vmem:[#allocation9 + $0x4c] ss:$12 sps:$4 sm:$0xff]   ;;  %v111_v42 = vld [vmem:[#allocation4 + $0x20] sm:$0xff]  ;;  %v6353_v44 = vld [vmem:[#allocation9 + $0x48] ss:$12 sps:$4 sm:$0xff]   ;;  %v7198_v3 = vsub.s32 1, %v6391_v63 }
  0x69   :  { %302 = vmatpush1.bf16.msra.mxu0 %v5595_v9  ;;  %5248 = vmatprep.subr.bf16.mxu1 %v5611_v18  ;;  %v117_v45 = vpack.c.bf16 %v112_v43, %v111_v42  ;;  %v5631_v46 = vld [vmem:[#allocation9 + $0x50] ss:$12 sps:$4 sm:$0xff]   ;;  %v6360_v48 = vld [vmem:[#allocation9 + $0x60] ss:$12 sps:$4 sm:$0xff]   ;;  %v5635_v49 = vld [vmem:[#allocation9 + $0x68] ss:$12 sps:$4 sm:$0xff]  }
  0x6a   :  { %303 = vmatprep.subr.bf16.mxu0 %v5596_v10  ;;  %v6357_v47 = vld [vmem:[#allocation9 + $0x64] ss:$12 sps:$4 sm:$0xff]   ;;  %v6365_v50 = vld [vmem:[#allocation9 + $0x7c] ss:$12 sps:$4 sm:$0xff]   ;;  %v5639_v55 = vld [vmem:[#allocation9 + $0x80] ss:$12 sps:$4 sm:$0xff]  }
  0x6b   :  { %v113_v51 = vld [vmem:[#allocation4 + $0x30] sm:$0xff]  ;;  %v114_v52 = vld [vmem:[#allocation4 + $0x38] sm:$0xff]  ;;  %v105_v2 = vld [vmem:[%s7189_s3] sm:$0x7]  ;;  %s6194_s25 = smov [#allocation13]   ;;  %s6195_s30 = smov [#allocation14]  }
  0x6c   :  { %5249 = vmatpush3.bf16.msra.mxu1 %v5611_v18  ;;  %v6368_v53 = vld [vmem:[#allocation9 + $0x78] ss:$12 sps:$4 sm:$0xff]   ;;  %v118_v54 = vpack.c.bf16 %v114_v52, %v113_v51  ;;  %v6372_v56 = vld [vmem:[#allocation9 + $0x94] ss:$12 sps:$4 sm:$0xff]   ;;  %v6374_v57 = vld [vmem:[#allocation9 + $0x90] ss:$12 sps:$4 sm:$0xff]   ;;  %v6400_v4 = vrot.slane %v105_v2, %v154_v1  ;;  %v6404_v6 = vrot.slane %v105_v2, %v7198_v3 }
  0x6d   :  { %304 = vmatpush1.bf16.msra.mxu0 %v5598_v15  ;;  %5250 = vmatprep.subr.bf16.mxu1 %v5612_v21  ;;  %v5643_v58 = vld [vmem:[#allocation9 + $0x98] ss:$12 sps:$4 sm:$0xff]   ;;  %v6383_v60 = vld [vmem:[#allocation9 + $0xa8] ss:$12 sps:$4 sm:$0xff]   ;;  %v5647_v61 = vld [vmem:[#allocation9 + $0xb0] ss:$12 sps:$4 sm:$0xff]  }
  0x6e   :  { %305 = vmatprep.subr.bf16.mxu0 %v5599_v17  ;;  %v6380_v59 = vld [vmem:[#allocation9 + $0xac] ss:$12 sps:$4 sm:$0xff]   ;;  %v6434_v28 = vld [vmem:[%s7190_s4] ss:$0 sm:$0xff]  ;;  %s4644_s0 = sshll.u32 %s6194_s25, 4  ;;  %s4656_s26 = sshll.u32 %s6195_s30, 4  ;;  %s4645_s0 = int_to_ptr.vmem [resolvable:$true] %s4644_s0  ;;  %s7149_s26 = int_to_ptr.vmem [resolvable:$true] %s4656_s26 }
  0x6f   :  { %p6133_p13 = scmp.lt.s32.totalorder %s4645_s0, %s4645_s0 }
  0x70   :  { %5251 = vmatpush3.bf16.msra.mxu1 %v5612_v21 }
  0x71   :  { %306 = vmatpush1.bf16.msra.mxu0 %v5601_v19  ;;  %5252 = vmatprep.subr.bf16.mxu1 %v5613_v24 }
  0x72   :  { %307 = vmatprep.subr.bf16.mxu0 %v5602_v20 }
  0x74   :  { %5253 = vmatpush3.bf16.msra.mxu1 %v5613_v24  ;;  %v7197_v24 = vsub.s32 2, %v6391_v63 }
  0x75   :  { %308 = vmatpush1.bf16.msra.mxu0 %v5605_v22  ;;  %5254 = vmatprep.subr.bf16.mxu1 %v5614_v26 }
  0x76   :  { %309 = vmatprep.subr.bf16.mxu0 %v5606_v23 }
  0x78   :  { %5255 = vmatpush3.bf16.msra.mxu1 %v5614_v26  ;;  %v6429_v26 = vrot.slane %v105_v2, %v7197_v24 }
  0x79   :  { %310 = vmatpush1.bf16.msra.mxu0 %v5609_v25  ;;  %5256 = vmatprep.subr.bf16.mxu1 %v5615_v27 }
  0x7a   :  { %649 = vmatprep.subr.bf16.mxu0 %v6329_v31 }
  0x7c   :  { %328 = vmatmul.mubr.bf16.vlgmr.msra.gmra.mrb[0].mxu0 %v115_v16  ;;  %5257 = vmatpush3.bf16.msra.mxu1 %v5615_v27 }
  0x7d   :  { %337 = vmatprep.mubr.bf16.mxu0 %v6191_v0  ;;  %5266 = vmatprep.subr.bf16.mxu1 %v6192_v34 }
  0x7e   :  { %650 = vmatpush1.bf16.msra.mxu0 %v6331_v32 }
  0x7f   :  { %5259 = vmatmul.mubr.bf16.vlgmr.msra.gmra.mrb[0].mxu1 %v116_v30  ;;  %651 = vmatprep.subr.bf16.mxu0 %v6336_v35 }
  0x80   :  { %5267 = vmatpush3.bf16.msra.mxu1 %v5619_v33  ;;  %5262 = vmatprep.mubr.bf16.mxu1 %v117_v45 }
  0x81   :  { %5268 = vmatprep.subr.bf16.mxu1 %v6192_v34 }
  0x82   :  { %652 = vmatpush1.bf16.msra.mxu0 %v6339_v36 }
  0x83   :  { %653 = vmatprep.subr.bf16.mxu0 %v6343_v38 }
  0x84   :  { %338 = vmatmul.mubr.bf16.gmra.mrb[4].mxu0 %v116_v30  ;;  %5269 = vmatpush3.bf16.msra.mxu1 %v5623_v37 }
  0x85   :  { %347 = vmatprep.mubr.bf16.mxu0 %v6191_v0  ;;  %5270 = vmatprep.subr.bf16.mxu1 %v6192_v34 }
  0x86   :  { %654 = vmatpush1.bf16.msra.mxu0 %v6346_v39 }
  0x87   :  { %655 = vmatprep.subr.bf16.mxu0 %v6350_v41  ;;  %5263 = vmatmul.mubr.bf16.gmra.mrb[4].mxu1 %v118_v54 }
  0x88   :  { %5271 = vmatpush3.bf16.msra.mxu1 %v5627_v40  ;;  %5282 = vmatprep.mubr.msk.bf16.mxu1 %vm6193_vm0, %v6192_v34 }
  0x89   :  { %5272 = vmatprep.subr.bf16.mxu1 %v6192_v34 }
  0x8a   :  { %656 = vmatpush1.bf16.msra.mxu0 %v6353_v44 }
  0x8b   :  { %657 = vmatprep.subr.bf16.mxu0 %v6357_v47 }
  0x8c   :  { %5273 = vmatpush3.bf16.msra.mxu1 %v5631_v46  ;;  %348 = vmatmul.mubr.bf16.gmra.mrb[8].mxu0 %v117_v45 }
  0x8d   :  { %5274 = vmatprep.subr.bf16.mxu1 %v6192_v34  ;;  %357 = vmatprep.mubr.bf16.mxu0 %v6191_v0 }
  0x8e   :  { %658 = vmatpush1.bf16.msra.mxu0 %v6360_v48 }
  0x8f   :  { %659 = vmatprep.subr.bf16.mxu0 %v6365_v50 }
  0x90   :  { %5275 = vmatpush3.bf16.msra.mxu1 %v5635_v49 }
  0x91   :  { %5276 = vmatprep.subr.bf16.mxu1 %v6192_v34 }
  0x92   :  { %660 = vmatpush1.bf16.msra.mxu0 %v6368_v53 }
  0x93   :  { %661 = vmatprep.subr.bf16.mxu0 %v6372_v56 }
  0x94   :  { %5277 = vmatpush3.bf16.msra.mxu1 %v5639_v55  ;;  %358 = vmatmul.mubr.bf16.gmra.mrb[12].mxu0 %v118_v54 }
  0x95   :  { %5278 = vmatprep.subr.bf16.mxu1 %v6192_v34  ;;  %681 = vmatprep.mubr.bf16.mxu0 %v6191_v0 }
  0x96   :  { %662 = vmatpush1.bf16.msra.mxu0 %v6374_v57 }
  0x97   :  { %663 = vmatprep.subr.bf16.mxu0 %v6380_v59 }
  0x98   :  { %5279 = vmatpush3.bf16.msra.mxu1 %v5643_v58 }
  0x99   :  { %5280 = vmatprep.subr.bf16.mxu1 %v6192_v34 }
  0x9a   :  { %664 = vmatpush1.bf16.msra.mxu0 %v6383_v60 }
  0x9b   :  { %919 = vmatprep.subr.bf16.mxu0 %v6329_v31 }
  0x9c   :  { %5281 = vmatpush3.bf16.msra.mxu1 %v5647_v61 }
  0x9d   :  { %5286 = vmatprep.subr.bf16.mxu1 %v6192_v34 }
 0x14f   :  { %v329_v5 = vpop.f32.mrb[0].mxu0 }
 0x150   :  { %v330_v7 = vadd.f32 %v329_v5, %v6400_v4  ;;  %v331_v8 = vpop.f32.mrb[1].mxu0 }
 0x151   :  { %v6407_v9 = vpop.f32.mrb[2].mxu0  ;;  %v332_v12 = vadd.f32 %v331_v8, %v6404_v6 }
 0x152   :  { %v4699_v10 = vmul.f32 -1.442695, %v330_v7  ;;  %v6409_v11 = vpop.f32.mrb[3].mxu0  ;;  %v6414_v15 = vpop.f32.mrb[0].mxu1 }
 0x153   :  { %v4700_v13 = vmul.f32 -1.442695, %v332_v12  ;;  %v402_v17 = vpop.f32.mrb[1].mxu1  ;;  %v5649_v12 = vld [vmem:[#allocation9 + $0x20] ss:$12 sps:$4 sm:$0xff]  }
 0x154   :  { %5856 = vpow2.f32 %v4699_v10  ;;  %v6420_v19 = vpop.f32.mrb[2].mxu1  ;;  %v403_v29 = vadd.f32 %v402_v17, %v6429_v26  ;;  %v5648_v10 = vld [vmem:[#allocation9 + $0x8] ss:$12 sps:$4 sm:$0xff]   ;;  %v5651_v17 = vld [vmem:[#allocation9 + $0x50] ss:$12 sps:$4 sm:$0xff]  }
 0x155   :  { %5858 = vpow2.f32 %v4700_v13  ;;  %v6424_v21 = vpop.f32.mrb[3].mxu1  ;;  %v5650_v13 = vld [vmem:[#allocation9 + $0x38] ss:$12 sps:$4 sm:$0xff]  }
 0x157   :  { %v6412_v14 = vpop.f32.mrb[4].mxu0 }
 0x158   :  { %v6416_v16 = vpop.f32.mrb[5].mxu0 }
 0x159   :  { %v6418_v18 = vpop.f32.mrb[6].mxu0 }
 0x15a   :  { %v6422_v20 = vpop.f32.mrb[7].mxu0  ;;  %v6471_v58 = vpop.f32.mrb[4].mxu1 }
 0x15b   :  { %v6475_v62 = vpop.f32.mrb[5].mxu1 }
 0x15c   :  { %v6479_v5 = vpop.f32.mrb[6].mxu1 }
 0x15d   :  { %v6483_v8 = vpop.f32.mrb[7].mxu1 }
 0x15e   :  { %v5857_v22 = vpop.eup %5856 }
 0x15f   :  { %v469_v23 = vadd.f32 1.0, %v5857_v22  ;;  %v5859_v25 = vpop.eup %5858  ;;  %v6461_v49 = vpop.f32.mrb[8].mxu0  ;;  %v5652_v22 = vld [vmem:[#allocation9 + $0x68] ss:$12 sps:$4 sm:$0xff]  }
 0x160   :  { %v475_v27 = vadd.f32 1.0, %v5859_v25  ;;  %v6463_v51 = vpop.f32.mrb[9].mxu0  ;;  %v5654_v25 = vld [vmem:[#allocation9 + $0x98] ss:$12 sps:$4 sm:$0xff]  }
 0x161   :  { %5860 = vrcp.f32 %v469_v23  ;;  %v6465_v52 = vpop.f32.mrb[10].mxu0  ;;  %v5653_v23 = vld [vmem:[#allocation9 + $0x80] ss:$12 sps:$4 sm:$0xff]  }
 0x162   :  { %5862 = vrcp.f32 %v475_v27  ;;  %v6467_v54 = vpop.f32.mrb[11].mxu0  ;;  %v5655_v27 = vld [vmem:[#allocation9 + $0xb0] ss:$12 sps:$4 sm:$0xff]  }
 0x167   :  { %v6469_v55 = vpop.f32.mrb[12].mxu0 }
 0x168   :  { %v6473_v61 = vpop.f32.mrb[13].mxu0 }
 0x169   :  { %v6477_v2 = vpop.f32.mrb[14].mxu0 }
 0x16a   :  { %v6481_v7 = vpop.f32.mrb[15].mxu0 }
 0x16b   :  { %v5861_v30 = vpop.eup %5860 }
 0x16c   :  { %v478_v33 = vmul.f32 %v5861_v30, %v6434_v28  ;;  %v5863_v40 = vpop.eup %5862  ;;  %v336_v30 = vadd.f32 %v6409_v11, %v6404_v6 }
 0x16d   :  { %v481_v42 = vsub.f32 1.0, %v5863_v40 }
 0x16e   :  { %v479_v37 = vadd.f32 %v478_v33, %v403_v29  ;;  %v334_v29 = vadd.f32 %v6407_v9, %v6400_v4 }
 0x170   :  { %5864 = vtanh.f32 %v479_v37 }
 0x17a   :  { %v5865_v43 = vpop.eup %5864 }
 0x17b   :  { %v6438_v45 = vmul.f32 %v5865_v43, %v481_v42 }
 0x17d   :  { %v488_v46 = vpack.c.bf16 %v6438_v45, %v6438_v45 }
 0x17f   :  { %682 = vmatmul.mubr.bf16.vlgmr.msra.gmra.mrb[16].mxu0 %v488_v46  ;;  %5283 = vmatmul.mubr.bf16.vlgmr.msra.gmra.mrb[8].mxu1 %v488_v46 }
 0x180   :  { %920 = vmatpush1.bf16.msra.mxu0 %v6331_v32  ;;  %951 = vmatprep.mubr.bf16.mxu0 %v6191_v0 }
 0x181   :  { %921 = vmatprep.subr.bf16.mxu0 %v6336_v35  ;;  %5302 = vmatprep.mubr.msk.bf16.mxu1 %vm6193_vm0, %v6192_v34 }
 0x182   :  { %5287 = vmatpush3.bf16.msra.mxu1 %v5648_v10 }
 0x183   :  { %5288 = vmatprep.subr.bf16.mxu1 %v6192_v34 }
 0x184   :  { %922 = vmatpush1.bf16.msra.mxu0 %v6339_v36 }
 0x185   :  { %923 = vmatprep.subr.bf16.mxu0 %v6343_v38 }
 0x186   :  { %5289 = vmatpush3.bf16.msra.mxu1 %v5649_v12 }
 0x187   :  { %5290 = vmatprep.subr.bf16.mxu1 %v6192_v34 }
 0x188   :  { %924 = vmatpush1.bf16.msra.mxu0 %v6346_v39 }
 0x189   :  { %925 = vmatprep.subr.bf16.mxu0 %v6350_v41 }
 0x18a   :  { %5291 = vmatpush3.bf16.msra.mxu1 %v5650_v13 }
 0x18b   :  { %5292 = vmatprep.subr.bf16.mxu1 %v6192_v34 }
 0x18c   :  { %926 = vmatpush1.bf16.msra.mxu0 %v6353_v44 }
 0x18d   :  { %927 = vmatprep.subr.bf16.mxu0 %v6357_v47 }
 0x18e   :  { %5293 = vmatpush3.bf16.msra.mxu1 %v5651_v17 }
 0x18f   :  { %5294 = vmatprep.subr.bf16.mxu1 %v6192_v34 }
 0x190   :  { %928 = vmatpush1.bf16.msra.mxu0 %v6360_v48 }
 0x191   :  { %929 = vmatprep.subr.bf16.mxu0 %v6365_v50 }
 0x192   :  { %5295 = vmatpush3.bf16.msra.mxu1 %v5652_v22 }
 0x193   :  { %5296 = vmatprep.subr.bf16.mxu1 %v6192_v34 }
 0x194   :  { %930 = vmatpush1.bf16.msra.mxu0 %v6368_v53 }
 0x195   :  { %931 = vmatprep.subr.bf16.mxu0 %v6372_v56 }
 0x196   :  { %5297 = vmatpush3.bf16.msra.mxu1 %v5653_v23 }
 0x197   :  { %5298 = vmatprep.subr.bf16.mxu1 %v6192_v34 }
 0x198   :  { %932 = vmatpush1.bf16.msra.mxu0 %v6374_v57 }
 0x199   :  { %933 = vmatprep.subr.bf16.mxu0 %v6380_v59 }
 0x19a   :  { %5299 = vmatpush3.bf16.msra.mxu1 %v5654_v25 }
 0x19b   :  { %5300 = vmatprep.subr.bf16.mxu1 %v6192_v34 }
 0x19c   :  { %934 = vmatpush1.bf16.msra.mxu0 %v6383_v60 }
 0x19d   :  { %1189 = vmatprep.subr.bf16.mxu0 %v6329_v31 }
 0x19e   :  { %5301 = vmatpush3.bf16.msra.mxu1 %v5655_v27 }
 0x19f   :  { %5306 = vmatprep.subr.bf16.mxu1 %v6192_v34 }
 0x252   :  { %v683_v33 = vpop.f32.mrb[16].mxu0  ;;  %v724_v37 = vpop.f32.mrb[8].mxu1 }
 0x253   :  { %v730_v40 = vadd.f32 %v683_v33, %v334_v29  ;;  %v685_v42 = vpop.f32.mrb[17].mxu0  ;;  %v5284_v43 = vpop.f32.mrb[9].mxu1  ;;  %v744_v11 = vadd.f32 %v6434_v28, %v724_v37  ;;  %v406_v29 = vadd.f32 %v6424_v21, %v6429_v26  ;;  %v5657_v21 = vld [vmem:[#allocation9 + $0x20] ss:$12 sps:$4 sm:$0xff]   ;;  %v5659_v37 = vld [vmem:[#allocation9 + $0x50] ss:$12 sps:$4 sm:$0xff]  }
 0x254   :  { %v737_v46 = vadd.f32 %v685_v42, %v336_v30  ;;  %v687_v10 = vpop.f32.mrb[18].mxu0  ;;  %v727_v12 = vpop.f32.mrb[10].mxu1 }
 0x255   :  { %v4725_v13 = vmul.f32 -1.442695, %v730_v40  ;;  %v688_v17 = vpop.f32.mrb[19].mxu0  ;;  %v5285_v22 = vpop.f32.mrb[11].mxu1 }
 0x256   :  { %v4726_v23 = vmul.f32 -1.442695, %v737_v46  ;;  %v5660_v17 = vld [vmem:[#allocation9 + $0x68] ss:$12 sps:$4 sm:$0xff]   ;;  %v5661_v22 = vld [vmem:[#allocation9 + $0x80] ss:$12 sps:$4 sm:$0xff]  }
 0x257   :  { %5866 = vpow2.f32 %v4725_v13 }
 0x258   :  { %5868 = vpow2.f32 %v4726_v23  ;;  %v5663_v23 = vld [vmem:[#allocation9 + $0xb0] ss:$12 sps:$4 sm:$0xff]  }
 0x261   :  { %v5867_v25 = vpop.eup %5866 }
 0x262   :  { %v734_v27 = vadd.f32 1.0, %v5867_v25  ;;  %v5869_v9 = vpop.eup %5868  ;;  %v340_v25 = vadd.f32 %v6412_v14, %v6400_v4 }
 0x263   :  { %v741_v24 = vadd.f32 1.0, %v5869_v9 }
 0x264   :  { %5870 = vrcp.f32 %v734_v27  ;;  %v342_v27 = vadd.f32 %v6416_v16, %v6404_v6 }
 0x265   :  { %5872 = vrcp.f32 %v741_v24  ;;  %v5658_v24 = vld [vmem:[#allocation9 + $0x38] ss:$12 sps:$4 sm:$0xff]  }
 0x26e   :  { %v5871_v3 = vpop.eup %5870 }
 0x26f   :  { %v745_v30 = vmul.f32 %v5871_v3, %v744_v11  ;;  %v5873_v40 = vpop.eup %5872  ;;  %v5656_v3 = vld [vmem:[#allocation9 + $0x8] ss:$12 sps:$4 sm:$0xff]  }
 0x270   :  { %v748_v42 = vsub.f32 1.0, %v5873_v40  ;;  %v750_v10 = vmul.f32 %v5873_v40, %v6438_v45 }
 0x271   :  { %v746_v33 = vadd.f32 %v745_v30, %v406_v29 }
 0x273   :  { %5874 = vtanh.f32 %v746_v33 }
 0x27d   :  { %v5875_v43 = vpop.eup %5874 }
 0x27e   :  { %v749_v46 = vmul.f32 %v5875_v43, %v748_v42 }
 0x280   :  { %v6501_v12 = vadd.f32 %v750_v10, %v749_v46 }
 0x282   :  { %v758_v13 = vpack.c.bf16 %v6501_v12, %v6501_v12 }
 0x284   :  { %952 = vmatmul.mubr.bf16.vlgmr.msra.gmra.mrb[20].mxu0 %v758_v13  ;;  %5303 = vmatmul.mubr.bf16.vlgmr.msra.gmra.mrb[12].mxu1 %v758_v13 }
 0x285   :  { %1190 = vmatpush1.bf16.msra.mxu0 %v6331_v32  ;;  %1221 = vmatprep.mubr.bf16.mxu0 %v6191_v0 }
 0x286   :  { %1191 = vmatprep.subr.bf16.mxu0 %v6336_v35  ;;  %5322 = vmatprep.mubr.msk.bf16.mxu1 %vm6193_vm0, %v6192_v34 }
 0x287   :  { %5307 = vmatpush3.bf16.msra.mxu1 %v5656_v3 }
 0x288   :  { %5308 = vmatprep.subr.bf16.mxu1 %v6192_v34 }
 0x289   :  { %1192 = vmatpush1.bf16.msra.mxu0 %v6339_v36 }
 0x28a   :  { %1193 = vmatprep.subr.bf16.mxu0 %v6343_v38 }
 0x28b   :  { %5309 = vmatpush3.bf16.msra.mxu1 %v5657_v21 }
 0x28c   :  { %5310 = vmatprep.subr.bf16.mxu1 %v6192_v34 }
 0x28d   :  { %1194 = vmatpush1.bf16.msra.mxu0 %v6346_v39 }
 0x28e   :  { %1195 = vmatprep.subr.bf16.mxu0 %v6350_v41 }
 0x28f   :  { %5311 = vmatpush3.bf16.msra.mxu1 %v5658_v24 }
 0x290   :  { %5312 = vmatprep.subr.bf16.mxu1 %v6192_v34 }
 0x291   :  { %1196 = vmatpush1.bf16.msra.mxu0 %v6353_v44 }
 0x292   :  { %1197 = vmatprep.subr.bf16.mxu0 %v6357_v47 }
 0x293   :  { %5313 = vmatpush3.bf16.msra.mxu1 %v5659_v37 }
 0x294   :  { %5314 = vmatprep.subr.bf16.mxu1 %v6192_v34 }
 0x295   :  { %1198 = vmatpush1.bf16.msra.mxu0 %v6360_v48 }
 0x296   :  { %1199 = vmatprep.subr.bf16.mxu0 %v6365_v50 }
 0x297   :  { %5315 = vmatpush3.bf16.msra.mxu1 %v5660_v17 }
 0x298   :  { %5316 = vmatprep.subr.bf16.mxu1 %v6192_v34 }
 0x299   :  { %1200 = vmatpush1.bf16.msra.mxu0 %v6368_v53 }
 0x29a   :  { %1201 = vmatprep.subr.bf16.mxu0 %v6372_v56 }
 0x29b   :  { %5317 = vmatpush3.bf16.msra.mxu1 %v5661_v22  ;;  %v411_v22 = vadd.f32 %v6414_v15, %v6429_v26 }
 0x29c   :  { %5318 = vmatprep.subr.bf16.mxu1 %v6192_v34 }
 0x29d   :  { %1202 = vmatpush1.bf16.msra.mxu0 %v6374_v57 }
 0x29e   :  { %1203 = vmatprep.subr.bf16.mxu0 %v6380_v59 }
 0x2a1   :  { %1204 = vmatpush1.bf16.msra.mxu0 %v6383_v60 }
 0x2a2   :  { %1459 = vmatprep.subr.bf16.mxu0 %v6329_v31  ;;  %v5662_v31 = vld [vmem:[#allocation9 + $0x98] ss:$12 sps:$4 sm:$0xff]  }
 0x2a3   :  { %5319 = vmatpush3.bf16.msra.mxu1 %v5662_v31 }
 0x2a4   :  { %5320 = vmatprep.subr.bf16.mxu1 %v6192_v34 }
 0x2a7   :  { %5321 = vmatpush3.bf16.msra.mxu1 %v5663_v23 }
 0x2a8   :  { %5326 = vmatprep.subr.bf16.mxu1 %v6192_v34 }
 0x357   :  { %v953_v9 = vpop.f32.mrb[20].mxu0  ;;  %v994_v11 = vpop.f32.mrb[12].mxu1 }
 0x358   :  { %v1000_v29 = vadd.f32 %v953_v9, %v340_v25  ;;  %v955_v30 = vpop.f32.mrb[21].mxu0  ;;  %v5304_v33 = vpop.f32.mrb[13].mxu1  ;;  %v1014_v16 = vadd.f32 %v6434_v28, %v994_v11 }
 0x359   :  { %v1007_v40 = vadd.f32 %v955_v30, %v342_v27  ;;  %v957_v42 = vpop.f32.mrb[22].mxu0  ;;  %v997_v43 = vpop.f32.mrb[14].mxu1 }
 0x35a   :  { %v4751_v46 = vmul.f32 -1.442695, %v1000_v29  ;;  %v958_v10 = vpop.f32.mrb[23].mxu0  ;;  %v5305_v13 = vpop.f32.mrb[15].mxu1 }
 0x35b   :  { %v4752_v3 = vmul.f32 -1.442695, %v1007_v40 }
 0x35c   :  { %5876 = vpow2.f32 %v4751_v46 }
 0x35d   :  { %5878 = vpow2.f32 %v4752_v3 }
 0x366   :  { %v5877_v21 = vpop.eup %5876 }
 0x367   :  { %v1004_v24 = vadd.f32 1.0, %v5877_v21  ;;  %v5879_v14 = vpop.eup %5878 }
 0x368   :  { %v1011_v37 = vadd.f32 1.0, %v5879_v14 }
 0x369   :  { %5880 = vrcp.f32 %v1004_v24 }
 0x36a   :  { %5882 = vrcp.f32 %v1011_v37 }
 0x373   :  { %v5881_v17 = vpop.eup %5880 }
 0x374   :  { %v1015_v31 = vmul.f32 %v5881_v17, %v1014_v16  ;;  %v5883_v25 = vpop.eup %5882 }
 0x375   :  { %v1018_v27 = vsub.f32 1.0, %v5883_v25  ;;  %v1020_v30 = vmul.f32 %v5883_v25, %v6501_v12 }
 0x376   :  { %v1016_v23 = vadd.f32 %v1015_v31, %v411_v22  ;;  %v414_v31 = vadd.f32 %v6420_v19, %v6429_v26  ;;  %v6585_v19 = vld [vmem:[#allocation9 + $0x4] ss:$12 sps:$4 sm:$0xff]  }
 0x378   :  { %5884 = vtanh.f32 %v1016_v23 }
 0x382   :  { %v5885_v9 = vpop.eup %5884 }
 0x383   :  { %v1019_v29 = vmul.f32 %v5885_v9, %v1018_v27 }
 0x385   :  { %v6540_v33 = vadd.f32 %v1020_v30, %v1019_v29 }
 0x387   :  { %v1028_v40 = vpack.c.bf16 %v6540_v33, %v6540_v33 }
 0x389   :  { %1222 = vmatmul.mubr.bf16.vlgmr.msra.gmra.mrb[24].mxu0 %v1028_v40  ;;  %5323 = vmatmul.mubr.bf16.vlgmr.msra.gmra.mrb[16].mxu1 %v1028_v40 }
 0x38a   :  { %1460 = vmatpush1.bf16.msra.mxu0 %v6331_v32  ;;  %1491 = vmatprep.mubr.bf16.mxu0 %v6191_v0  ;;  %v5664_v32 = vld [vmem:[#allocation9 + $0x8] ss:$12 sps:$4 sm:$0xff]  }
 0x38b   :  { %1461 = vmatprep.subr.bf16.mxu0 %v6336_v35  ;;  %5342 = vmatprep.mubr.msk.bf16.mxu1 %vm6193_vm0, %v6192_v34  ;;  %v5665_v35 = vld [vmem:[#allocation9 + $0x20] ss:$12 sps:$4 sm:$0xff]  }
 0x38c   :  { %5327 = vmatpush3.bf16.msra.mxu1 %v5664_v32 }
 0x38d   :  { %5328 = vmatprep.subr.bf16.mxu1 %v6192_v34 }
 0x38e   :  { %1462 = vmatpush1.bf16.msra.mxu0 %v6339_v36  ;;  %v5666_v36 = vld [vmem:[#allocation9 + $0x38] ss:$12 sps:$4 sm:$0xff]  }
 0x38f   :  { %1463 = vmatprep.subr.bf16.mxu0 %v6343_v38  ;;  %v5667_v38 = vld [vmem:[#allocation9 + $0x50] ss:$12 sps:$4 sm:$0xff]  }
 0x390   :  { %5329 = vmatpush3.bf16.msra.mxu1 %v5665_v35 }
 0x391   :  { %5330 = vmatprep.subr.bf16.mxu1 %v6192_v34 }
 0x392   :  { %1464 = vmatpush1.bf16.msra.mxu0 %v6346_v39  ;;  %v5668_v39 = vld [vmem:[#allocation9 + $0x68] ss:$12 sps:$4 sm:$0xff]  }
 0x393   :  { %1465 = vmatprep.subr.bf16.mxu0 %v6350_v41  ;;  %v5669_v41 = vld [vmem:[#allocation9 + $0x80] ss:$12 sps:$4 sm:$0xff]  }
 0x394   :  { %5331 = vmatpush3.bf16.msra.mxu1 %v5666_v36  ;;  %v6587_v36 = vld [vmem:[#allocation9] ss:$12 sps:$4 sm:$0xff]  }
 0x395   :  { %5332 = vmatprep.subr.bf16.mxu1 %v6192_v34 }
 0x396   :  { %1466 = vmatpush1.bf16.msra.mxu0 %v6353_v44  ;;  %v5670_v44 = vld [vmem:[#allocation9 + $0x98] ss:$12 sps:$4 sm:$0xff]  }
 0x397   :  { %1467 = vmatprep.subr.bf16.mxu0 %v6357_v47  ;;  %v5671_v47 = vld [vmem:[#allocation9 + $0xb0] ss:$12 sps:$4 sm:$0xff]  }
 0x398   :  { %5333 = vmatpush3.bf16.msra.mxu1 %v5667_v38  ;;  %v5675_v38 = vld [vmem:[#allocation9 + $0x8] ss:$12 sps:$4 sm:$0xff]  }
 0x399   :  { %5334 = vmatprep.subr.bf16.mxu1 %v6192_v34 }
 0x39a   :  { %1468 = vmatpush1.bf16.msra.mxu0 %v6360_v48  ;;  %v344_v48 = vadd.f32 %v6418_v18, %v6400_v4 }
 0x39b   :  { %1469 = vmatprep.subr.bf16.mxu0 %v6365_v50  ;;  %v346_v50 = vadd.f32 %v6422_v20, %v6404_v6 }
 0x39c   :  { %5335 = vmatpush3.bf16.msra.mxu1 %v5668_v39  ;;  %v6591_v39 = vld [vmem:[#allocation9 + $0x1c] ss:$12 sps:$4 sm:$0xff]  }
 0x39d   :  { %5336 = vmatprep.subr.bf16.mxu1 %v6192_v34 }
 0x39e   :  { %1470 = vmatpush1.bf16.msra.mxu0 %v6368_v53 }
 0x39f   :  { %1471 = vmatprep.subr.bf16.mxu0 %v6372_v56 }
 0x3a0   :  { %5337 = vmatpush3.bf16.msra.mxu1 %v5669_v41  ;;  %v6594_v41 = vld [vmem:[#allocation9 + $0x18] ss:$12 sps:$4 sm:$0xff]  }
 0x3a1   :  { %5338 = vmatprep.subr.bf16.mxu1 %v6192_v34 }
 0x3a2   :  { %1472 = vmatpush1.bf16.msra.mxu0 %v6374_v57 }
 0x3a3   :  { %1473 = vmatprep.subr.bf16.mxu0 %v6380_v59 }
 0x3a4   :  { %5339 = vmatpush3.bf16.msra.mxu1 %v5670_v44  ;;  %v5679_v44 = vld [vmem:[#allocation9 + $0x20] ss:$12 sps:$4 sm:$0xff]  }
 0x3a5   :  { %5340 = vmatprep.subr.bf16.mxu1 %v6192_v34 }
 0x3a6   :  { %1474 = vmatpush1.bf16.msra.mxu0 %v6383_v60 }
 0x3a7   :  { %1729 = vmatprep.subr.bf16.mxu0 %v6585_v19 }
 0x3a8   :  { %5341 = vmatpush3.bf16.msra.mxu1 %v5671_v47  ;;  %v6598_v47 = vld [vmem:[#allocation9 + $0x34] ss:$12 sps:$4 sm:$0xff]  }
 0x3a9   :  { %5346 = vmatprep.subr.bf16.mxu1 %v6192_v34 }
 0x45c   :  { %v1223_v53 = vpop.f32.mrb[24].mxu0  ;;  %v1264_v15 = vpop.f32.mrb[16].mxu1 }
 0x45d   :  { %v1270_v11 = vadd.f32 %v1223_v53, %v344_v48  ;;  %v1225_v42 = vpop.f32.mrb[25].mxu0  ;;  %v5324_v43 = vpop.f32.mrb[17].mxu1  ;;  %v1284_v20 = vadd.f32 %v6434_v28, %v1264_v15  ;;  %v6601_v48 = vld [vmem:[#allocation9 + $0x30] ss:$12 sps:$4 sm:$0xff]   ;;  %v6605_v53 = vld [vmem:[#allocation9 + $0x4c] ss:$12 sps:$4 sm:$0xff]  }
 0x45e   :  { %v1277_v46 = vadd.f32 %v1225_v42, %v346_v50  ;;  %v1227_v10 = vpop.f32.mrb[26].mxu0  ;;  %v1267_v13 = vpop.f32.mrb[18].mxu1  ;;  %v5683_v50 = vld [vmem:[#allocation9 + $0x38] ss:$12 sps:$4 sm:$0xff]   ;;  %v6608_v15 = vld [vmem:[#allocation9 + $0x48] ss:$12 sps:$4 sm:$0xff]  }
 0x45f   :  { %v4777_v3 = vmul.f32 -1.442695, %v1270_v11  ;;  %v1228_v21 = vpop.f32.mrb[27].mxu0  ;;  %v5325_v24 = vpop.f32.mrb[19].mxu1  ;;  %v5687_v11 = vld [vmem:[#allocation9 + $0x50] ss:$12 sps:$4 sm:$0xff]  }
 0x460   :  { %v4778_v14 = vmul.f32 -1.442695, %v1277_v46  ;;  %v6612_v42 = vld [vmem:[#allocation9 + $0x64] ss:$12 sps:$4 sm:$0xff]   ;;  %v6615_v43 = vld [vmem:[#allocation9 + $0x60] ss:$12 sps:$4 sm:$0xff]  }
 0x461   :  { %5886 = vpow2.f32 %v4777_v3  ;;  %v5691_v46 = vld [vmem:[#allocation9 + $0x68] ss:$12 sps:$4 sm:$0xff]   ;;  %v6621_v13 = vld [vmem:[#allocation9 + $0x78] ss:$12 sps:$4 sm:$0xff]   ;;  %v5695_v3 = vld [vmem:[#allocation9 + $0x80] ss:$12 sps:$4 sm:$0xff]  }
 0x462   :  { %5888 = vpow2.f32 %v4778_v14  ;;  %v6618_v10 = vld [vmem:[#allocation9 + $0x7c] ss:$12 sps:$4 sm:$0xff]   ;;  %v5696_v21 = vld [vmem:[#allocation9 + $0x98] ss:$12 sps:$4 sm:$0xff]   ;;  %v352_v14 = vadd.f32 %v6463_v51, %v6404_v6 }
 0x463   :  { %v5697_v24 = vld [vmem:[#allocation9 + $0xb0] ss:$12 sps:$4 sm:$0xff]  }
 0x46b   :  { %v5887_v37 = vpop.eup %5886 }
 0x46c   :  { %v1274_v16 = vadd.f32 1.0, %v5887_v37  ;;  %v5889_v18 = vpop.eup %5888 }
 0x46d   :  { %v1281_v17 = vadd.f32 1.0, %v5889_v18 }
 0x46e   :  { %5890 = vrcp.f32 %v1274_v16 }
 0x46f   :  { %5892 = vrcp.f32 %v1281_v17 }
 0x478   :  { %v5891_v22 = vpop.eup %5890 }
 0x479   :  { %v1285_v23 = vmul.f32 %v5891_v22, %v1284_v20  ;;  %v5893_v27 = vpop.eup %5892 }
 0x47a   :  { %v1288_v9 = vsub.f32 1.0, %v5893_v27  ;;  %v1290_v40 = vmul.f32 %v5893_v27, %v6540_v33 }
 0x47b   :  { %v1286_v25 = vadd.f32 %v1285_v23, %v414_v31 }
 0x47d   :  { %5894 = vtanh.f32 %v1286_v25 }
 0x487   :  { %v5895_v29 = vpop.eup %5894 }
 0x488   :  { %v1289_v30 = vmul.f32 %v5895_v29, %v1288_v9 }
 0x48a   :  { %v6578_v32 = vadd.f32 %v1290_v40, %v1289_v30  ;;  %v419_v40 = vadd.f32 %v6475_v62, %v6429_v26  ;;  %v5698_v62 = vld [vmem:[#allocation9 + $0x8] ss:$12 sps:$4 sm:$0xff]  }
 0x48c   :  { %v1298_v35 = vpack.c.bf16 %v6578_v32, %v6578_v32 }
 0x48e   :  { %1492 = vmatmul.mubr.bf16.vlgmr.msra.gmra.mrb[28].mxu0 %v1298_v35  ;;  %5343 = vmatmul.mubr.bf16.vlgmr.msra.gmra.mrb[20].mxu1 %v1298_v35 }
 0x48f   :  { %1761 = vmatprep.mubr.bf16.mxu0 %v6191_v0  ;;  %5362 = vmatprep.mubr.msk.bf16.mxu1 %vm6193_vm0, %v6192_v34 }
 0x490   :  { %1730 = vmatpush1.bf16.msra.mxu0 %v6587_v36  ;;  %5347 = vmatpush3.bf16.msra.mxu1 %v5675_v38 }
 0x491   :  { %5348 = vmatprep.subr.bf16.mxu1 %v6192_v34  ;;  %1731 = vmatprep.subr.bf16.mxu0 %v6591_v39 }
 0x494   :  { %1732 = vmatpush1.bf16.msra.mxu0 %v6594_v41  ;;  %5349 = vmatpush3.bf16.msra.mxu1 %v5679_v44 }
 0x495   :  { %5350 = vmatprep.subr.bf16.mxu1 %v6192_v34  ;;  %1733 = vmatprep.subr.bf16.mxu0 %v6598_v47 }
 0x498   :  { %1734 = vmatpush1.bf16.msra.mxu0 %v6601_v48  ;;  %5351 = vmatpush3.bf16.msra.mxu1 %v5683_v50 }
 0x499   :  { %5352 = vmatprep.subr.bf16.mxu1 %v6192_v34  ;;  %1735 = vmatprep.subr.bf16.mxu0 %v6605_v53 }
 0x49c   :  { %1736 = vmatpush1.bf16.msra.mxu0 %v6608_v15  ;;  %5353 = vmatpush3.bf16.msra.mxu1 %v5687_v11 }
 0x49d   :  { %5354 = vmatprep.subr.bf16.mxu1 %v6192_v34  ;;  %1737 = vmatprep.subr.bf16.mxu0 %v6612_v42 }
 0x4a0   :  { %1738 = vmatpush1.bf16.msra.mxu0 %v6615_v43  ;;  %5355 = vmatpush3.bf16.msra.mxu1 %v5691_v46 }
 0x4a1   :  { %1739 = vmatprep.subr.bf16.mxu0 %v6618_v10  ;;  %5356 = vmatprep.subr.bf16.mxu1 %v6192_v34 }
 0x4a4   :  { %1740 = vmatpush1.bf16.msra.mxu0 %v6621_v13  ;;  %5357 = vmatpush3.bf16.msra.mxu1 %v5695_v3 }
 0x4a5   :  { %1741 = vmatprep.subr.bf16.mxu0 %v6372_v56  ;;  %5358 = vmatprep.subr.bf16.mxu1 %v6192_v34  ;;  %v350_v56 = vadd.f32 %v6461_v49, %v6400_v4 }
 0x4a8   :  { %1742 = vmatpush1.bf16.msra.mxu0 %v6374_v57  ;;  %5359 = vmatpush3.bf16.msra.mxu1 %v5696_v21 }
 0x4a9   :  { %1743 = vmatprep.subr.bf16.mxu0 %v6380_v59  ;;  %5360 = vmatprep.subr.bf16.mxu1 %v6192_v34 }
 0x4ac   :  { %1744 = vmatpush1.bf16.msra.mxu0 %v6383_v60  ;;  %5361 = vmatpush3.bf16.msra.mxu1 %v5697_v24 }
 0x4ad   :  { %1999 = vmatprep.subr.bf16.mxu0 %v6585_v19  ;;  %5366 = vmatprep.subr.bf16.mxu1 %v6192_v34 }
 0x561   :  { %v1493_v57 = vpop.f32.mrb[28].mxu0  ;;  %v1534_v37 = vpop.f32.mrb[20].mxu1 }
 0x562   :  { %v1540_v16 = vadd.f32 %v1493_v57, %v350_v56  ;;  %v1495_v18 = vpop.f32.mrb[29].mxu0  ;;  %v5344_v59 = vpop.f32.mrb[21].mxu1  ;;  %v1554_v51 = vadd.f32 %v6434_v28, %v1534_v37  ;;  %v5699_v56 = vld [vmem:[#allocation9 + $0x20] ss:$12 sps:$4 sm:$0xff]   ;;  %v5701_v57 = vld [vmem:[#allocation9 + $0x50] ss:$12 sps:$4 sm:$0xff]  }
 0x563   :  { %v1547_v17 = vadd.f32 %v1495_v18, %v352_v14  ;;  %v1497_v20 = vpop.f32.mrb[30].mxu0  ;;  %v1537_v22 = vpop.f32.mrb[22].mxu1  ;;  %v5700_v14 = vld [vmem:[#allocation9 + $0x38] ss:$12 sps:$4 sm:$0xff]   ;;  %v5702_v37 = vld [vmem:[#allocation9 + $0x68] ss:$12 sps:$4 sm:$0xff]  }
 0x564   :  { %v4803_v60 = vmul.f32 -1.442695, %v1540_v16  ;;  %v1498_v31 = vpop.f32.mrb[31].mxu0  ;;  %v5345_v23 = vpop.f32.mrb[23].mxu1  ;;  %v6664_v16 = vld [vmem:[#allocation9 + $0x90] ss:$12 sps:$4 sm:$0xff]  }
 0x565   :  { %v4804_v25 = vmul.f32 -1.442695, %v1547_v17  ;;  %v6666_v18 = vld [vmem:[#allocation9 + $0x94] ss:$12 sps:$4 sm:$0xff]   ;;  %v6668_v17 = vld [vmem:[#allocation9 + $0xac] ss:$12 sps:$4 sm:$0xff]   ;;  %v354_v31 = vadd.f32 %v6465_v52, %v6400_v4  ;;  %v356_v23 = vadd.f32 %v6467_v54, %v6404_v6 }
 0x566   :  { %5896 = vpow2.f32 %v4803_v60  ;;  %v5703_v59 = vld [vmem:[#allocation9 + $0x80] ss:$12 sps:$4 sm:$0xff]   ;;  %v6673_v20 = vld [vmem:[#allocation9 + $0xa8] ss:$12 sps:$4 sm:$0xff]   ;;  %v5707_v22 = vld [vmem:[#allocation9 + $0x98] ss:$12 sps:$4 sm:$0xff]  }
 0x567   :  { %5898 = vpow2.f32 %v4804_v25  ;;  %v5711_v60 = vld [vmem:[#allocation9 + $0xb0] ss:$12 sps:$4 sm:$0xff]  }
 0x570   :  { %v5897_v27 = vpop.eup %5896 }
 0x571   :  { %v1544_v9 = vadd.f32 1.0, %v5897_v27  ;;  %v5899_v49 = vpop.eup %5898 }
 0x572   :  { %v1551_v29 = vadd.f32 1.0, %v5899_v49 }
 0x573   :  { %5900 = vrcp.f32 %v1544_v9 }
 0x574   :  { %5902 = vrcp.f32 %v1551_v29 }
 0x57d   :  { %v5901_v30 = vpop.eup %5900 }
 0x57e   :  { %v1555_v35 = vmul.f32 %v5901_v30, %v1554_v51  ;;  %v5903_v44 = vpop.eup %5902 }
 0x57f   :  { %v1558_v50 = vsub.f32 1.0, %v5903_v44  ;;  %v1560_v3 = vmul.f32 %v5903_v44, %v6578_v32 }
 0x580   :  { %v1556_v38 = vadd.f32 %v1555_v35, %v419_v40 }
 0x582   :  { %5904 = vtanh.f32 %v1556_v38 }
 0x58c   :  { %v5905_v11 = vpop.eup %5904 }
 0x58d   :  { %v1559_v46 = vmul.f32 %v5905_v11, %v1558_v50 }
 0x58f   :  { %v6642_v21 = vadd.f32 %v1560_v3, %v1559_v46 }
 0x591   :  { %v1568_v24 = vpack.c.bf16 %v6642_v21, %v6642_v21 }
 0x593   :  { %1762 = vmatmul.mubr.bf16.vlgmr.msra.gmra.mrb[32].mxu0 %v1568_v24  ;;  %5363 = vmatmul.mubr.bf16.vlgmr.msra.gmra.mrb[24].mxu1 %v1568_v24  ;;  %v422_v24 = vadd.f32 %v6483_v8, %v6429_v26  ;;  %v5712_v8 = vld [vmem:[#allocation9 + $0x8] ss:$12 sps:$4 sm:$0xff]  }
 0x594   :  { %2000 = vmatpush1.bf16.msra.mxu0 %v6587_v36  ;;  %2031 = vmatprep.mubr.bf16.mxu0 %v6191_v0 }
 0x595   :  { %2001 = vmatprep.subr.bf16.mxu0 %v6591_v39  ;;  %5382 = vmatprep.mubr.msk.bf16.mxu1 %vm6193_vm0, %v6192_v34 }
 0x596   :  { %5367 = vmatpush3.bf16.msra.mxu1 %v5698_v62 }
 0x597   :  { %5368 = vmatprep.subr.bf16.mxu1 %v6192_v34 }
 0x598   :  { %2002 = vmatpush1.bf16.msra.mxu0 %v6594_v41 }
 0x599   :  { %2003 = vmatprep.subr.bf16.mxu0 %v6598_v47 }
 0x59a   :  { %5369 = vmatpush3.bf16.msra.mxu1 %v5699_v56 }
 0x59b   :  { %5370 = vmatprep.subr.bf16.mxu1 %v6192_v34 }
 0x59c   :  { %2004 = vmatpush1.bf16.msra.mxu0 %v6601_v48 }
 0x59d   :  { %2005 = vmatprep.subr.bf16.mxu0 %v6605_v53 }
 0x59e   :  { %5371 = vmatpush3.bf16.msra.mxu1 %v5700_v14 }
 0x59f   :  { %5372 = vmatprep.subr.bf16.mxu1 %v6192_v34 }
 0x5a0   :  { %2006 = vmatpush1.bf16.msra.mxu0 %v6608_v15 }
 0x5a1   :  { %2007 = vmatprep.subr.bf16.mxu0 %v6612_v42 }
 0x5a2   :  { %5373 = vmatpush3.bf16.msra.mxu1 %v5701_v57 }
 0x5a3   :  { %5374 = vmatprep.subr.bf16.mxu1 %v6192_v34 }
 0x5a4   :  { %2008 = vmatpush1.bf16.msra.mxu0 %v6615_v43 }
 0x5a5   :  { %2009 = vmatprep.subr.bf16.mxu0 %v6618_v10 }
 0x5a6   :  { %5375 = vmatpush3.bf16.msra.mxu1 %v5702_v37 }
 0x5a7   :  { %5376 = vmatprep.subr.bf16.mxu1 %v6192_v34 }
 0x5a8   :  { %2010 = vmatpush1.bf16.msra.mxu0 %v6621_v13 }
 0x5a9   :  { %2011 = vmatprep.subr.bf16.mxu0 %v6666_v18 }
 0x5aa   :  { %5377 = vmatpush3.bf16.msra.mxu1 %v5703_v59 }
 0x5ab   :  { %5378 = vmatprep.subr.bf16.mxu1 %v6192_v34 }
 0x5ac   :  { %2012 = vmatpush1.bf16.msra.mxu0 %v6664_v16 }
 0x5ad   :  { %2013 = vmatprep.subr.bf16.mxu0 %v6668_v17 }
 0x5ae   :  { %5379 = vmatpush3.bf16.msra.mxu1 %v5707_v22 }
 0x5af   :  { %5380 = vmatprep.subr.bf16.mxu1 %v6192_v34 }
 0x5b0   :  { %2014 = vmatpush1.bf16.msra.mxu0 %v6673_v20 }
 0x5b1   :  { %2269 = vmatprep.subr.bf16.mxu0 %v6585_v19 }
 0x5b2   :  { %5381 = vmatpush3.bf16.msra.mxu1 %v5711_v60 }
 0x5b3   :  { %5386 = vmatprep.subr.bf16.mxu1 %v6192_v34 }
 0x666   :  { %v1763_v25 = vpop.f32.mrb[32].mxu0  ;;  %v1804_v27 = vpop.f32.mrb[24].mxu1 }
 0x667   :  { %v1810_v9 = vadd.f32 %v1763_v25, %v354_v31  ;;  %v1765_v49 = vpop.f32.mrb[33].mxu0  ;;  %v5364_v29 = vpop.f32.mrb[25].mxu1  ;;  %v1824_v54 = vadd.f32 %v6434_v28, %v1804_v27 }
 0x668   :  { %v1817_v51 = vadd.f32 %v1765_v49, %v356_v23  ;;  %v1767_v19 = vpop.f32.mrb[34].mxu0  ;;  %v1807_v30 = vpop.f32.mrb[26].mxu1 }
 0x669   :  { %v4829_v40 = vmul.f32 -1.442695, %v1810_v9  ;;  %v1768_v35 = vpop.f32.mrb[35].mxu0  ;;  %v5365_v38 = vpop.f32.mrb[27].mxu1 }
 0x66a   :  { %v4830_v44 = vmul.f32 -1.442695, %v1817_v51 }
 0x66b   :  { %5906 = vpow2.f32 %v4829_v40 }
 0x66c   :  { %5908 = vpow2.f32 %v4830_v44  ;;  %v427_v44 = vadd.f32 %v6471_v58, %v6429_v26  ;;  %v2385_v58 = vpack.c.bf16 %v6501_v12, %v6438_v45  ;;  %v5732_v45 = vld [vmem:[#allocation10 + $0x48] ss:$12 sps:$4 sm:$0xff]   ;;  %v5738_v12 = vld [vmem:[#allocation10 + $0x64] ss:$12 sps:$4 sm:$0xff]  }
 0x675   :  { %v5907_v50 = vpop.eup %5906 }
 0x676   :  { %v1814_v11 = vadd.f32 1.0, %v5907_v50  ;;  %v5909_v52 = vpop.eup %5908 }
 0x677   :  { %v1821_v46 = vadd.f32 1.0, %v5909_v52 }
 0x678   :  { %5910 = vrcp.f32 %v1814_v11 }
 0x679   :  { %5912 = vrcp.f32 %v1821_v46 }
 0x682   :  { %v5911_v3 = vpop.eup %5910 }
 0x683   :  { %v1825_v62 = vmul.f32 %v5911_v3, %v1824_v54  ;;  %v5913_v14 = vpop.eup %5912 }
 0x684   :  { %v1828_v57 = vsub.f32 1.0, %v5913_v14  ;;  %v1830_v22 = vmul.f32 %v5913_v14, %v6642_v21  ;;  %v5726_v14 = vld [vmem:[#allocation10 + $0x1c] ss:$12 sps:$4 sm:$0xff]  }
 0x685   :  { %v1826_v56 = vadd.f32 %v1825_v62, %v422_v24 }
 0x687   :  { %5914 = vtanh.f32 %v1826_v56  ;;  %v5720_v56 = vld [vmem:[#allocation10] ss:$12 sps:$4 sm:$0xff]  }
 0x691   :  { %v5915_v37 = vpop.eup %5914 }
 0x692   :  { %v1829_v59 = vmul.f32 %v5915_v37, %v1828_v57  ;;  %v5727_v57 = vld [vmem:[#allocation10 + $0x20] ss:$12 sps:$4 sm:$0xff]   ;;  %v5724_v37 = vld [vmem:[#allocation10 + $0x18] ss:$12 sps:$4 sm:$0xff]  }
 0x694   :  { %v6689_v60 = vadd.f32 %v1830_v22, %v1829_v59  ;;  %v5730_v59 = vld [vmem:[#allocation10 + $0x34] ss:$12 sps:$4 sm:$0xff]   ;;  %v5731_v22 = vld [vmem:[#allocation10 + $0x38] ss:$12 sps:$4 sm:$0xff]  }
 0x696   :  { %v1838_v31 = vpack.c.bf16 %v6689_v60, %v6689_v60 }
 0x698   :  { %2032 = vmatmul.mubr.bf16.vlgmr.msra.gmra.mrb[36].mxu0 %v1838_v31  ;;  %5383 = vmatmul.mubr.bf16.vlgmr.msra.gmra.mrb[28].mxu1 %v1838_v31  ;;  %v5728_v31 = vld [vmem:[#allocation10 + $0x30] ss:$12 sps:$4 sm:$0xff]  }
 0x699   :  { %2270 = vmatpush1.bf16.msra.mxu0 %v6587_v36  ;;  %2301 = vmatprep.mubr.bf16.mxu0 %v6191_v0  ;;  %v5713_v36 = vld [vmem:[#allocation9 + $0x20] ss:$12 sps:$4 sm:$0xff]  }
 0x69a   :  { %2271 = vmatprep.subr.bf16.mxu0 %v6591_v39  ;;  %5402 = vmatprep.mubr.msk.bf16.mxu1 %vm6193_vm0, %v6192_v34  ;;  %v5714_v39 = vld [vmem:[#allocation9 + $0x38] ss:$12 sps:$4 sm:$0xff]  }
 0x69b   :  { %5387 = vmatpush3.bf16.msra.mxu1 %v5712_v8  ;;  %v5734_v8 = vld [vmem:[#allocation10 + $0x4c] ss:$12 sps:$4 sm:$0xff]  }
 0x69c   :  { %5388 = vmatprep.subr.bf16.mxu1 %v6192_v34 }
 0x69d   :  { %2272 = vmatpush1.bf16.msra.mxu0 %v6594_v41  ;;  %v5715_v41 = vld [vmem:[#allocation9 + $0x50] ss:$12 sps:$4 sm:$0xff]  }
 0x69e   :  { %2273 = vmatprep.subr.bf16.mxu0 %v6598_v47  ;;  %v5716_v47 = vld [vmem:[#allocation9 + $0x68] ss:$12 sps:$4 sm:$0xff]  }
 0x69f   :  { %5389 = vmatpush3.bf16.msra.mxu1 %v5713_v36  ;;  %v5735_v36 = vld [vmem:[#allocation10 + $0x50] ss:$12 sps:$4 sm:$0xff]  }
 0x6a0   :  { %5390 = vmatprep.subr.bf16.mxu1 %v6192_v34 }
 0x6a1   :  { %2274 = vmatpush1.bf16.msra.mxu0 %v6601_v48  ;;  %v5717_v48 = vld [vmem:[#allocation9 + $0x80] ss:$12 sps:$4 sm:$0xff]  }
 0x6a2   :  { %2275 = vmatprep.subr.bf16.mxu0 %v6605_v53  ;;  %v5722_v53 = vld [vmem:[#allocation10 + $0x4] ss:$12 sps:$4 sm:$0xff]  }
 0x6a3   :  { %5391 = vmatpush3.bf16.msra.mxu1 %v5714_v39  ;;  %v5739_v39 = vld [vmem:[#allocation10 + $0x68] ss:$12 sps:$4 sm:$0xff]  }
 0x6a4   :  { %5392 = vmatprep.subr.bf16.mxu1 %v6192_v34 }
 0x6a5   :  { %2276 = vmatpush1.bf16.msra.mxu0 %v6608_v15  ;;  %v5718_v15 = vld [vmem:[#allocation9 + $0x98] ss:$12 sps:$4 sm:$0xff]  }
 0x6a6   :  { %2277 = vmatprep.subr.bf16.mxu0 %v6612_v42  ;;  %v5719_v42 = vld [vmem:[#allocation9 + $0xb0] ss:$12 sps:$4 sm:$0xff]  }
 0x6a7   :  { %5393 = vmatpush3.bf16.msra.mxu1 %v5715_v41  ;;  %v5736_v41 = vld [vmem:[#allocation10 + $0x60] ss:$12 sps:$4 sm:$0xff]  }
 0x6a8   :  { %5394 = vmatprep.subr.bf16.mxu1 %v6192_v34 }
 0x6a9   :  { %2278 = vmatpush1.bf16.msra.mxu0 %v6615_v43  ;;  %v5723_v43 = vld [vmem:[#allocation10 + $0x8] ss:$12 sps:$4 sm:$0xff]  }
 0x6aa   :  { %2279 = vmatprep.subr.bf16.mxu0 %v6618_v10  ;;  %v360_v10 = vadd.f32 %v6469_v55, %v6400_v4 }
 0x6ab   :  { %5395 = vmatpush3.bf16.msra.mxu1 %v5716_v47  ;;  %v5742_v47 = vld [vmem:[#allocation10 + $0x7c] ss:$12 sps:$4 sm:$0xff]  }
 0x6ac   :  { %5396 = vmatprep.subr.bf16.mxu1 %v6192_v34 }
 0x6ad   :  { %2280 = vmatpush1.bf16.msra.mxu0 %v6621_v13  ;;  %v362_v13 = vadd.f32 %v6473_v61, %v6404_v6 }
 0x6ae   :  { %2281 = vmatprep.subr.bf16.mxu0 %v6666_v18 }
 0x6af   :  { %5397 = vmatpush3.bf16.msra.mxu1 %v5717_v48  ;;  %v5743_v48 = vld [vmem:[#allocation10 + $0x80] ss:$12 sps:$4 sm:$0xff]  }
 0x6b0   :  { %5398 = vmatprep.subr.bf16.mxu1 %v6192_v34 }
 0x6b1   :  { %2282 = vmatpush1.bf16.msra.mxu0 %v6664_v16 }
 0x6b2   :  { %2283 = vmatprep.subr.bf16.mxu0 %v6668_v17 }
 0x6b3   :  { %5399 = vmatpush3.bf16.msra.mxu1 %v5718_v15  ;;  %v5746_v15 = vld [vmem:[#allocation10 + $0x94] ss:$12 sps:$4 sm:$0xff]  }
 0x6b4   :  { %5400 = vmatprep.subr.bf16.mxu1 %v6192_v34 }
 0x6b5   :  { %2284 = vmatpush1.bf16.msra.mxu0 %v6673_v20 }
 0x6b6   :  { %2565 = vmatprep.subr.bf16.mxu0 %v5722_v53  ;;  %v5740_v53 = vld [vmem:[#allocation10 + $0x78] ss:$12 sps:$4 sm:$0xff]  }
 0x6b7   :  { %5401 = vmatpush3.bf16.msra.mxu1 %v5719_v42  ;;  %v5747_v42 = vld [vmem:[#allocation10 + $0x98] ss:$12 sps:$4 sm:$0xff]  }
 0x6b8   :  { %5406 = vmatprep.subr.bf16.mxu1 %v5723_v43 }
 0x76b   :  { %v2033_v16 = vpop.f32.mrb[36].mxu0  ;;  %v2074_v18 = vpop.f32.mrb[28].mxu1 }
 0x76c   :  { %v2080_v17 = vadd.f32 %v2033_v16, %v360_v10  ;;  %v2035_v20 = vpop.f32.mrb[37].mxu0  ;;  %v5384_v23 = vpop.f32.mrb[29].mxu1  ;;  %v2094_v61 = vadd.f32 %v6434_v28, %v2074_v18  ;;  %v5750_v10 = vld [vmem:[#allocation10 + $0xac] ss:$12 sps:$4 sm:$0xff]   ;;  %v5748_v16 = vld [vmem:[#allocation10 + $0xa8] ss:$12 sps:$4 sm:$0xff]   ;;  %v2386_v18 = vpack.c.bf16 %v6578_v32, %v6540_v33 }
 0x76d   :  { %v2087_v25 = vadd.f32 %v2035_v20, %v362_v13  ;;  %v2037_v27 = vpop.f32.mrb[38].mxu0  ;;  %v2077_v9 = vpop.f32.mrb[30].mxu1  ;;  %v5751_v13 = vld [vmem:[#allocation10 + $0xb0] ss:$12 sps:$4 sm:$0xff]   ;;  %v6743_v23 = vld [vmem:[#allocation12] ss:$12 sps:$4 sm:$0xff]  }
 0x76e   :  { %v4855_v49 = vmul.f32 -1.442695, %v2080_v17  ;;  %v2038_v29 = vpop.f32.mrb[39].mxu0  ;;  %v5385_v51 = vpop.f32.mrb[31].mxu1  ;;  %v2387_v17 = vpack.c.bf16 %v6689_v60, %v6642_v21  ;;  %v6741_v20 = vld [vmem:[#allocation12 + $0x4] ss:$12 sps:$4 sm:$0xff]  }
 0x76f   :  { %v4856_v19 = vmul.f32 -1.442695, %v2087_v25  ;;  %v5755_v33 = vld [vmem:[#allocation12 + $0x8] ss:$12 sps:$4 sm:$0xff]   ;;  %v6750_v21 = vld [vmem:[#allocation12 + $0x18] ss:$12 sps:$4 sm:$0xff]  }
 0x770   :  { %5916 = vpow2.f32 %v4855_v49  ;;  %v6747_v32 = vld [vmem:[#allocation12 + $0x1c] ss:$12 sps:$4 sm:$0xff]   ;;  %v6754_v25 = vld [vmem:[#allocation12 + $0x34] ss:$12 sps:$4 sm:$0xff]   ;;  %v5763_v9 = vld [vmem:[#allocation12 + $0x38] ss:$12 sps:$4 sm:$0xff]  }
 0x771   :  { %5918 = vpow2.f32 %v4856_v19  ;;  %v6757_v27 = vld [vmem:[#allocation12 + $0x30] ss:$12 sps:$4 sm:$0xff]   ;;  %v6761_v49 = vld [vmem:[#allocation12 + $0x4c] ss:$12 sps:$4 sm:$0xff]   ;;  %v6764_v29 = vld [vmem:[#allocation12 + $0x48] ss:$12 sps:$4 sm:$0xff]  }
 0x772   :  { %v5767_v51 = vld [vmem:[#allocation12 + $0x50] ss:$12 sps:$4 sm:$0xff]  }
 0x773   :  { %v6768_v19 = vld [vmem:[#allocation12 + $0x64] ss:$12 sps:$4 sm:$0xff]  }
 0x77a   :  { %v5917_v30 = vpop.eup %5916 }
 0x77b   :  { %v2084_v40 = vadd.f32 1.0, %v5917_v30  ;;  %v5919_v55 = vpop.eup %5918  ;;  %v6771_v30 = vld [vmem:[#allocation12 + $0x60] ss:$12 sps:$4 sm:$0xff]  }
 0x77c   :  { %v2091_v35 = vadd.f32 1.0, %v5919_v55  ;;  %v6775_v55 = vld [vmem:[#allocation12 + $0x7c] ss:$12 sps:$4 sm:$0xff]  }
 0x77d   :  { %5920 = vrcp.f32 %v2084_v40  ;;  %v5771_v40 = vld [vmem:[#allocation12 + $0x68] ss:$12 sps:$4 sm:$0xff]  }
 0x77e   :  { %5922 = vrcp.f32 %v2091_v35  ;;  %v6778_v35 = vld [vmem:[#allocation12 + $0x78] ss:$12 sps:$4 sm:$0xff]  }
 0x787   :  { %v5921_v38 = vpop.eup %5920 }
 0x788   :  { %v2095_v50 = vmul.f32 %v5921_v38, %v2094_v61  ;;  %v5923_v52 = vpop.eup %5922  ;;  %v5775_v61 = vld [vmem:[#allocation12 + $0x80] ss:$12 sps:$4 sm:$0xff]  }
 0x789   :  { %v2098_v46 = vsub.f32 1.0, %v5923_v52  ;;  %v2100_v24 = vmul.f32 %v5923_v52, %v6689_v60  ;;  %v5759_v60 = vld [vmem:[#allocation12 + $0x20] ss:$12 sps:$4 sm:$0xff]   ;;  %v6792_v52 = vld [vmem:[#allocation12 + $0xa8] ss:$12 sps:$4 sm:$0xff]  }
 0x78a   :  { %v2096_v11 = vadd.f32 %v2095_v50, %v427_v44  ;;  %v6782_v38 = vld [vmem:[#allocation12 + $0x94] ss:$12 sps:$4 sm:$0xff]   ;;  %v6785_v44 = vld [vmem:[#allocation12 + $0x90] ss:$12 sps:$4 sm:$0xff]   ;;  %v5779_v50 = vld [vmem:[#allocation12 + $0x98] ss:$12 sps:$4 sm:$0xff]  }
 0x78c   :  { %5924 = vtanh.f32 %v2096_v11  ;;  %v6789_v11 = vld [vmem:[#allocation12 + $0xac] ss:$12 sps:$4 sm:$0xff]  }
 0x796   :  { %v5925_v54 = vpop.eup %5924 }
 0x797   :  { %v2099_v3 = vmul.f32 %v5925_v54, %v2098_v46  ;;  %v5783_v46 = vld [vmem:[#allocation12 + $0xb0] ss:$12 sps:$4 sm:$0xff]   ;;  %v364_v54 = vadd.f32 %v6477_v2, %v6400_v4 }
 0x799   :  { %v6726_v62 = vadd.f32 %v2100_v24, %v2099_v3  ;;  %v366_v3 = vadd.f32 %v6481_v7, %v6404_v6  ;;  %v2375_v6 = vld [vmem:[%s7193_s7] sm:$0x7] }
 0x79a   :  { %v6016_v7 = vld [vmem:[%s7190_s4] ss:$0 sm:$0xff] }
 0x79b   :  { %v2108_v28 = vpack.c.bf16 %v6726_v62, %v6726_v62 }
 0x79d   :  { %2302 = vmatmul.mubr.bf16.vlgmr.msra.gmra.mrb[40].mxu0 %v2108_v28  ;;  %5403 = vmatmul.mubr.bf16.vlgmr.msra.gmra.mrb[32].mxu1 %v2108_v28 }
 0x79e   :  { %2566 = vmatpush1.bf16.msra.mxu0 %v5720_v56  ;;  %5407 = vmatpush3.bf16.msra.mxu1 %v5723_v43  ;;  %v5744_v43 = vld [vmem:[#allocation10 + $0x90] ss:$12 sps:$4 sm:$0xff]  }
 0x79f   :  { %5422 = vmatprep.mubr.bf16.mxu1 %v2385_v58  ;;  %2567 = vmatprep.subr.bf16.mxu0 %v5726_v14 }
 0x7a0   :  { %5408 = vmatprep.subr.bf16.mxu1 %v5727_v57  ;;  %2597 = vmatprep.mubr.bf16.mxu0 %v6191_v0 }
 0x7a2   :  { %2568 = vmatpush1.bf16.msra.mxu0 %v5724_v37  ;;  %5409 = vmatpush3.bf16.msra.mxu1 %v5727_v57 }
 0x7a3   :  { %2569 = vmatprep.subr.bf16.mxu0 %v5730_v59  ;;  %5410 = vmatprep.subr.bf16.mxu1 %v5731_v22 }
 0x7a6   :  { %2570 = vmatpush1.bf16.msra.mxu0 %v5728_v31  ;;  %5411 = vmatpush3.bf16.msra.mxu1 %v5731_v22 }
 0x7a7   :  { %2571 = vmatprep.subr.bf16.mxu0 %v5734_v8  ;;  %5412 = vmatprep.subr.bf16.mxu1 %v5735_v36 }
 0x7aa   :  { %2572 = vmatpush1.bf16.msra.mxu0 %v5732_v45  ;;  %5413 = vmatpush3.bf16.msra.mxu1 %v5735_v36 }
 0x7ab   :  { %2573 = vmatprep.subr.bf16.mxu0 %v5738_v12  ;;  %5414 = vmatprep.subr.bf16.mxu1 %v5739_v39 }
 0x7ae   :  { %2574 = vmatpush1.bf16.msra.mxu0 %v5736_v41  ;;  %5415 = vmatpush3.bf16.msra.mxu1 %v5739_v39 }
 0x7af   :  { %2575 = vmatprep.subr.bf16.mxu0 %v5742_v47  ;;  %5416 = vmatprep.subr.bf16.mxu1 %v5743_v48  ;;  %v430_v47 = vadd.f32 %v6479_v5, %v6429_v26 }
 0x7b2   :  { %2576 = vmatpush1.bf16.msra.mxu0 %v5740_v53  ;;  %5417 = vmatpush3.bf16.msra.mxu1 %v5743_v48  ;;  %v6812_v53 = vrot.slane %v2375_v6, %v154_v1 }
 0x7b3   :  { %2577 = vmatprep.subr.bf16.mxu0 %v5746_v15  ;;  %5418 = vmatprep.subr.bf16.mxu1 %v5747_v42 }
 0x7b6   :  { %2578 = vmatpush1.bf16.msra.mxu0 %v5744_v43  ;;  %5419 = vmatpush3.bf16.msra.mxu1 %v5747_v42 }
 0x7b7   :  { %2579 = vmatprep.subr.bf16.mxu0 %v5750_v10  ;;  %5420 = vmatprep.subr.bf16.mxu1 %v5751_v13  ;;  %v7199_v10 = vsub.s32 1, %v6391_v63 }
 0x7ba   :  { %2580 = vmatpush1.bf16.msra.mxu0 %v5748_v16  ;;  %5421 = vmatpush3.bf16.msra.mxu1 %v5751_v13  ;;  %v6818_v13 = vrot.slane %v2375_v6, %v7199_v10  ;;  %v5785_v10 = vld [vmem:[#allocation12 + $0x20] ss:$12 sps:$4 sm:$0xff]  }
 0x7bb   :  { %5430 = vmatprep.subr.bf16.mxu1 %v6192_v34  ;;  %2918 = vmatprep.subr.bf16.mxu0 %v6741_v20 }
 0x7bd   :  { %2598 = vmatmul.mubr.bf16.vlgmr.msra.gmra.mrb[44].mxu0 %v2385_v58  ;;  %5423 = vmatmul.mubr.bf16.vlgmr.msra.gmra.mrb[36].mxu1 %v2386_v18 }
 0x7be   :  { %5426 = vmatprep.mubr.bf16.mxu1 %v2387_v17  ;;  %2607 = vmatprep.mubr.bf16.mxu0 %v6191_v0 }
 0x7bf   :  { %2919 = vmatpush1.bf16.msra.mxu0 %v6743_v23  ;;  %5431 = vmatpush3.bf16.msra.mxu1 %v5755_v33 }
 0x7c0   :  { %5432 = vmatprep.subr.bf16.mxu1 %v6192_v34  ;;  %2920 = vmatprep.subr.bf16.mxu0 %v6747_v32 }
 0x7c3   :  { %2921 = vmatpush1.bf16.msra.mxu0 %v6750_v21  ;;  %5433 = vmatpush3.bf16.msra.mxu1 %v5759_v60 }
 0x7c4   :  { %5434 = vmatprep.subr.bf16.mxu1 %v6192_v34  ;;  %2922 = vmatprep.subr.bf16.mxu0 %v6754_v25 }
 0x7c5   :  { %2608 = vmatmul.mubr.bf16.gmra.mrb[48].mxu0 %v2386_v18 }
 0x7c6   :  { %2617 = vmatprep.mubr.bf16.mxu0 %v6191_v0 }
 0x7c7   :  { %2923 = vmatpush1.bf16.msra.mxu0 %v6757_v27  ;;  %5435 = vmatpush3.bf16.msra.mxu1 %v5763_v9 }
 0x7c8   :  { %5436 = vmatprep.subr.bf16.mxu1 %v6192_v34  ;;  %2924 = vmatprep.subr.bf16.mxu0 %v6761_v49 }
 0x7cb   :  { %2925 = vmatpush1.bf16.msra.mxu0 %v6764_v29  ;;  %5437 = vmatpush3.bf16.msra.mxu1 %v5767_v51 }
 0x7cc   :  { %5438 = vmatprep.subr.bf16.mxu1 %v6192_v34  ;;  %2926 = vmatprep.subr.bf16.mxu0 %v6768_v19 }
 0x7cd   :  { %2618 = vmatmul.mubr.bf16.gmra.mrb[52].mxu0 %v2387_v17 }
 0x7ce   :  { %2627 = vmatprep.mubr.bf16.mxu0 %v6191_v0 }
 0x7cf   :  { %2927 = vmatpush1.bf16.msra.mxu0 %v6771_v30  ;;  %5439 = vmatpush3.bf16.msra.mxu1 %v5771_v40 }
 0x7d0   :  { %5440 = vmatprep.subr.bf16.mxu1 %v6192_v34  ;;  %2928 = vmatprep.subr.bf16.mxu0 %v6775_v55 }
 0x7d3   :  { %2929 = vmatpush1.bf16.msra.mxu0 %v6778_v35  ;;  %5441 = vmatpush3.bf16.msra.mxu1 %v5775_v61 }
 0x7d4   :  { %5442 = vmatprep.subr.bf16.mxu1 %v6192_v34  ;;  %2930 = vmatprep.subr.bf16.mxu0 %v6782_v38 }
 0x7d7   :  { %2931 = vmatpush1.bf16.msra.mxu0 %v6785_v44  ;;  %5443 = vmatpush3.bf16.msra.mxu1 %v5779_v50 }
 0x7d8   :  { %5444 = vmatprep.subr.bf16.mxu1 %v6192_v34  ;;  %2932 = vmatprep.subr.bf16.mxu0 %v6789_v11 }
 0x7db   :  { %2933 = vmatpush1.bf16.msra.mxu0 %v6792_v52  ;;  %5445 = vmatpush3.bf16.msra.mxu1 %v5783_v46 }
 0x7dc   :  { %3187 = vmatprep.subr.bf16.mxu0 %v6741_v20  ;;  %5450 = vmatprep.subr.bf16.mxu1 %v6192_v34 }
 0x870   :  { %v2303_v24 = vpop.f32.mrb[40].mxu0  ;;  %v2344_v56 = vpop.f32.mrb[32].mxu1 }
 0x871   :  { %v2350_v28 = vadd.f32 %v2303_v24, %v364_v54  ;;  %v2305_v14 = vpop.f32.mrb[41].mxu0  ;;  %v5404_v57 = vpop.f32.mrb[33].mxu1  ;;  %v2364_v39 = vadd.f32 %v6016_v7, %v2344_v56 }
 0x872   :  { %v2357_v58 = vadd.f32 %v2305_v14, %v366_v3  ;;  %v2307_v37 = vpop.f32.mrb[42].mxu0  ;;  %v2347_v59 = vpop.f32.mrb[34].mxu1 }
 0x873   :  { %v4881_v22 = vmul.f32 -1.442695, %v2350_v28  ;;  %v2308_v31 = vpop.f32.mrb[43].mxu0  ;;  %v5405_v8 = vpop.f32.mrb[35].mxu1 }
 0x874   :  { %v4882_v36 = vmul.f32 -1.442695, %v2357_v58 }
 0x875   :  { %5926 = vpow2.f32 %v4881_v22 }
 0x876   :  { %5928 = vpow2.f32 %v4882_v36 }
 0x87f   :  { %v5927_v45 = vpop.eup %5926 }
 0x880   :  { %v2354_v12 = vadd.f32 1.0, %v5927_v45  ;;  %v5929_v4 = vpop.eup %5928  ;;  %v7200_v45 = vsub.s32 2, %v6391_v63 }
 0x881   :  { %v2361_v2 = vadd.f32 1.0, %v5929_v4  ;;  %v6858_v4 = vld [vmem:[%s7194_s8] ss:$0 sm:$0xff] }
 0x882   :  { %5930 = vrcp.f32 %v2354_v12  ;;  %v6853_v12 = vrot.slane %v2375_v6, %v7200_v45 }
 0x883   :  { %5932 = vrcp.f32 %v2361_v2 }
 0x88c   :  { %v5931_v41 = vpop.eup %5930 }
 0x88d   :  { %v2365_v48 = vmul.f32 %v5931_v41, %v2364_v39  ;;  %v5933_v51 = vpop.eup %5932 }
 0x88e   :  { %v2368_v54 = vsub.f32 1.0, %v5933_v51  ;;  %v2370_v28 = vmul.f32 %v5933_v51, %v6726_v62  ;;  %v5791_v51 = vld [vmem:[#allocation12 + $0xb0] ss:$12 sps:$4 sm:$0xff]  }
 0x88f   :  { %v2366_v15 = vadd.f32 %v2365_v48, %v430_v47 }
 0x890   :  { %v2599_v42 = vpop.f32.mrb[44].mxu0  ;;  %v6814_v43 = vpop.f32.mrb[36].mxu1 }
 0x891   :  { %5934 = vtanh.f32 %v2366_v15  ;;  %v2600_v16 = vadd.f32 %v2599_v42, %v6812_v53  ;;  %v2601_v18 = vpop.f32.mrb[45].mxu0  ;;  %v2672_v17 = vpop.f32.mrb[37].mxu1  ;;  %v5784_v42 = vld [vmem:[#allocation12 + $0x8] ss:$12 sps:$4 sm:$0xff]  }
 0x892   :  { %v6821_v26 = vpop.f32.mrb[46].mxu0  ;;  %v6823_v5 = vpop.f32.mrb[38].mxu1  ;;  %v2602_v9 = vadd.f32 %v2601_v18, %v6818_v13  ;;  %v2673_v7 = vadd.f32 %v2672_v17, %v6853_v12  ;;  %v5787_v18 = vld [vmem:[#allocation12 + $0x50] ss:$12 sps:$4 sm:$0xff]   ;;  %v5788_v17 = vld [vmem:[#allocation12 + $0x68] ss:$12 sps:$4 sm:$0xff]  }
 0x893   :  { %v4908_v33 = vmul.f32 -1.442695, %v2600_v16  ;;  %v6825_v1 = vpop.f32.mrb[47].mxu0  ;;  %v6827_v60 = vpop.f32.mrb[39].mxu1  ;;  %v5786_v16 = vld [vmem:[#allocation12 + $0x38] ss:$12 sps:$4 sm:$0xff]  }
 0x894   :  { %v4909_v40 = vmul.f32 -1.442695, %v2602_v9  ;;  %v5790_v9 = vld [vmem:[#allocation12 + $0x98] ss:$12 sps:$4 sm:$0xff]  }
 0x895   :  { %5936 = vpow2.f32 %v4908_v33  ;;  %v5789_v33 = vld [vmem:[#allocation12 + $0x80] ss:$12 sps:$4 sm:$0xff]  }
 0x896   :  { %5938 = vpow2.f32 %v4909_v40 }
 0x898   :  { %v6830_v61 = vpop.f32.mrb[48].mxu0 }
 0x899   :  { %v6832_v50 = vpop.f32.mrb[49].mxu0 }
 0x89a   :  { %v6834_v46 = vpop.f32.mrb[50].mxu0 }
 0x89b   :  { %v5935_v3 = vpop.eup %5934  ;;  %v6836_v24 = vpop.f32.mrb[51].mxu0 }
 0x89c   :  { %v2369_v56 = vmul.f32 %v5935_v3, %v2368_v54 }
 0x89e   :  { %v2371_v14 = vadd.f32 %v2370_v28, %v2369_v56 }
 0x89f   :  { %v5937_v57 = vpop.eup %5936 }
 0x8a0   :  { %v2739_v58 = vadd.f32 1.0, %v5937_v57  ;;  %v6839_v37 = vpop.f32.mrb[52].mxu0  ;;  %v2388_v59 = vpack.c.bf16 %v2371_v14, %v6726_v62  ;;  %2374 = vst [vmem:[#allocation14] sm:$0xff] %v2371_v14  ;;  %v5939_v36 = vpop.eup %5938 }
 0x8a1   :  { %v6842_v22 = vpop.f32.mrb[53].mxu0  ;;  %v2745_v62 = vadd.f32 1.0, %v5939_v36  ;;  %v2606_v36 = vadd.f32 %v6825_v1, %v6818_v13 }
 0x8a2   :  { %5940 = vrcp.f32 %v2739_v58  ;;  %v6844_v31 = vpop.f32.mrb[54].mxu0  ;;  %2628 = vmatmul.mubr.bf16.gmra.mrb[56].mxu0 %v2388_v59  ;;  %5427 = vmatmul.mubr.bf16.gmra.mrb[40].mxu1 %v2388_v59  ;;  %v2604_v59 = vadd.f32 %v6821_v26, %v6812_v53 }
 0x8a3   :  { %v6846_v8 = vpop.f32.mrb[55].mxu0  ;;  %2950 = vmatprep.mubr.bf16.mxu0 %v6191_v0  ;;  %5446 = vmatprep.mubr.msk.bf16.mxu1 %vm6193_vm0, %v6192_v34  ;;  %5942 = vrcp.f32 %v2745_v62 }
 0x8ac   :  { %v5941_v2 = vpop.eup %5940 }
 0x8ad   :  { %v2748_v39 = vmul.f32 %v5941_v2, %v6858_v4  ;;  %v5943_v47 = vpop.eup %5942 }
 0x8ae   :  { %v2751_v48 = vsub.f32 1.0, %v5943_v47 }
 0x8af   :  { %v2749_v41 = vadd.f32 %v2748_v39, %v2673_v7 }
 0x8b1   :  { %5944 = vtanh.f32 %v2749_v41 }
 0x8bb   :  { %v5945_v15 = vpop.eup %5944 }
 0x8bc   :  { %v6862_v63 = vmul.f32 %v5945_v15, %v2751_v48 }
 0x8be   :  { %2753 = vst [vmem:[#allocation13] sm:$0xff] %v6862_v63  ;;  %v2757_v6 = vpack.c.bf16 %v6862_v63, %v6862_v63 }
 0x8c0   :  { %2951 = vmatmul.mubr.bf16.vlgmr.msra.gmra.mrb[60].mxu0 %v2757_v6  ;;  %5447 = vmatmul.mubr.bf16.vlgmr.msra.gmra.mrb[44].mxu1 %v2757_v6 }
 0x8c1   :  { %3188 = vmatpush1.bf16.msra.mxu0 %v6743_v23  ;;  %3219 = vmatprep.mubr.bf16.mxu0 %v6191_v0 }
 0x8c2   :  { %3189 = vmatprep.subr.bf16.mxu0 %v6747_v32  ;;  %5466 = vmatprep.mubr.msk.bf16.mxu1 %vm6193_vm0, %v6192_v34 }
 0x8c3   :  { %5451 = vmatpush3.bf16.msra.mxu1 %v5784_v42 }
 0x8c4   :  { %5452 = vmatprep.subr.bf16.mxu1 %v6192_v34 }
 0x8c5   :  { %3190 = vmatpush1.bf16.msra.mxu0 %v6750_v21 }
 0x8c6   :  { %3191 = vmatprep.subr.bf16.mxu0 %v6754_v25 }
 0x8c7   :  { %5453 = vmatpush3.bf16.msra.mxu1 %v5785_v10 }
 0x8c8   :  { %5454 = vmatprep.subr.bf16.mxu1 %v6192_v34 }
 0x8c9   :  { %3192 = vmatpush1.bf16.msra.mxu0 %v6757_v27 }
 0x8ca   :  { %3193 = vmatprep.subr.bf16.mxu0 %v6761_v49 }
 0x8cb   :  { %5455 = vmatpush3.bf16.msra.mxu1 %v5786_v16 }
 0x8cc   :  { %5456 = vmatprep.subr.bf16.mxu1 %v6192_v34 }
 0x8cd   :  { %3194 = vmatpush1.bf16.msra.mxu0 %v6764_v29 }
 0x8ce   :  { %3195 = vmatprep.subr.bf16.mxu0 %v6768_v19 }
 0x8cf   :  { %5457 = vmatpush3.bf16.msra.mxu1 %v5787_v18 }
 0x8d0   :  { %5458 = vmatprep.subr.bf16.mxu1 %v6192_v34 }
 0x8d1   :  { %3196 = vmatpush1.bf16.msra.mxu0 %v6771_v30 }
 0x8d2   :  { %3197 = vmatprep.subr.bf16.mxu0 %v6775_v55 }
 0x8d3   :  { %5459 = vmatpush3.bf16.msra.mxu1 %v5788_v17 }
 0x8d4   :  { %5460 = vmatprep.subr.bf16.mxu1 %v6192_v34 }
 0x8d5   :  { %3198 = vmatpush1.bf16.msra.mxu0 %v6778_v35 }
 0x8d6   :  { %3199 = vmatprep.subr.bf16.mxu0 %v6782_v38 }
 0x8d7   :  { %5461 = vmatpush3.bf16.msra.mxu1 %v5789_v33 }
 0x8d8   :  { %5462 = vmatprep.subr.bf16.mxu1 %v6192_v34 }
 0x8d9   :  { %3200 = vmatpush1.bf16.msra.mxu0 %v6785_v44 }
 0x8da   :  { %3201 = vmatprep.subr.bf16.mxu0 %v6789_v11 }
 0x8db   :  { %5463 = vmatpush3.bf16.msra.mxu1 %v5790_v9  ;;  %v2676_v9 = vadd.f32 %v6827_v60, %v6853_v12  ;;  %v5792_v60 = vld [vmem:[#allocation12 + $0x8] ss:$12 sps:$4 sm:$0xff]  }
 0x8dc   :  { %5464 = vmatprep.subr.bf16.mxu1 %v6192_v34 }
 0x8dd   :  { %3202 = vmatpush1.bf16.msra.mxu0 %v6792_v52 }
 0x8de   :  { %3456 = vmatprep.subr.bf16.mxu0 %v6741_v20 }
 0x8df   :  { %5465 = vmatpush3.bf16.msra.mxu1 %v5791_v51 }
 0x8e0   :  { %5470 = vmatprep.subr.bf16.mxu1 %v6192_v34 }
 0x975   :  { %v6894_v40 = vpop.f32.mrb[56].mxu0  ;;  %v6896_v54 = vpop.f32.mrb[40].mxu1 }
 0x976   :  { %v6898_v3 = vpop.f32.mrb[57].mxu0  ;;  %v6900_v56 = vpop.f32.mrb[41].mxu1 }
 0x977   :  { %v6902_v28 = vpop.f32.mrb[58].mxu0  ;;  %v6904_v14 = vpop.f32.mrb[42].mxu1 }
 0x978   :  { %v6906_v57 = vpop.f32.mrb[59].mxu0  ;;  %v6908_v58 = vpop.f32.mrb[43].mxu1 }
 0x993   :  { %v2952_v45 = vpop.f32.mrb[60].mxu0  ;;  %v2993_v62 = vpop.f32.mrb[44].mxu1 }
 0x994   :  { %v2999_v2 = vadd.f32 %v2952_v45, %v2604_v59  ;;  %v2954_v7 = vpop.f32.mrb[61].mxu0  ;;  %v5448_v39 = vpop.f32.mrb[45].mxu1  ;;  %v3013_v1 = vadd.f32 %v6858_v4, %v2993_v62 }
 0x995   :  { %v3006_v41 = vadd.f32 %v2954_v7, %v2606_v36  ;;  %v2956_v47 = vpop.f32.mrb[62].mxu0  ;;  %v2996_v48 = vpop.f32.mrb[46].mxu1 }
 0x996   :  { %v4934_v15 = vmul.f32 -1.442695, %v2999_v2  ;;  %v2957_v6 = vpop.f32.mrb[63].mxu0  ;;  %v5449_v42 = vpop.f32.mrb[47].mxu1  ;;  %v5794_v47 = vld [vmem:[#allocation12 + $0x38] ss:$12 sps:$4 sm:$0xff]  }
 0x997   :  { %v4935_v10 = vmul.f32 -1.442695, %v3006_v41  ;;  %v5795_v48 = vld [vmem:[#allocation12 + $0x50] ss:$12 sps:$4 sm:$0xff]   ;;  %v5797_v6 = vld [vmem:[#allocation12 + $0x80] ss:$12 sps:$4 sm:$0xff]  }
 0x998   :  { %5946 = vpow2.f32 %v4934_v15  ;;  %v5796_v15 = vld [vmem:[#allocation12 + $0x68] ss:$12 sps:$4 sm:$0xff]   ;;  %v5798_v42 = vld [vmem:[#allocation12 + $0x98] ss:$12 sps:$4 sm:$0xff]  }
 0x999   :  { %5948 = vpow2.f32 %v4935_v10  ;;  %v5799_v10 = vld [vmem:[#allocation12 + $0xb0] ss:$12 sps:$4 sm:$0xff]  }
 0x9a2   :  { %v5947_v16 = vpop.eup %5946 }
 0x9a3   :  { %v3003_v18 = vadd.f32 1.0, %v5947_v16  ;;  %v5949_v26 = vpop.eup %5948  ;;  %v2610_v16 = vadd.f32 %v6830_v61, %v6812_v53 }
 0x9a4   :  { %v3010_v17 = vadd.f32 1.0, %v5949_v26 }
 0x9a5   :  { %5950 = vrcp.f32 %v3003_v18  ;;  %v2612_v18 = vadd.f32 %v6832_v50, %v6818_v13 }
 0x9a6   :  { %5952 = vrcp.f32 %v3010_v17 }
 0x9af   :  { %v5951_v33 = vpop.eup %5950 }
 0x9b0   :  { %v3014_v51 = vmul.f32 %v5951_v33, %v3013_v1  ;;  %v5953_v36 = vpop.eup %5952 }
 0x9b1   :  { %v3017_v45 = vsub.f32 1.0, %v5953_v36  ;;  %v3019_v39 = vmul.f32 %v5953_v36, %v6862_v63  ;;  %v5793_v63 = vld [vmem:[#allocation12 + $0x20] ss:$12 sps:$4 sm:$0xff]  }
 0x9b2   :  { %v3015_v59 = vadd.f32 %v3014_v51, %v2676_v9 }
 0x9b4   :  { %5954 = vtanh.f32 %v3015_v59 }
 0x9be   :  { %v5955_v2 = vpop.eup %5954 }
 0x9bf   :  { %v3018_v7 = vmul.f32 %v5955_v2, %v3017_v45 }
 0x9c1   :  { %v6918_v41 = vadd.f32 %v3019_v39, %v3018_v7 }
 0x9c3   :  { %3022 = vst [vmem:[#allocation13 + $0x8] sm:$0xff] %v6918_v41  ;;  %v3026_v62 = vpack.c.bf16 %v6918_v41, %v6918_v41 }
 0x9c5   :  { %3220 = vmatmul.mubr.bf16.vlgmr.msra.gmra.mrb[64].mxu0 %v3026_v62  ;;  %5467 = vmatmul.mubr.bf16.vlgmr.msra.gmra.mrb[48].mxu1 %v3026_v62 }
 0x9c6   :  { %3457 = vmatpush1.bf16.msra.mxu0 %v6743_v23  ;;  %3488 = vmatprep.mubr.bf16.mxu0 %v6191_v0 }
 0x9c7   :  { %3458 = vmatprep.subr.bf16.mxu0 %v6747_v32  ;;  %5486 = vmatprep.mubr.msk.bf16.mxu1 %vm6193_vm0, %v6192_v34 }
 0x9c8   :  { %5471 = vmatpush3.bf16.msra.mxu1 %v5792_v60 }
 0x9c9   :  { %5472 = vmatprep.subr.bf16.mxu1 %v6192_v34 }
 0x9ca   :  { %3459 = vmatpush1.bf16.msra.mxu0 %v6750_v21 }
 0x9cb   :  { %3460 = vmatprep.subr.bf16.mxu0 %v6754_v25 }
 0x9cc   :  { %5473 = vmatpush3.bf16.msra.mxu1 %v5793_v63 }
 0x9cd   :  { %5474 = vmatprep.subr.bf16.mxu1 %v6192_v34 }
 0x9ce   :  { %3461 = vmatpush1.bf16.msra.mxu0 %v6757_v27 }
 0x9cf   :  { %3462 = vmatprep.subr.bf16.mxu0 %v6761_v49 }
 0x9d0   :  { %5475 = vmatpush3.bf16.msra.mxu1 %v5794_v47 }
 0x9d1   :  { %5476 = vmatprep.subr.bf16.mxu1 %v6192_v34 }
 0x9d2   :  { %3463 = vmatpush1.bf16.msra.mxu0 %v6764_v29 }
 0x9d3   :  { %3464 = vmatprep.subr.bf16.mxu0 %v6768_v19 }
 0x9d4   :  { %5477 = vmatpush3.bf16.msra.mxu1 %v5795_v48  ;;  %v2681_v48 = vadd.f32 %v6814_v43, %v6853_v12  ;;  %v5800_v43 = vld [vmem:[#allocation12 + $0x8] ss:$12 sps:$4 sm:$0xff]  }
 0x9d5   :  { %5478 = vmatprep.subr.bf16.mxu1 %v6192_v34 }
 0x9d6   :  { %3465 = vmatpush1.bf16.msra.mxu0 %v6771_v30 }
 0x9d7   :  { %3466 = vmatprep.subr.bf16.mxu0 %v6775_v55 }
 0x9d8   :  { %5479 = vmatpush3.bf16.msra.mxu1 %v5796_v15 }
 0x9d9   :  { %5480 = vmatprep.subr.bf16.mxu1 %v6192_v34 }
 0x9da   :  { %3467 = vmatpush1.bf16.msra.mxu0 %v6778_v35 }
 0x9db   :  { %3468 = vmatprep.subr.bf16.mxu0 %v6782_v38 }
 0x9dc   :  { %5481 = vmatpush3.bf16.msra.mxu1 %v5797_v6 }
 0x9dd   :  { %5482 = vmatprep.subr.bf16.mxu1 %v6192_v34 }
 0x9de   :  { %3469 = vmatpush1.bf16.msra.mxu0 %v6785_v44 }
 0x9df   :  { %3470 = vmatprep.subr.bf16.mxu0 %v6789_v11 }
 0x9e0   :  { %5483 = vmatpush3.bf16.msra.mxu1 %v5798_v42 }
 0x9e1   :  { %5484 = vmatprep.subr.bf16.mxu1 %v6192_v34 }
 0x9e2   :  { %3471 = vmatpush1.bf16.msra.mxu0 %v6792_v52 }
 0x9e3   :  { %3725 = vmatprep.subr.bf16.mxu0 %v6741_v20 }
 0x9e4   :  { %5485 = vmatpush3.bf16.msra.mxu1 %v5799_v10 }
 0x9e5   :  { %5490 = vmatprep.subr.bf16.mxu1 %v6192_v34 }
 0xa98   :  { %v3221_v26 = vpop.f32.mrb[64].mxu0  ;;  %v3262_v17 = vpop.f32.mrb[48].mxu1 }
 0xa99   :  { %v3268_v1 = vadd.f32 %v3221_v26, %v2610_v16  ;;  %v3223_v33 = vpop.f32.mrb[65].mxu0  ;;  %v5468_v9 = vpop.f32.mrb[49].mxu1  ;;  %v3282_v50 = vadd.f32 %v6858_v4, %v3262_v17 }
 0xa9a   :  { %v3275_v51 = vadd.f32 %v3223_v33, %v2612_v18  ;;  %v3225_v59 = vpop.f32.mrb[66].mxu0  ;;  %v3265_v36 = vpop.f32.mrb[50].mxu1  ;;  %v5802_v33 = vld [vmem:[#allocation12 + $0x38] ss:$12 sps:$4 sm:$0xff]   ;;  %v5803_v9 = vld [vmem:[#allocation12 + $0x50] ss:$12 sps:$4 sm:$0xff]  }
 0xa9b   :  { %v4960_v45 = vmul.f32 -1.442695, %v3268_v1  ;;  %v3226_v2 = vpop.f32.mrb[67].mxu0  ;;  %v5469_v7 = vpop.f32.mrb[51].mxu1  ;;  %v5805_v59 = vld [vmem:[#allocation12 + $0x80] ss:$12 sps:$4 sm:$0xff]  }
 0xa9c   :  { %v4961_v39 = vmul.f32 -1.442695, %v3275_v51  ;;  %v5804_v51 = vld [vmem:[#allocation12 + $0x68] ss:$12 sps:$4 sm:$0xff]   ;;  %v5807_v36 = vld [vmem:[#allocation12 + $0xb0] ss:$12 sps:$4 sm:$0xff]   ;;  %v2616_v2 = vadd.f32 %v6836_v24, %v6818_v13 }
 0xa9d   :  { %5956 = vpow2.f32 %v4960_v45  ;;  %v2614_v45 = vadd.f32 %v6834_v46, %v6812_v53 }
 0xa9e   :  { %5958 = vpow2.f32 %v4961_v39 }
 0xaa7   :  { %v5957_v62 = vpop.eup %5956 }
 0xaa8   :  { %v3272_v60 = vadd.f32 1.0, %v5957_v62  ;;  %v5959_v61 = vpop.eup %5958 }
 0xaa9   :  { %v3279_v63 = vadd.f32 1.0, %v5959_v61 }
 0xaaa   :  { %5960 = vrcp.f32 %v3272_v60 }
 0xaab   :  { %5962 = vrcp.f32 %v3279_v63 }
 0xab4   :  { %v5961_v47 = vpop.eup %5960 }
 0xab5   :  { %v3283_v15 = vmul.f32 %v5961_v47, %v3282_v50  ;;  %v5963_v42 = vpop.eup %5962 }
 0xab6   :  { %v3286_v10 = vsub.f32 1.0, %v5963_v42  ;;  %v3288_v26 = vmul.f32 %v5963_v42, %v6918_v41  ;;  %v5801_v41 = vld [vmem:[#allocation12 + $0x20] ss:$12 sps:$4 sm:$0xff]  }
 0xab7   :  { %v3284_v6 = vadd.f32 %v3283_v15, %v2681_v48 }
 0xab9   :  { %5964 = vtanh.f32 %v3284_v6 }
 0xac3   :  { %v5965_v16 = vpop.eup %5964 }
 0xac4   :  { %v3287_v18 = vmul.f32 %v5965_v16, %v3286_v10 }
 0xac6   :  { %v6958_v1 = vadd.f32 %v3288_v26, %v3287_v18 }
 0xac8   :  { %3291 = vst [vmem:[#allocation13 + $0x10] sm:$0xff] %v6958_v1  ;;  %v3295_v17 = vpack.c.bf16 %v6958_v1, %v6958_v1 }
 0xaca   :  { %3489 = vmatmul.mubr.bf16.vlgmr.msra.gmra.mrb[68].mxu0 %v3295_v17  ;;  %5487 = vmatmul.mubr.bf16.vlgmr.msra.gmra.mrb[52].mxu1 %v3295_v17  ;;  %v2684_v17 = vadd.f32 %v6823_v5, %v6853_v12 }
 0xacb   :  { %3726 = vmatpush1.bf16.msra.mxu0 %v6743_v23  ;;  %3757 = vmatprep.mubr.bf16.mxu0 %v6191_v0 }
 0xacc   :  { %3727 = vmatprep.subr.bf16.mxu0 %v6747_v32  ;;  %5506 = vmatprep.mubr.msk.bf16.mxu1 %vm6193_vm0, %v6192_v34 }
 0xacd   :  { %5491 = vmatpush3.bf16.msra.mxu1 %v5800_v43 }
 0xace   :  { %5492 = vmatprep.subr.bf16.mxu1 %v6192_v34 }
 0xacf   :  { %3728 = vmatpush1.bf16.msra.mxu0 %v6750_v21 }
 0xad0   :  { %3729 = vmatprep.subr.bf16.mxu0 %v6754_v25 }
 0xad1   :  { %5493 = vmatpush3.bf16.msra.mxu1 %v5801_v41 }
 0xad2   :  { %5494 = vmatprep.subr.bf16.mxu1 %v6192_v34 }
 0xad3   :  { %3730 = vmatpush1.bf16.msra.mxu0 %v6757_v27 }
 0xad4   :  { %3731 = vmatprep.subr.bf16.mxu0 %v6761_v49 }
 0xad5   :  { %5495 = vmatpush3.bf16.msra.mxu1 %v5802_v33 }
 0xad6   :  { %5496 = vmatprep.subr.bf16.mxu1 %v6192_v34 }
 0xad7   :  { %3732 = vmatpush1.bf16.msra.mxu0 %v6764_v29 }
 0xad8   :  { %3733 = vmatprep.subr.bf16.mxu0 %v6768_v19 }
 0xad9   :  { %5497 = vmatpush3.bf16.msra.mxu1 %v5803_v9 }
 0xada   :  { %5498 = vmatprep.subr.bf16.mxu1 %v6192_v34 }
 0xadb   :  { %3734 = vmatpush1.bf16.msra.mxu0 %v6771_v30 }
 0xadc   :  { %3735 = vmatprep.subr.bf16.mxu0 %v6775_v55 }
 0xadd   :  { %5499 = vmatpush3.bf16.msra.mxu1 %v5804_v51 }
 0xade   :  { %5500 = vmatprep.subr.bf16.mxu1 %v6192_v34 }
 0xadf   :  { %3736 = vmatpush1.bf16.msra.mxu0 %v6778_v35 }
 0xae0   :  { %3737 = vmatprep.subr.bf16.mxu0 %v6782_v38 }
 0xae1   :  { %5501 = vmatpush3.bf16.msra.mxu1 %v5805_v59 }
 0xae2   :  { %5502 = vmatprep.subr.bf16.mxu1 %v6192_v34 }
 0xae3   :  { %3738 = vmatpush1.bf16.msra.mxu0 %v6785_v44 }
 0xae4   :  { %3739 = vmatprep.subr.bf16.mxu0 %v6789_v11 }
 0xae7   :  { %3740 = vmatpush1.bf16.msra.mxu0 %v6792_v52 }
 0xae8   :  { %3994 = vmatprep.subr.bf16.mxu0 %v6741_v20  ;;  %v5806_v20 = vld [vmem:[#allocation12 + $0x98] ss:$12 sps:$4 sm:$0xff]  }
 0xae9   :  { %5503 = vmatpush3.bf16.msra.mxu1 %v5806_v20 }
 0xaea   :  { %5504 = vmatprep.subr.bf16.mxu1 %v6192_v34 }
 0xaed   :  { %5505 = vmatpush3.bf16.msra.mxu1 %v5807_v36 }
 0xaee   :  { %5510 = vmatprep.subr.bf16.mxu1 %v6192_v34 }
 0xb9d   :  { %v3490_v7 = vpop.f32.mrb[68].mxu0  ;;  %v3531_v39 = vpop.f32.mrb[52].mxu1 }
 0xb9e   :  { %v3537_v62 = vadd.f32 %v3490_v7, %v2614_v45  ;;  %v3492_v60 = vpop.f32.mrb[69].mxu0  ;;  %v5488_v61 = vpop.f32.mrb[53].mxu1  ;;  %v3551_v24 = vadd.f32 %v6858_v4, %v3531_v39 }
 0xb9f   :  { %v3544_v63 = vadd.f32 %v3492_v60, %v2616_v2  ;;  %v3494_v50 = vpop.f32.mrb[70].mxu0  ;;  %v3534_v47 = vpop.f32.mrb[54].mxu1 }
 0xba0   :  { %v4986_v48 = vmul.f32 -1.442695, %v3537_v62  ;;  %v3495_v15 = vpop.f32.mrb[71].mxu0  ;;  %v5489_v6 = vpop.f32.mrb[55].mxu1 }
 0xba1   :  { %v4987_v42 = vmul.f32 -1.442695, %v3544_v63 }
 0xba2   :  { %5966 = vpow2.f32 %v4986_v48  ;;  %v2689_v48 = vadd.f32 %v6900_v56, %v6853_v12  ;;  %v5818_v56 = vld [vmem:[#allocation12 + $0x4] ss:$12 sps:$4 sm:$0xff]  }
 0xba3   :  { %5968 = vpow2.f32 %v4987_v42 }
 0xbac   :  { %v5967_v10 = vpop.eup %5966 }
 0xbad   :  { %v3541_v16 = vadd.f32 1.0, %v5967_v10  ;;  %v5969_v46 = vpop.eup %5968 }
 0xbae   :  { %v3548_v18 = vadd.f32 1.0, %v5969_v46 }
 0xbaf   :  { %5970 = vrcp.f32 %v3541_v16 }
 0xbb0   :  { %5972 = vrcp.f32 %v3548_v18 }
 0xbb9   :  { %v5971_v26 = vpop.eup %5970 }
 0xbba   :  { %v3552_v43 = vmul.f32 %v5971_v26, %v3551_v24  ;;  %v5973_v33 = vpop.eup %5972 }
 0xbbb   :  { %v3555_v9 = vsub.f32 1.0, %v5973_v33  ;;  %v3557_v20 = vmul.f32 %v5973_v33, %v6958_v1  ;;  %v7051_v33 = vld [vmem:[#allocation12 + $0x18] ss:$12 sps:$4 sm:$0xff]  }
 0xbbc   :  { %v3553_v41 = vadd.f32 %v3552_v43, %v2684_v17  ;;  %v7045_v17 = vld [vmem:[#allocation12] ss:$12 sps:$4 sm:$0xff]   ;;  %v5819_v43 = vld [vmem:[#allocation12 + $0x8] ss:$12 sps:$4 sm:$0xff]  }
 0xbbe   :  { %5974 = vtanh.f32 %v3553_v41  ;;  %v7048_v41 = vld [vmem:[#allocation12 + $0x1c] ss:$12 sps:$4 sm:$0xff]  }
 0xbc8   :  { %v5975_v51 = vpop.eup %5974 }
 0xbc9   :  { %v3556_v59 = vmul.f32 %v5975_v51, %v3555_v9  ;;  %v5823_v9 = vld [vmem:[#allocation12 + $0x20] ss:$12 sps:$4 sm:$0xff]  }
 0xbca   :  { %v7055_v51 = vld [vmem:[#allocation12 + $0x34] ss:$12 sps:$4 sm:$0xff]  }
 0xbcb   :  { %v6998_v36 = vadd.f32 %v3557_v20, %v3556_v59  ;;  %v7058_v59 = vld [vmem:[#allocation12 + $0x30] ss:$12 sps:$4 sm:$0xff]   ;;  %v5827_v20 = vld [vmem:[#allocation12 + $0x38] ss:$12 sps:$4 sm:$0xff]  }
 0xbcd   :  { %3560 = vst [vmem:[#allocation13 + $0x18] sm:$0xff] %v6998_v36  ;;  %v3564_v45 = vpack.c.bf16 %v6998_v36, %v6998_v36 }
 0xbcf   :  { %3758 = vmatmul.mubr.bf16.vlgmr.msra.gmra.mrb[72].mxu0 %v3564_v45  ;;  %5507 = vmatmul.mubr.bf16.vlgmr.msra.gmra.mrb[56].mxu1 %v3564_v45  ;;  %v7065_v45 = vld [vmem:[#allocation12 + $0x48] ss:$12 sps:$4 sm:$0xff]  }
 0xbd0   :  { %3995 = vmatpush1.bf16.msra.mxu0 %v6743_v23  ;;  %4026 = vmatprep.mubr.bf16.mxu0 %v6191_v0  ;;  %v5808_v23 = vld [vmem:[#allocation12 + $0x8] ss:$12 sps:$4 sm:$0xff]  }
 0xbd1   :  { %3996 = vmatprep.subr.bf16.mxu0 %v6747_v32  ;;  %5526 = vmatprep.mubr.msk.bf16.mxu1 %vm6193_vm0, %v6192_v34  ;;  %v5809_v32 = vld [vmem:[#allocation12 + $0x20] ss:$12 sps:$4 sm:$0xff]  }
 0xbd2   :  { %5511 = vmatpush3.bf16.msra.mxu1 %v5808_v23  ;;  %v5831_v23 = vld [vmem:[#allocation12 + $0x50] ss:$12 sps:$4 sm:$0xff]  }
 0xbd3   :  { %5512 = vmatprep.subr.bf16.mxu1 %v6192_v34 }
 0xbd4   :  { %3997 = vmatpush1.bf16.msra.mxu0 %v6750_v21  ;;  %v5810_v21 = vld [vmem:[#allocation12 + $0x38] ss:$12 sps:$4 sm:$0xff]  }
 0xbd5   :  { %3998 = vmatprep.subr.bf16.mxu0 %v6754_v25  ;;  %v5811_v25 = vld [vmem:[#allocation12 + $0x50] ss:$12 sps:$4 sm:$0xff]  }
 0xbd6   :  { %5513 = vmatpush3.bf16.msra.mxu1 %v5809_v32  ;;  %v7069_v32 = vld [vmem:[#allocation12 + $0x64] ss:$12 sps:$4 sm:$0xff]  }
 0xbd7   :  { %5514 = vmatprep.subr.bf16.mxu1 %v6192_v34 }
 0xbd8   :  { %3999 = vmatpush1.bf16.msra.mxu0 %v6757_v27  ;;  %v5812_v27 = vld [vmem:[#allocation12 + $0x68] ss:$12 sps:$4 sm:$0xff]  }
 0xbd9   :  { %4000 = vmatprep.subr.bf16.mxu0 %v6761_v49  ;;  %v5813_v49 = vld [vmem:[#allocation12 + $0x80] ss:$12 sps:$4 sm:$0xff]  }
 0xbda   :  { %5515 = vmatpush3.bf16.msra.mxu1 %v5810_v21  ;;  %v7072_v21 = vld [vmem:[#allocation12 + $0x60] ss:$12 sps:$4 sm:$0xff]  }
 0xbdb   :  { %5516 = vmatprep.subr.bf16.mxu1 %v6192_v34 }
 0xbdc   :  { %4001 = vmatpush1.bf16.msra.mxu0 %v6764_v29  ;;  %v5814_v29 = vld [vmem:[#allocation12 + $0x98] ss:$12 sps:$4 sm:$0xff]  }
 0xbdd   :  { %4002 = vmatprep.subr.bf16.mxu0 %v6768_v19  ;;  %v5815_v19 = vld [vmem:[#allocation12 + $0xb0] ss:$12 sps:$4 sm:$0xff]  }
 0xbde   :  { %5517 = vmatpush3.bf16.msra.mxu1 %v5811_v25  ;;  %v5835_v25 = vld [vmem:[#allocation12 + $0x68] ss:$12 sps:$4 sm:$0xff]  }
 0xbdf   :  { %5518 = vmatprep.subr.bf16.mxu1 %v6192_v34 }
 0xbe0   :  { %4003 = vmatpush1.bf16.msra.mxu0 %v6771_v30  ;;  %v2620_v30 = vadd.f32 %v6839_v37, %v6812_v53 }
 0xbe1   :  { %4004 = vmatprep.subr.bf16.mxu0 %v6775_v55  ;;  %v2622_v55 = vadd.f32 %v6842_v22, %v6818_v13 }
 0xbe2   :  { %5519 = vmatpush3.bf16.msra.mxu1 %v5812_v27  ;;  %v7075_v27 = vld [vmem:[#allocation12 + $0x7c] ss:$12 sps:$4 sm:$0xff]  }
 0xbe3   :  { %5520 = vmatprep.subr.bf16.mxu1 %v6192_v34 }
 0xbe4   :  { %4005 = vmatpush1.bf16.msra.mxu0 %v6778_v35 }
 0xbe5   :  { %4006 = vmatprep.subr.bf16.mxu0 %v6782_v38 }
 0xbe6   :  { %5521 = vmatpush3.bf16.msra.mxu1 %v5813_v49  ;;  %v7078_v49 = vld [vmem:[#allocation12 + $0x78] ss:$12 sps:$4 sm:$0xff]  }
 0xbe7   :  { %5522 = vmatprep.subr.bf16.mxu1 %v6192_v34 }
 0xbe8   :  { %4007 = vmatpush1.bf16.msra.mxu0 %v6785_v44 }
 0xbe9   :  { %4008 = vmatprep.subr.bf16.mxu0 %v6789_v11 }
 0xbea   :  { %5523 = vmatpush3.bf16.msra.mxu1 %v5814_v29  ;;  %v5839_v29 = vld [vmem:[#allocation12 + $0x80] ss:$12 sps:$4 sm:$0xff]  }
 0xbeb   :  { %5524 = vmatprep.subr.bf16.mxu1 %v6192_v34 }
 0xbec   :  { %4009 = vmatpush1.bf16.msra.mxu0 %v6792_v52 }
 0xbed   :  { %4263 = vmatprep.subr.bf16.mxu0 %v5818_v56 }
 0xbee   :  { %5525 = vmatpush3.bf16.msra.mxu1 %v5815_v19  ;;  %v7082_v19 = vld [vmem:[#allocation12 + $0x94] ss:$12 sps:$4 sm:$0xff]  }
 0xbef   :  { %5530 = vmatprep.subr.bf16.mxu1 %v6192_v34 }
 0xca2   :  { %v3759_v35 = vpop.f32.mrb[72].mxu0  ;;  %v3800_v38 = vpop.f32.mrb[56].mxu1 }
 0xca3   :  { %v3806_v44 = vadd.f32 %v3759_v35, %v2620_v30  ;;  %v3761_v11 = vpop.f32.mrb[73].mxu0  ;;  %v5508_v52 = vpop.f32.mrb[57].mxu1  ;;  %v3820_v22 = vadd.f32 %v6858_v4, %v3800_v38  ;;  %v7085_v30 = vld [vmem:[#allocation12 + $0x90] ss:$12 sps:$4 sm:$0xff]   ;;  %v7089_v35 = vld [vmem:[#allocation12 + $0xac] ss:$12 sps:$4 sm:$0xff]  }
 0xca4   :  { %v3813_v5 = vadd.f32 %v3761_v11, %v2622_v55  ;;  %v3763_v1 = vpop.f32.mrb[74].mxu0  ;;  %v3803_v2 = vpop.f32.mrb[58].mxu1  ;;  %v5843_v55 = vld [vmem:[#allocation12 + $0x98] ss:$12 sps:$4 sm:$0xff]   ;;  %v5844_v38 = vld [vmem:[#allocation12 + $0xa8] ss:$12 sps:$4 sm:$0xff]   ;;  %v2624_v11 = vadd.f32 %v6844_v31, %v6812_v53  ;;  %v2626_v52 = vadd.f32 %v6846_v8, %v6818_v13 }
 0xca5   :  { %v5012_v7 = vmul.f32 -1.442695, %v3806_v44  ;;  %v3764_v39 = vpop.f32.mrb[75].mxu0  ;;  %v5509_v62 = vpop.f32.mrb[59].mxu1  ;;  %v5847_v44 = vld [vmem:[#allocation12 + $0xb0] ss:$12 sps:$4 sm:$0xff]  }
 0xca6   :  { %v5013_v60 = vmul.f32 -1.442695, %v3813_v5 }
 0xca7   :  { %5976 = vpow2.f32 %v5012_v7 }
 0xca8   :  { %5978 = vpow2.f32 %v5013_v60 }
 0xcb1   :  { %v5977_v61 = vpop.eup %5976 }
 0xcb2   :  { %v3810_v63 = vadd.f32 1.0, %v5977_v61  ;;  %v5979_v37 = vpop.eup %5978 }
 0xcb3   :  { %v3817_v50 = vadd.f32 1.0, %v5979_v37 }
 0xcb4   :  { %5980 = vrcp.f32 %v3810_v63 }
 0xcb5   :  { %5982 = vrcp.f32 %v3817_v50 }
 0xcbe   :  { %v5981_v47 = vpop.eup %5980 }
 0xcbf   :  { %v3821_v15 = vmul.f32 %v5981_v47, %v3820_v22  ;;  %v5983_v42 = vpop.eup %5982 }
 0xcc0   :  { %v3824_v10 = vsub.f32 1.0, %v5983_v42  ;;  %v3826_v18 = vmul.f32 %v5983_v42, %v6998_v36  ;;  %v7062_v36 = vld [vmem:[#allocation12 + $0x4c] ss:$12 sps:$4 sm:$0xff]   ;;  %v2692_v42 = vadd.f32 %v6908_v58, %v6853_v12 }
 0xcc1   :  { %v3822_v6 = vadd.f32 %v3821_v15, %v2689_v48  ;;  %v5849_v58 = vld [vmem:[#allocation12 + $0x20] ss:$12 sps:$4 sm:$0xff]  }
 0xcc3   :  { %5984 = vtanh.f32 %v3822_v6 }
 0xccd   :  { %v5985_v16 = vpop.eup %5984 }
 0xcce   :  { %v3825_v46 = vmul.f32 %v5985_v16, %v3824_v10 }
 0xcd0   :  { %v7037_v24 = vadd.f32 %v3826_v18, %v3825_v46 }
 0xcd2   :  { %3829 = vst [vmem:[#allocation13 + $0x20] sm:$0xff] %v7037_v24  ;;  %v3833_v26 = vpack.c.bf16 %v7037_v24, %v7037_v24 }
 0xcd4   :  { %4027 = vmatmul.mubr.bf16.vlgmr.msra.gmra.mrb[76].mxu0 %v3833_v26  ;;  %5527 = vmatmul.mubr.bf16.vlgmr.msra.gmra.mrb[60].mxu1 %v3833_v26 }
 0xcd5   :  { %4295 = vmatprep.mubr.bf16.mxu0 %v6191_v0  ;;  %5546 = vmatprep.mubr.msk.bf16.mxu1 %vm6193_vm0, %v6192_v34 }
 0xcd6   :  { %4264 = vmatpush1.bf16.msra.mxu0 %v7045_v17  ;;  %5531 = vmatpush3.bf16.msra.mxu1 %v5819_v43 }
 0xcd7   :  { %5532 = vmatprep.subr.bf16.mxu1 %v6192_v34  ;;  %4265 = vmatprep.subr.bf16.mxu0 %v7048_v41 }
 0xcda   :  { %4266 = vmatpush1.bf16.msra.mxu0 %v7051_v33  ;;  %5533 = vmatpush3.bf16.msra.mxu1 %v5823_v9 }
 0xcdb   :  { %5534 = vmatprep.subr.bf16.mxu1 %v6192_v34  ;;  %4267 = vmatprep.subr.bf16.mxu0 %v7055_v51 }
 0xcde   :  { %4268 = vmatpush1.bf16.msra.mxu0 %v7058_v59  ;;  %5535 = vmatpush3.bf16.msra.mxu1 %v5827_v20 }
 0xcdf   :  { %5536 = vmatprep.subr.bf16.mxu1 %v6192_v34  ;;  %4269 = vmatprep.subr.bf16.mxu0 %v7062_v36 }
 0xce2   :  { %4270 = vmatpush1.bf16.msra.mxu0 %v7065_v45  ;;  %5537 = vmatpush3.bf16.msra.mxu1 %v5831_v23 }
 0xce3   :  { %5538 = vmatprep.subr.bf16.mxu1 %v6192_v34  ;;  %4271 = vmatprep.subr.bf16.mxu0 %v7069_v32 }
 0xce6   :  { %4272 = vmatpush1.bf16.msra.mxu0 %v7072_v21  ;;  %5539 = vmatpush3.bf16.msra.mxu1 %v5835_v25 }
 0xce7   :  { %4273 = vmatprep.subr.bf16.mxu0 %v7075_v27  ;;  %5540 = vmatprep.subr.bf16.mxu1 %v6192_v34 }
 0xcea   :  { %4274 = vmatpush1.bf16.msra.mxu0 %v7078_v49  ;;  %5541 = vmatpush3.bf16.msra.mxu1 %v5839_v29 }
 0xceb   :  { %4275 = vmatprep.subr.bf16.mxu0 %v7082_v19  ;;  %5542 = vmatprep.subr.bf16.mxu1 %v6192_v34 }
 0xcee   :  { %4276 = vmatpush1.bf16.msra.mxu0 %v7085_v30  ;;  %5543 = vmatpush3.bf16.msra.mxu1 %v5843_v55 }
 0xcef   :  { %4277 = vmatprep.subr.bf16.mxu0 %v7089_v35  ;;  %5544 = vmatprep.subr.bf16.mxu1 %v6192_v34 }
 0xcf2   :  { %4278 = vmatpush1.bf16.msra.mxu0 %v5844_v38  ;;  %5545 = vmatpush3.bf16.msra.mxu1 %v5847_v44 }
 0xcf3   :  { %4532 = vmatprep.subr.bf16.mxu0 %v5818_v56  ;;  %5550 = vmatprep.subr.bf16.mxu1 %v6192_v34 }
 0xda7   :  { %v4028_v5 = vpop.f32.mrb[76].mxu0  ;;  %v4069_v1 = vpop.f32.mrb[60].mxu1 }
 0xda8   :  { %v4075_v2 = vadd.f32 %v4028_v5, %v2624_v11  ;;  %v4030_v7 = vpop.f32.mrb[77].mxu0  ;;  %v5528_v39 = vpop.f32.mrb[61].mxu1  ;;  %v4089_v8 = vadd.f32 %v6858_v4, %v4069_v1  ;;  %v2697_v5 = vadd.f32 %v6896_v54, %v6853_v12  ;;  %v2636_v54 = vadd.f32 %v6906_v57, %v6818_v13 }
 0xda9   :  { %v4082_v62 = vadd.f32 %v4030_v7, %v2626_v52  ;;  %v4032_v60 = vpop.f32.mrb[78].mxu0  ;;  %v4072_v61 = vpop.f32.mrb[62].mxu1 }
 0xdaa   :  { %v5038_v63 = vmul.f32 -1.442695, %v4075_v2  ;;  %v4033_v37 = vpop.f32.mrb[79].mxu0  ;;  %v5529_v50 = vpop.f32.mrb[63].mxu1 }
 0xdab   :  { %v5039_v22 = vmul.f32 -1.442695, %v4082_v62 }
 0xdac   :  { %5986 = vpow2.f32 %v5038_v63 }
 0xdad   :  { %5988 = vpow2.f32 %v5039_v22 }
 0xdb6   :  { %v5987_v47 = vpop.eup %5986 }
 0xdb7   :  { %v4079_v48 = vadd.f32 1.0, %v5987_v47  ;;  %v5989_v31 = vpop.eup %5988 }
 0xdb8   :  { %v4086_v15 = vadd.f32 1.0, %v5989_v31 }
 0xdb9   :  { %5990 = vrcp.f32 %v4079_v48 }
 0xdba   :  { %5992 = vrcp.f32 %v4086_v15 }
 0xdc3   :  { %v5991_v6 = vpop.eup %5990 }
 0xdc4   :  { %v4090_v10 = vmul.f32 %v5991_v6, %v4089_v8  ;;  %v5993_v46 = vpop.eup %5992 }
 0xdc5   :  { %v4093_v18 = vsub.f32 1.0, %v5993_v46  ;;  %v4095_v43 = vmul.f32 %v5993_v46, %v7037_v24  ;;  %v5850_v24 = vld [vmem:[#allocation12 + $0x38] ss:$12 sps:$4 sm:$0xff]  }
 0xdc6   :  { %v4091_v16 = vadd.f32 %v4090_v10, %v2692_v42 }
 0xdc8   :  { %5994 = vtanh.f32 %v4091_v16 }
 0xdd2   :  { %v5995_v26 = vpop.eup %5994 }
 0xdd3   :  { %v4094_v56 = vmul.f32 %v5995_v26, %v4093_v18 }
 0xdd5   :  { %v7103_v9 = vadd.f32 %v4095_v43, %v4094_v56  ;;  %v2700_v43 = vadd.f32 %v6904_v14, %v6853_v12 }
 0xdd7   :  { %4098 = vst [vmem:[#allocation13 + $0x28] sm:$0xff] %v7103_v9  ;;  %v4102_v20 = vpack.c.bf16 %v7103_v9, %v7103_v9 }
 0xdd9   :  { %4296 = vmatmul.mubr.bf16.vlgmr.msra.gmra.mrb[80].mxu0 %v4102_v20  ;;  %5547 = vmatmul.mubr.bf16.vlgmr.msra.gmra.mrb[64].mxu1 %v4102_v20 }
 0xdda   :  { %4533 = vmatpush1.bf16.msra.mxu0 %v7045_v17  ;;  %4564 = vmatprep.mubr.bf16.mxu0 %v6191_v0  ;;  %v5848_v0 = vld [vmem:[#allocation12 + $0x8] ss:$12 sps:$4 sm:$0xff]   ;;  %v5851_v17 = vld [vmem:[#allocation12 + $0x50] ss:$12 sps:$4 sm:$0xff]  }
 0xddb   :  { %4534 = vmatprep.subr.bf16.mxu0 %v7048_v41  ;;  %5566 = vmatprep.mubr.msk.bf16.mxu1 %vm6193_vm0, %v6192_v34  ;;  %v5852_v41 = vld [vmem:[#allocation12 + $0x68] ss:$12 sps:$4 sm:$0xff]  }
 0xddc   :  { %5551 = vmatpush3.bf16.msra.mxu1 %v5848_v0 }
 0xddd   :  { %5552 = vmatprep.subr.bf16.mxu1 %v6192_v34 }
 0xdde   :  { %4535 = vmatpush1.bf16.msra.mxu0 %v7051_v33  ;;  %v5853_v33 = vld [vmem:[#allocation12 + $0x80] ss:$12 sps:$4 sm:$0xff]  }
 0xddf   :  { %4536 = vmatprep.subr.bf16.mxu0 %v7055_v51  ;;  %v5854_v51 = vld [vmem:[#allocation12 + $0x98] ss:$12 sps:$4 sm:$0xff]  }
 0xde0   :  { %5553 = vmatpush3.bf16.msra.mxu1 %v5849_v58 }
 0xde1   :  { %5554 = vmatprep.subr.bf16.mxu1 %v6192_v34 }
 0xde2   :  { %4537 = vmatpush1.bf16.msra.mxu0 %v7058_v59  ;;  %v5855_v59 = vld [vmem:[#allocation12 + $0xb0] ss:$12 sps:$4 sm:$0xff]  }
 0xde3   :  { %4538 = vmatprep.subr.bf16.mxu0 %v7062_v36  ;;  %v2630_v36 = vadd.f32 %v6894_v40, %v6812_v53 }
 0xde4   :  { %5555 = vmatpush3.bf16.msra.mxu1 %v5850_v24 }
 0xde5   :  { %5556 = vmatprep.subr.bf16.mxu1 %v6192_v34 }
 0xde6   :  { %4539 = vmatpush1.bf16.msra.mxu0 %v7065_v45  ;;  %v2632_v45 = vadd.f32 %v6898_v3, %v6818_v13  ;;  %v6017_v13 = vld [vmem:[%s7194_s8] ss:$0 sm:$0xff]  ;;  %s6128_s8 = scalar_lea.vmem %s4645_s0, 1024 }
 0xde7   :  { %4540 = vmatprep.subr.bf16.mxu0 %v7069_v32  ;;  %p6129_p12 = scmp.ne.s32.totalorder %s4645_s0, %s6128_s8  ;;  %p6134_p0 = scmp.lt.s32.totalorder %s6128_s8, %s6128_s8 }
 0xde8   :  { %5557 = vmatpush3.bf16.msra.mxu1 %v5851_v17 }
 0xde9   :  { %5558 = vmatprep.subr.bf16.mxu1 %v6192_v34  ;;  %p6135_p1 = por %p6134_p0, %p6133_p13 }
 0xdea   :  { %4541 = vmatpush1.bf16.msra.mxu0 %v7072_v21 }
 0xdeb   :  { %4542 = vmatprep.subr.bf16.mxu0 %v7075_v27  ;;  %p6136_p2 = pnand %p6135_p1, %p6129_p12 }
 0xdec   :  { %5559 = vmatpush3.bf16.msra.mxu1 %v5852_v41 }
 0xded   :  { %5560 = vmatprep.subr.bf16.mxu1 %v6192_v34 }
 0xdee   :  { %4543 = vmatpush1.bf16.msra.mxu0 %v7078_v49 }
 0xdef   :  { %4544 = vmatprep.subr.bf16.mxu0 %v7082_v19 }
 0xdf0   :  { %5561 = vmatpush3.bf16.msra.mxu1 %v5853_v33 }
 0xdf1   :  { %5562 = vmatprep.subr.bf16.mxu1 %v6192_v34 }
 0xdf2   :  { %4545 = vmatpush1.bf16.msra.mxu0 %v7085_v30 }
 0xdf3   :  { %4546 = vmatprep.subr.bf16.mxu0 %v7089_v35 }
 0xdf4   :  { %5563 = vmatpush3.bf16.msra.mxu1 %v5854_v51 }
 0xdf5   :  { %5564 = vmatprep.subr.bf16.mxu1 %v6192_v34 }
 0xdf6   :  { %4547 = vmatpush1.bf16.msra.mxu0 %v5844_v38 }
 0xdf8   :  { %5565 = vmatpush3.bf16.msra.mxu1 %v5855_v59 }
 0xeac   :  { %v4297_v23 = vpop.f32.mrb[80].mxu0  ;;  %v4338_v32 = vpop.f32.mrb[64].mxu1 }
 0xead   :  { %v4344_v21 = vadd.f32 %v4297_v23, %v2630_v36  ;;  %v4299_v25 = vpop.f32.mrb[81].mxu0  ;;  %v5548_v27 = vpop.f32.mrb[65].mxu1  ;;  %v4358_v3 = vadd.f32 %v6858_v4, %v4338_v32  ;;  %v2634_v4 = vadd.f32 %v6902_v28, %v6812_v53 }
 0xeae   :  { %v4351_v49 = vadd.f32 %v4299_v25, %v2632_v45  ;;  %v4301_v29 = vpop.f32.mrb[82].mxu0  ;;  %v4341_v19 = vpop.f32.mrb[66].mxu1 }
 0xeaf   :  { %v5064_v30 = vmul.f32 -1.442695, %v4344_v21  ;;  %v4302_v55 = vpop.f32.mrb[83].mxu0  ;;  %v5549_v35 = vpop.f32.mrb[67].mxu1 }
 0xeb0   :  { %v5065_v34 = vmul.f32 -1.442695, %v4351_v49 }
 0xeb1   :  { %5996 = vpow2.f32 %v5064_v30 }
 0xeb2   :  { %5998 = vpow2.f32 %v5065_v34 }
 0xebb   :  { %v5997_v38 = vpop.eup %5996 }
 0xebc   :  { %v4348_v44 = vadd.f32 1.0, %v5997_v38  ;;  %v5999_v40 = vpop.eup %5998 }
 0xebd   :  { %v4355_v11 = vadd.f32 1.0, %v5999_v40 }
 0xebe   :  { %6000 = vrcp.f32 %v4348_v44 }
 0xebf   :  { %6002 = vrcp.f32 %v4355_v11 }
 0xec8   :  { %v6001_v52 = vpop.eup %6000 }
 0xec9   :  { %v4359_v1 = vmul.f32 %v6001_v52, %v4358_v3  ;;  %v6003_v7 = vpop.eup %6002 }
 0xeca   :  { %v4362_v39 = vsub.f32 1.0, %v6003_v7  ;;  %v4364_v61 = vmul.f32 %v6003_v7, %v7103_v9 }
 0xecb   :  { %v4360_v2 = vadd.f32 %v4359_v1, %v2697_v5 }
 0xecd   :  { %6004 = vtanh.f32 %v4360_v2 }
 0xed7   :  { %v6005_v62 = vpop.eup %6004 }
 0xed8   :  { %v4363_v60 = vmul.f32 %v6005_v62, %v4362_v39 }
 0xeda   :  { %v4365_v63 = vadd.f32 %v4364_v61, %v4363_v60 }
 0xedc   :  { %4367 = vst [vmem:[#allocation13 + $0x30] sm:$0xff] %v4365_v63  ;;  %v4371_v37 = vpack.c.bf16 %v4365_v63, %v4365_v63 }
 0xede   :  { %4565 = vmatmul.mubr.bf16.vlgmr.msra.gmra.mrb[84].mxu0 %v4371_v37  ;;  %5567 = vmatmul.mubr.bf16.vlgmr.msra.gmra.mrb[68].mxu1 %v4371_v37 }
 0xfb1   :  { %v4566_v50 = vpop.f32.mrb[84].mxu0  ;;  %v4607_v22 = vpop.f32.mrb[68].mxu1 }
 0xfb2   :  { %v4613_v47 = vadd.f32 %v4566_v50, %v2634_v4  ;;  %v4568_v48 = vpop.f32.mrb[85].mxu0  ;;  %v5568_v31 = vpop.f32.mrb[69].mxu1  ;;  %v4627_v57 = vadd.f32 %v6017_v13, %v4607_v22 }
 0xfb3   :  { %v4620_v15 = vadd.f32 %v4568_v48, %v2636_v54  ;;  %v4570_v8 = vpop.f32.mrb[86].mxu0  ;;  %v4610_v6 = vpop.f32.mrb[70].mxu1 }
 0xfb4   :  { %v5090_v42 = vmul.f32 -1.442695, %v4613_v47  ;;  %v4571_v10 = vpop.f32.mrb[87].mxu0  ;;  %v5569_v16 = vpop.f32.mrb[71].mxu1 }
 0xfb5   :  { %v5091_v46 = vmul.f32 -1.442695, %v4620_v15 }
 0xfb6   :  { %6006 = vpow2.f32 %v5090_v42 }
 0xfb7   :  { %6008 = vpow2.f32 %v5091_v46 }
 0xfc0   :  { %v6007_v18 = vpop.eup %6006 }
 0xfc1   :  { %v4617_v26 = vadd.f32 1.0, %v6007_v18  ;;  %v6009_v53 = vpop.eup %6008 }
 0xfc2   :  { %v4624_v28 = vadd.f32 1.0, %v6009_v53 }
 0xfc3   :  { %6010 = vrcp.f32 %v4617_v26 }
 0xfc4   :  { %6012 = vrcp.f32 %v4624_v28 }
 0xfcd   :  { %v6011_v56 = vpop.eup %6010 }
 0xfce   :  { %v4628_v9 = vmul.f32 %v6011_v56, %v4627_v57  ;;  %v6013_v0 = vpop.eup %6012 }
 0xfcf   :  { %v4631_v58 = vsub.f32 1.0, %v6013_v0  ;;  %v4633_v41 = vmul.f32 %v6013_v0, %v4365_v63 }
 0xfd0   :  { %v4629_v20 = vadd.f32 %v4628_v9, %v2700_v43 }
 0xfd2   :  { %6014 = vtanh.f32 %v4629_v20 }
 0xfdc   :  { %v6015_v24 = vpop.eup %6014 }
 0xfdd   :  { %v4632_v17 = vmul.f32 %v6015_v24, %v4631_v58 }
 0xfdf   :  { %v4634_v33 = vadd.f32 %v4633_v41, %v4632_v17 }
 0xfe1   :  { %4636 = vst [vmem:[#allocation13 + $0x38] sm:$0xff] %v4634_v33  ;;  %4638 = vst [vmem:[#allocation14 + $0x8] sm:$0xff] %v4634_v33 }
 0xfe2   :  { %6139 = shalt.err (!%p6136_p2)
}
 0xfe3   :  { %s6140_s11 = scalar_lea.hbm %s7195_s9, 1024 }
 0xfe4   :  { %p6141_p3 = scmp.ne.s32.totalorder %s7195_s9, %s6140_s11  ;;  %p6144_p4 = scmp.lt.u32.totalorder %s6140_s11, %s7195_s9 }
 0xfe6   :  { %p6146_p5 = pnand %p6144_p4, %p6141_p3 }
 0xfe8   :  { %6149 = shalt.err (!%p6146_p5)
}
 0xfe9   :  { %4650 = dma.vmem_to_hbm [thread:$0]  %s4645_s0, 1024, %s7195_s9, [#allocation6], %s6187_s5, %s6187_s5, %s6188_s28  }
 0xfea   :  { %s6150_s16 = scalar_lea.vmem %s7149_s26, 256  ;;  %p6155_p7 = scmp.lt.s32.totalorder %s7149_s26, %s7149_s26 }
 0xfeb   :  { %p6151_p6 = scmp.ne.s32.totalorder %s7149_s26, %s6150_s16  ;;  %p6156_p8 = scmp.lt.s32.totalorder %s6150_s16, %s6150_s16 }
 0xfed   :  { %p6157_p9 = por %p6156_p8, %p6155_p7 }
 0xfef   :  { %p6158_p10 = pnand %p6157_p9, %p6151_p6 }
 0xff1   :  { %6161 = shalt.err (!%p6158_p10)
}
 0xff2   :  { %s6162_s3 = scalar_lea.hbm %s7196_s10, 256 }
 0xff3   :  { %p6163_p11 = scmp.ne.s32.totalorder %s7196_s10, %s6162_s3  ;;  %p6166_p12 = scmp.lt.u32.totalorder %s6162_s3, %s7196_s10 }
 0xff5   :  { %p6168_p13 = pnand %p6166_p12, %p6163_p11 }
 0xff7   :  { %6171 = shalt.err (!%p6168_p13)
}
 0xff8   :  { %4662 = dma.vmem_to_hbm [thread:$0]  %s7149_s26, 256, %s7196_s10, [#allocation15], %s6187_s5, %s6187_s5, %s6188_s28  }
 0xff9   :  { %6178 = dma.done.wait [#allocation6], 1024  }
 0xffa   :  { %6179 = vsyncadd [#allocation6], 4294966272 }
 0xffb   :  { %6180 = dma.done.wait [#allocation15], 256  }
 0xffc   :  { %6181 = vsyncadd [#allocation15], 4294967040 }
 0xffd   :  { %4669 = vsyncpa [#allocation5], 1 }
 0xffe   :  { %4670 = vsyncpa [#allocation8], 1 }
 0xfff   :  { %4671 = vsyncpa [#allocation11], 1 }
0x1000   :  { %4672 = vsyncpa [#allocation6], 1 }
0x1001   :  { %4673 = vsyncpa [#allocation15], 1 }

</bundles_post_ra>
